<compile_context>
chip_gen: v5e
topology: v5e:2x2
jax: 0.10.0
libtpu: 0.0.40
codegen_flags: <defaults>
</compile_context>

<pallas_src>
import math

import jax
import jax.numpy as jnp
from jax import lax
from jax.experimental import pallas as pl
from jax.experimental.pallas import tpu as pltpu

# ----------------------------- configuration ---------------------------------
B = 2            # batch
T_IN = 8         # encoder input sequence length
JOINTS = 29
FEAT = JOINTS * 3          # 87
LNF = 32         # linear_num_features
NHEAD = 4
LATENT = 16
NUNITS = 32
SEQ_LEN = 8      # decoder output sequence length
OUTW = FEAT * SEQ_LEN      # 696 (flattened decoder output per sample)
OUTW_PAD = 768             # padded to a multiple of 128 lanes (unmasked stores)


# ------------------------------- fused kernel --------------------------------
def _lstm_cell(gates, n, c_prev=None):
    """PyTorch LSTM cell, gate order [i | f | g | o].  Activations are evaluated once on
    the full 4n-wide vector (2 EUP vreg passes) and then statically lane-sliced."""
    sg = jax.nn.sigmoid(gates)
    th = jnp.tanh(gates)
    i = sg[:, :n]
    f = sg[:, n:2 * n]
    g = th[:, 2 * n:3 * n]
    o = sg[:, 3 * n:]
    c_new = i * g if c_prev is None else f * c_prev + i * g
    return o * jnp.tanh(c_new), c_new


def fused_vae_kernel(d1_ref, d2_ref, bpe_ref, eps_ref,
                     w_lin_ref,
                     w_qkv_ref, b_qkv_ref, w_o_ref, b_o_ref,
                     e_wih0_ref, e_b0_ref, e_wf_ref, e_whh1_ref, e_b1_ref,
                     w_ml_ref, b_ml_ref,
                     w_dec_ref, b_dec_ref,
                     d_wih0_ref, d_b0_ref, d_wf_ref, d_whh1_ref, d_b1_ref,
                     w_cv_ref, b_cv_ref,
                     out_ref, ml_ref):
    f32 = jnp.float32
    BM, T = d1_ref.shape[0], d1_ref.shape[1]
    F = w_lin_ref.shape[1]          # 32
    H = NHEAD
    dh = F // H
    LAT = eps_ref.shape[1]
    U = w_dec_ref.shape[1]
    F4, U4 = 4 * F, 4 * U
    S = w_cv_ref.shape[0] // U      # decoder sequence length

    def mm(a, w_ref):
        w = w_ref[...]
        return jnp.dot(a.astype(w.dtype), w, preferred_element_type=f32)

    # ---- front end: proximity -> Linear(87->F) + (bias + per-batch PE) ----
    prox = jnp.abs(d1_ref[...] - d2_ref[...]).reshape(BM * T, d1_ref.shape[2])  # (BM*T, 87)
    x = mm(prox, w_lin_ref) + bpe_ref[...].reshape(BM * T, F)                   # (BM*T, F)

    # ---- multi-head self-attention: fused QKV, per-(batch,head) softmax, fused out-proj
    qkv = mm(x, w_qkv_ref) + b_qkv_ref[...]                                     # (BM*T, 3F)
    scale = 1.0 / math.sqrt(dh)
    ctx_rows = []
    for b in range(BM):
        r0 = b * T
        q = qkv[r0:r0 + T, 0:F] * scale
        k = qkv[r0:r0 + T, F:2 * F]
        v = qkv[r0:r0 + T, 2 * F:3 * F]
        heads = []
        for h in range(H):
            lo = h * dh
            s = lax.dot_general(q[:, lo:lo + dh], k[:, lo:lo + dh],
                                (((1,), (1,)), ((), ())),
                                preferred_element_type=f32)                     # (T, T)
            s = s - jnp.max(s, axis=-1, keepdims=True)
            p = jnp.exp(s)
            p = p * pl.reciprocal(jnp.sum(p, axis=-1, keepdims=True), approx=True)
            heads.append(jnp.dot(p, v[:, lo:lo + dh], preferred_element_type=f32))
        ctx_rows.append(jnp.concatenate(heads, axis=1))                         # (T, F)
    ctx = jnp.concatenate(ctx_rows, axis=0)                                     # (BM*T, F)
    a = mm(ctx, w_o_ref) + b_o_ref[...]                                         # (BM*T, F)

    # ---- encoder 2-layer LSTM (layer-0 input proj hoisted, [W_ih1|W_hh0] fused) ----
    xw0 = (mm(a, e_wih0_ref) + e_b0_ref[...]).reshape(BM, T, F4)
    # t = 0 peeled: all hidden/cell states are zero -> no hidden-state matmuls
    h0, c0 = _lstm_cell(xw0[:, 0, :], F)
    y = mm(h0, e_wf_ref)                                   # (BM, 8F): [ih1 now | hh0 next]
    h1, c1 = _lstm_cell(y[:, :F4] + e_b1_ref[...], F)
    hh0 = y[:, F4:]
    for t in range(1, T):
        h0, c0 = _lstm_cell(xw0[:, t, :] + hh0, F, c0)
        y = mm(h0, e_wf_ref)
        h1, c1 = _lstm_cell(y[:, :F4] + mm(h1, e_whh1_ref) + e_b1_ref[...], F, c1)
        hh0 = y[:, F4:]

    # ---- fused latent heads (mean | log_var) + reparameterization ----
    ml = mm(h1, w_ml_ref) + b_ml_ref[...]                  # (BM, 2*LAT), lane-packed
    ml_ref[...] = ml
    mean = ml[:, :LAT]
    log_var = ml[:, LAT:]
    z = mean + jnp.exp(0.5 * log_var) * eps_ref[...]

    # ---- decoder Linear(latent -> n_units) + ReLU ----
    x0 = jnp.maximum(mm(z, w_dec_ref) + b_dec_ref[...], 0.0)                    # (BM, U)

    # ---- decoder 2-layer LSTM (constant repeated input hoisted, fused weights) ----
    xw0d = mm(x0, d_wih0_ref) + d_b0_ref[...]                                   # (BM, 4U)
    h0, c0 = _lstm_cell(xw0d, U)
    y = mm(h0, d_wf_ref)
    h1, c1 = _lstm_cell(y[:, :U4] + d_b1_ref[...], U)
    hs = [h1]
    hh0 = y[:, U4:]
    for t in range(1, S):
        h0, c0 = _lstm_cell(xw0d + hh0, U, c0)
        y = mm(h0, d_wf_ref)
        h1, c1 = _lstm_cell(y[:, :U4] + mm(h1, d_whh1_ref) + d_b1_ref[...], U, c1)
        hs.append(h1)
        hh0 = y[:, U4:]

    # ---- folded Conv1d + both raw reshapes: ONE (BM, S*U) x (S*U, OUTW_PAD) matmul ----
    h_flat = jnp.concatenate(hs, axis=1)                                        # (BM, 256)
    out_ref[...] = (mm(h_flat, w_cv_ref) + b_cv_ref[...]).astype(out_ref.dtype)


# ------------------------------ pallas_call wrapper ---------------------------
def _rep_spec(shape):
    nd = len(shape)
    return pl.BlockSpec(shape, lambda i, _nd=nd: (0,) * _nd)       # whole array, resident


def _batch_spec(block_shape):
    nd = len(block_shape)
    return pl.BlockSpec(block_shape, lambda i, _nd=nd: (i,) + (0,) * (_nd - 1))


def positional_encoding_rows(num_rows, d_model):
    # pe[:num_rows, 0, :d_model]: the reference indexes pe by the FIRST dim of a
    # batch-first tensor, i.e. by batch index, and broadcasts it over time.
    pos = jnp.arange(num_rows, dtype=jnp.float32)[:, None]
    div = jnp.exp(jnp.arange(0, d_model, 2, dtype=jnp.float32)
                  * (-math.log(10000.0) / d_model))
    ang = pos * div
    pe = jnp.stack([jnp.sin(ang), jnp.cos(ang)], axis=-1).reshape(num_rows, d_model)
    return pe.astype(jnp.float32)


def vae_for_duet_forward(d1, d2, kp, eps, *, block_batch=None):
    """block_batch=None (default): whole batch in one grid step (best on single-TC
    v5e/v6e).  block_batch=1: grid=(B,) with 'parallel' semantics for v7x's two TCs."""
    Bb, T = d1.shape[0], d1.shape[1]
    BM = Bb if block_batch is None else int(block_batch)
    assert Bb % BM == 0
    d1f = d1.reshape(Bb, T, -1).astype(jnp.float32)
    d2f = d2.reshape(Bb, T, -1).astype(jnp.float32)
    pe = positional_encoding_rows(Bb, LNF)
    # encoder-linear bias and the per-batch PE row pre-combined (one VPU add saved)
    bias_pe = jnp.broadcast_to((pe + kp["b_lin"][None, :])[:, None, :], (Bb, T, LNF))

    batch_inputs = (d1f, d2f, bias_pe, eps.astype(jnp.float32))
    batch_specs = [_batch_spec((BM, T, FEAT)), _batch_spec((BM, T, FEAT)),
                   _batch_spec((BM, T, LNF)), _batch_spec((BM, LATENT))]
    weight_order = ("w_lin", "w_qkv", "b_qkv", "w_o", "b_o",
                    "e_wih0", "e_b0", "e_wf", "e_whh1", "e_b1",
                    "w_ml", "b_ml", "w_dec", "b_dec",
                    "d_wih0", "d_b0", "d_wf", "d_whh1", "d_b1",
                    "w_cv", "b_cv")
    weight_inputs = tuple(kp[k] for k in weight_order)
    weight_specs = [_rep_spec(w.shape) for w in weight_inputs]

    out_pad, ml = pl.pallas_call(
        fused_vae_kernel,
        out_shape=(jax.ShapeDtypeStruct((Bb, OUTW_PAD), jnp.float32),
                   jax.ShapeDtypeStruct((Bb, 2 * LATENT), jnp.float32)),
        grid=(Bb // BM,),
        in_specs=batch_specs + weight_specs,
        out_specs=(pl.BlockSpec((BM, OUTW_PAD), lambda i: (i, 0)),
                   pl.BlockSpec((BM, 2 * LATENT), lambda i: (i, 0))),
        compiler_params=pltpu.CompilerParams(dimension_semantics=("parallel",)),
    )(*batch_inputs, *weight_inputs)

    out = out_pad[:, :OUTW].reshape(Bb, SEQ_LEN, FEAT)   # drop lane padding; raw reshape
    mean = ml[:, :LATENT]
    log_var = ml[:, LATENT:]
    return out, mean, log_var


# ------------------------- parameter preparation / folding --------------------
def fold_conv_to_matmul(w_conv, b_conv, seq_len, out_pad):
    """Fold Conv1d(CI->CO, k=3, pad=1) together with BOTH raw PyTorch reshapes around it
    into one (seq_len*CI, out_pad) matmul on the lane-concatenated decoder LSTM states."""
    CO, CI, K = w_conv.shape
    L = seq_len
    w_big = jnp.zeros((CI, L, CO, L), jnp.float32)
    for kk in range(K):
        # tap kk reads (zero-padded) input position m = l + kk - 1
        shift = jnp.eye(L, L, k=1 - kk, dtype=jnp.float32)
        w_big = w_big + jnp.einsum("oc,ml->cmol", w_conv[:, :, kk], shift)
    # row index g = ci*L + m  ==  t*CI + u (raw-reshape identity), i.e. exactly the
    # lane-concatenated [h1_0 | h1_1 | ... | h1_{L-1}] ordering used in the kernel.
    w2d = w_big.reshape(CI * L, CO * L)
    b_flat = jnp.repeat(b_conv, L)
    w2d = jnp.pad(w2d, ((0, 0), (0, out_pad - CO * L)))
    b_flat = jnp.pad(b_flat, (0, out_pad - CO * L))
    return w2d, b_flat[None, :]


def prepare_kernel_params(tp, weight_dtype=jnp.bfloat16):
    """PyTorch-layout params -> fused/transposed/folded kernel layout.  Matmul weights in
    bf16 (half the parameter DMA; MXU is natively bf16, accumulation stays f32)."""
    f32 = jnp.float32
    wd = lambda x: x.astype(weight_dtype)
    kp = {
        "w_lin": wd(tp["lin_w"].T),
        "b_lin": tp["lin_b"].astype(f32),
        "w_qkv": wd(tp["attn_in_w"].T),          # columns [q | k | v], head-major inside
        "b_qkv": tp["attn_in_b"][None, :].astype(f32),
        "w_o": wd(tp["attn_out_w"].T),
        "b_o": tp["attn_out_b"][None, :].astype(f32),
        "e_wih0": wd(tp["enc_wih"][0].T),
        "e_b0": (tp["enc_bih"][0] + tp["enc_bhh"][0])[None, :].astype(f32),
        "e_wf": wd(jnp.concatenate([tp["enc_wih"][1].T, tp["enc_whh"][0].T], axis=1)),
        "e_whh1": wd(tp["enc_whh"][1].T),
        "e_b1": (tp["enc_bih"][1] + tp["enc_bhh"][1])[None, :].astype(f32),
        "w_ml": wd(jnp.concatenate([tp["mean_w"].T, tp["lv_w"].T], axis=1)),
        "b_ml": jnp.concatenate([tp["mean_b"], tp["lv_b"]])[None, :].astype(f32),
        "w_dec": wd(tp["dec_lin_w"].T),
        "b_dec": tp["dec_lin_b"][None, :].astype(f32),
        "d_wih0": wd(tp["dec_wih"][0].T),
        "d_b0": (tp["dec_bih"][0] + tp["dec_bhh"][0])[None, :].astype(f32),
        "d_wf": wd(jnp.concatenate([tp["dec_wih"][1].T, tp["dec_whh"][0].T], axis=1)),
        "d_whh1": wd(tp["dec_whh"][1].T),
        "d_b1": (tp["dec_bih"][1] + tp["dec_bhh"][1])[None, :].astype(f32),
    }
    w_cv, b_cv = fold_conv_to_matmul(tp["conv_w"], tp["conv_b"], SEQ_LEN, OUTW_PAD)
    kp["w_cv"] = wd(w_cv)
    kp["b_cv"] = b_cv.astype(f32)
    return kp


# ---------------------- pure-JAX reference (PyTorch semantics) -----------------
def reference_forward(d1, d2, tp, eps):
    f32 = jnp.float32
    Bb, T = d1.shape[0], d1.shape[1]
    F, H, dh = LNF, NHEAD, LNF // NHEAD

    def lstm_layer(xseq, wih, whh, bih, bhh):
        n = whh.shape[1]
        h = jnp.zeros((xseq.shape[0], n), f32)
        c = jnp.zeros_like(h)
        outs = []
        for t in range(xseq.shape[1]):
            g = xseq[:, t] @ wih.T + h @ whh.T + bih + bhh
            i, f, gg, o = jnp.split(g, 4, axis=-1)
            c = jax.nn.sigmoid(f) * c + jax.nn.sigmoid(i) * jnp.tanh(gg)
            h = jax.nn.sigmoid(o) * jnp.tanh(c)
            outs.append(h)
        return jnp.stack(outs, axis=1), h

    x = jnp.abs(d1 - d2).reshape(Bb, T, -1).astype(f32)
    x = x @ tp["lin_w"].T + tp["lin_b"]
    x = x + positional_encoding_rows(Bb, F)[:, None, :]     # pe indexed by batch (PyTorch)
    wq, wk, wv = jnp.split(tp["attn_in_w"], 3, axis=0)
    bq, bk, bv = jnp.split(tp["attn_in_b"], 3, axis=0)
    q = (x @ wq.T + bq).reshape(Bb, T, H, dh).transpose(0, 2, 1, 3)
    k = (x @ wk.T + bk).reshape(Bb, T, H, dh).transpose(0, 2, 1, 3)
    v = (x @ wv.T + bv).reshape(Bb, T, H, dh).transpose(0, 2, 1, 3)
    s = jnp.einsum("bhqd,bhkd->bhqk", q, k) / math.sqrt(dh)
    p = jax.nn.softmax(s, axis=-1)
    ctx = jnp.einsum("bhqk,bhkd->bhqd", p, v).transpose(0, 2, 1, 3).reshape(Bb, T, F)
    attn = ctx @ tp["attn_out_w"].T + tp["attn_out_b"]
    enc_l0, _ = lstm_layer(attn, tp["enc_wih"][0], tp["enc_whh"][0],
                           tp["enc_bih"][0], tp["enc_bhh"][0])
    _, h_last = lstm_layer(enc_l0, tp["enc_wih"][1], tp["enc_whh"][1],
                           tp["enc_bih"][1], tp["enc_bhh"][1])
    mean = h_last @ tp["mean_w"].T + tp["mean_b"]
    log_var = h_last @ tp["lv_w"].T + tp["lv_b"]
    z = mean + jnp.exp(0.5 * log_var) * eps
    x0 = jax.nn.relu(z @ tp["dec_lin_w"].T + tp["dec_lin_b"])
    xrep = jnp.broadcast_to(x0[:, None, :], (Bb, SEQ_LEN, NUNITS))
    dec_l0, _ = lstm_layer(xrep, tp["dec_wih"][0], tp["dec_whh"][0],
                           tp["dec_bih"][0], tp["dec_bhh"][0])
    dec_l1, _ = lstm_layer(dec_l0, tp["dec_wih"][1], tp["dec_whh"][1],
                           tp["dec_bih"][1], tp["dec_bhh"][1])
    lo = dec_l1.reshape(Bb, NUNITS, SEQ_LEN)                # raw reshape, as in PyTorch
    lo = lax.conv_general_dilated(lo, tp["conv_w"], (1,), [(1, 1)],
                                  dimension_numbers=("NCH", "OIH", "NCH"))
    lo = lo + tp["conv_b"][None, :, None]
    out = lo.reshape(Bb, SEQ_LEN, FEAT)                     # raw reshape, as in PyTorch
    return out, mean, log_var


# --------------------------------- init ---------------------------------------
def _uniform(key, shape, fan_in):
    k = 1.0 / math.sqrt(fan_in)
    return jax.random.uniform(key, shape, jnp.float32, -k, k)


def init_torch_params(key):
    ks = iter(jax.random.split(key, 40))
    nxt = lambda: next(ks)
    p = {}
    p["lin_w"] = _uniform(nxt(), (LNF, FEAT), FEAT)
    p["lin_b"] = _uniform(nxt(), (LNF,), FEAT)
    p["attn_in_w"] = _uniform(nxt(), (3 * LNF, LNF), LNF)      # [q; k; v] rows (PyTorch)
    p["attn_in_b"] = _uniform(nxt(), (3 * LNF,), LNF)
    p["attn_out_w"] = _uniform(nxt(), (LNF, LNF), LNF)
    p["attn_out_b"] = _uniform(nxt(), (LNF,), LNF)
    p["enc_wih"] = jnp.stack([_uniform(nxt(), (4 * LNF, LNF), LNF) for _ in range(2)])
    p["enc_whh"] = jnp.stack([_uniform(nxt(), (4 * LNF, LNF), LNF) for _ in range(2)])
    p["enc_bih"] = jnp.stack([_uniform(nxt(), (4 * LNF,), LNF) for _ in range(2)])
    p["enc_bhh"] = jnp.stack([_uniform(nxt(), (4 * LNF,), LNF) for _ in range(2)])
    p["mean_w"] = _uniform(nxt(), (LATENT, LNF), LNF)
    p["mean_b"] = _uniform(nxt(), (LATENT,), LNF)
    p["lv_w"] = _uniform(nxt(), (LATENT, LNF), LNF)
    p["lv_b"] = _uniform(nxt(), (LATENT,), LNF)
    p["dec_lin_w"] = _uniform(nxt(), (NUNITS, LATENT), LATENT)
    p["dec_lin_b"] = _uniform(nxt(), (NUNITS,), LATENT)
    p["dec_wih"] = jnp.stack([_uniform(nxt(), (4 * NUNITS, NUNITS), NUNITS) for _ in range(2)])
    p["dec_whh"] = jnp.stack([_uniform(nxt(), (4 * NUNITS, NUNITS), NUNITS) for _ in range(2)])
    p["dec_bih"] = jnp.stack([_uniform(nxt(), (4 * NUNITS,), NUNITS) for _ in range(2)])
    p["dec_bhh"] = jnp.stack([_uniform(nxt(), (4 * NUNITS,), NUNITS) for _ in range(2)])
    p["conv_w"] = _uniform(nxt(), (FEAT, NUNITS, 3), NUNITS * 3)   # (CO, CI, K)
    p["conv_b"] = _uniform(nxt(), (FEAT,), NUNITS * 3)
    return p


# ---------------------------------- main --------------------------------------
if __name__ == "__main__":
    key = jax.random.PRNGKey(0)
    k_d1, k_d2, k_eps, k_par = jax.random.split(key, 4)

    d1 = jax.random.normal(k_d1, (B, T_IN, JOINTS, 3), jnp.float32)
    d2 = jax.random.normal(k_d2, (B, T_IN, JOINTS, 3), jnp.float32)
    # TODO(synk): torch.randn in sample_z is host-side RNG; it is supplied here as the
    # explicit, deterministic `eps` input instead of being drawn inside the kernel.
    eps = jax.random.normal(k_eps, (B, LATENT), jnp.float32)

    torch_params = init_torch_params(k_par)
    kernel_params = prepare_kernel_params(torch_params)        # bf16 matmul weights

    fwd = jax.jit(vae_for_duet_forward, static_argnames=("block_batch",))
    out, mean, log_var = fwd(d1, d2, kernel_params, eps)
    jax.block_until_ready((out, mean, log_var))

    assert out.shape == (B, SEQ_LEN, FEAT)
    assert mean.shape == (B, LATENT) and log_var.shape == (B, LATENT)

    # validate conv fold / weight fusions against a pure-JAX f32 reference; the kernel's
    # bf16 weights + approx reciprocal bound the deviation to ~1e-2 at these magnitudes.
    r_out, r_mean, r_lv = jax.jit(reference_forward)(d1, d2, torch_params, eps)
    err = max(float(jnp.max(jnp.abs(out - r_out))),
              float(jnp.max(jnp.abs(mean - r_mean))),
              float(jnp.max(jnp.abs(log_var - r_lv))))
    assert err < 0.1, f"kernel deviates from reference: max abs err = {err}"

    print("KERNEL_OK")
</pallas_src>

<mosaic_0001>
module attributes {stable_mosaic.version = 11 : i64} {
  func.func @fused_vae_kernel(%arg0: i32, %arg1: memref<2x8x87xf32, #tpu.memory_space<vmem>>, %arg2: memref<2x8x87xf32, #tpu.memory_space<vmem>>, %arg3: memref<2x8x32xf32, #tpu.memory_space<vmem>>, %arg4: memref<2x16xf32, #tpu.memory_space<vmem>>, %arg5: memref<87x32xbf16, #tpu.memory_space<vmem>>, %arg6: memref<32x96xbf16, #tpu.memory_space<vmem>>, %arg7: memref<1x96xf32, #tpu.memory_space<vmem>>, %arg8: memref<32x32xbf16, #tpu.memory_space<vmem>>, %arg9: memref<1x32xf32, #tpu.memory_space<vmem>>, %arg10: memref<32x128xbf16, #tpu.memory_space<vmem>>, %arg11: memref<1x128xf32, #tpu.memory_space<vmem>>, %arg12: memref<32x256xbf16, #tpu.memory_space<vmem>>, %arg13: memref<32x128xbf16, #tpu.memory_space<vmem>>, %arg14: memref<1x128xf32, #tpu.memory_space<vmem>>, %arg15: memref<32x32xbf16, #tpu.memory_space<vmem>>, %arg16: memref<1x32xf32, #tpu.memory_space<vmem>>, %arg17: memref<16x32xbf16, #tpu.memory_space<vmem>>, %arg18: memref<1x32xf32, #tpu.memory_space<vmem>>, %arg19: memref<32x128xbf16, #tpu.memory_space<vmem>>, %arg20: memref<1x128xf32, #tpu.memory_space<vmem>>, %arg21: memref<32x256xbf16, #tpu.memory_space<vmem>>, %arg22: memref<32x128xbf16, #tpu.memory_space<vmem>>, %arg23: memref<1x128xf32, #tpu.memory_space<vmem>>, %arg24: memref<256x768xbf16, #tpu.memory_space<vmem>>, %arg25: memref<1x768xf32, #tpu.memory_space<vmem>>, %arg26: memref<2x768xf32, #tpu.memory_space<vmem>>, %arg27: memref<2x32xf32, #tpu.memory_space<vmem>>) attributes {dimension_semantics = [#tpu.dimension_semantics<parallel>], iteration_bounds = array<i64: 1>, scalar_prefetch = 0 : i64, scratch_operands = 0 : i64, tpu.core_type = #tpu.core_type<tc>, window_params = [{transform_indices = @transform_0, window_bounds = array<i64: 2, 8, 87>}, {transform_indices = @transform_1, window_bounds = array<i64: 2, 8, 87>}, {transform_indices = @transform_2, window_bounds = array<i64: 2, 8, 32>}, {transform_indices = @transform_3, window_bounds = array<i64: 2, 16>}, {pipeline_mode = #tpu.pipeline_mode<synchronous>, transform_indices = @transform_4, window_bounds = array<i64: 87, 32>}, {pipeline_mode = #tpu.pipeline_mode<synchronous>, transform_indices = @transform_5, window_bounds = array<i64: 32, 96>}, {pipeline_mode = #tpu.pipeline_mode<synchronous>, transform_indices = @transform_6, window_bounds = array<i64: 1, 96>}, {pipeline_mode = #tpu.pipeline_mode<synchronous>, transform_indices = @transform_7, window_bounds = array<i64: 32, 32>}, {pipeline_mode = #tpu.pipeline_mode<synchronous>, transform_indices = @transform_8, window_bounds = array<i64: 1, 32>}, {pipeline_mode = #tpu.pipeline_mode<synchronous>, transform_indices = @transform_9, window_bounds = array<i64: 32, 128>}, {pipeline_mode = #tpu.pipeline_mode<synchronous>, transform_indices = @transform_10, window_bounds = array<i64: 1, 128>}, {pipeline_mode = #tpu.pipeline_mode<synchronous>, transform_indices = @transform_11, window_bounds = array<i64: 32, 256>}, {pipeline_mode = #tpu.pipeline_mode<synchronous>, transform_indices = @transform_12, window_bounds = array<i64: 32, 128>}, {pipeline_mode = #tpu.pipeline_mode<synchronous>, transform_indices = @transform_13, window_bounds = array<i64: 1, 128>}, {pipeline_mode = #tpu.pipeline_mode<synchronous>, transform_indices = @transform_14, window_bounds = array<i64: 32, 32>}, {pipeline_mode = #tpu.pipeline_mode<synchronous>, transform_indices = @transform_15, window_bounds = array<i64: 1, 32>}, {pipeline_mode = #tpu.pipeline_mode<synchronous>, transform_indices = @transform_16, window_bounds = array<i64: 16, 32>}, {pipeline_mode = #tpu.pipeline_mode<synchronous>, transform_indices = @transform_17, window_bounds = array<i64: 1, 32>}, {pipeline_mode = #tpu.pipeline_mode<synchronous>, transform_indices = @transform_18, window_bounds = array<i64: 32, 128>}, {pipeline_mode = #tpu.pipeline_mode<synchronous>, transform_indices = @transform_19, window_bounds = array<i64: 1, 128>}, {pipeline_mode = #tpu.pipeline_mode<synchronous>, transform_indices = @transform_20, window_bounds = array<i64: 32, 256>}, {pipeline_mode = #tpu.pipeline_mode<synchronous>, transform_indices = @transform_21, window_bounds = array<i64: 32, 128>}, {pipeline_mode = #tpu.pipeline_mode<synchronous>, transform_indices = @transform_22, window_bounds = array<i64: 1, 128>}, {pipeline_mode = #tpu.pipeline_mode<synchronous>, transform_indices = @transform_23, window_bounds = array<i64: 256, 768>}, {pipeline_mode = #tpu.pipeline_mode<synchronous>, transform_indices = @transform_24, window_bounds = array<i64: 1, 768>}, {transform_indices = @transform_25, window_bounds = array<i64: 2, 768>}, {transform_indices = @transform_26, window_bounds = array<i64: 2, 32>}]} {
    %c0 = arith.constant 0 : index
    %c0_0 = arith.constant 0 : index
    %c0_1 = arith.constant 0 : index
    %0 = vector.load %arg1[%c0, %c0_0, %c0_1] : memref<2x8x87xf32, #tpu.memory_space<vmem>>, vector<2x8x87xf32>
    %c0_2 = arith.constant 0 : index
    %c0_3 = arith.constant 0 : index
    %c0_4 = arith.constant 0 : index
    %1 = vector.load %arg2[%c0_2, %c0_3, %c0_4] : memref<2x8x87xf32, #tpu.memory_space<vmem>>, vector<2x8x87xf32>
    %2 = arith.subf %0, %1 : vector<2x8x87xf32>
    %3 = math.absf %2 : vector<2x8x87xf32>
    %4 = vector.shape_cast %3 : vector<2x8x87xf32> to vector<16x87xf32>
    %c0_5 = arith.constant 0 : index
    %c0_6 = arith.constant 0 : index
    %5 = vector.load %arg5[%c0_5, %c0_6] : memref<87x32xbf16, #tpu.memory_space<vmem>>, vector<87x32xbf16>
    %6 = arith.truncf %4 : vector<16x87xf32> to vector<16x87xbf16>
    %cst = arith.constant dense<0.000000e+00> : vector<16x32xf32>
    %7 = tpu.matmul %6, %5, %cst {dimension_numbers = #tpu.dot_dimension_numbers<[1], [0], [0], [1], [0, 0, 1, 1], [], []>} : vector<16x87xbf16>, vector<87x32xbf16>, vector<16x32xf32> -> vector<16x32xf32>
    %c0_7 = arith.constant 0 : index
    %c0_8 = arith.constant 0 : index
    %c0_9 = arith.constant 0 : index
    %8 = vector.load %arg3[%c0_7, %c0_8, %c0_9] : memref<2x8x32xf32, #tpu.memory_space<vmem>>, vector<2x8x32xf32>
    %9 = vector.shape_cast %8 : vector<2x8x32xf32> to vector<16x32xf32>
    %10 = arith.addf %7, %9 : vector<16x32xf32>
    %c0_10 = arith.constant 0 : index
    %c0_11 = arith.constant 0 : index
    %11 = vector.load %arg6[%c0_10, %c0_11] : memref<32x96xbf16, #tpu.memory_space<vmem>>, vector<32x96xbf16>
    %12 = arith.truncf %10 : vector<16x32xf32> to vector<16x32xbf16>
    %cst_12 = arith.constant dense<0.000000e+00> : vector<16x96xf32>
    %13 = tpu.matmul %12, %11, %cst_12 {dimension_numbers = #tpu.dot_dimension_numbers<[1], [0], [0], [1], [0, 0, 1, 1], [], []>} : vector<16x32xbf16>, vector<32x96xbf16>, vector<16x96xf32> -> vector<16x96xf32>
    %c0_13 = arith.constant 0 : index
    %c0_14 = arith.constant 0 : index
    %14 = vector.load %arg7[%c0_13, %c0_14] : memref<1x96xf32, #tpu.memory_space<vmem>>, vector<1x96xf32>
    %15 = vector.broadcast %14 : vector<1x96xf32> to vector<16x96xf32>
    %16 = arith.addf %13, %15 : vector<16x96xf32>
    %17 = vector.extract_strided_slice %16 {offsets = [0, 0], sizes = [8, 32], strides = [1, 1]} : vector<16x96xf32> to vector<8x32xf32>
    %cst_15 = arith.constant 0.353553385 : f32
    %18 = vector.broadcast %cst_15 : f32 to vector<8x32xf32>
    %19 = arith.mulf %17, %18 : vector<8x32xf32>
    %20 = vector.extract_strided_slice %16 {offsets = [0, 32], sizes = [8, 32], strides = [1, 1]} : vector<16x96xf32> to vector<8x32xf32>
    %21 = vector.extract_strided_slice %16 {offsets = [0, 64], sizes = [8, 32], strides = [1, 1]} : vector<16x96xf32> to vector<8x32xf32>
    %22 = vector.extract_strided_slice %19 {offsets = [0, 0], sizes = [8, 8], strides = [1, 1]} : vector<8x32xf32> to vector<8x8xf32>
    %23 = vector.extract_strided_slice %20 {offsets = [0, 0], sizes = [8, 8], strides = [1, 1]} : vector<8x32xf32> to vector<8x8xf32>
    %cst_16 = arith.constant dense<0.000000e+00> : vector<8x8xf32>
    %24 = tpu.matmul %22, %23, %cst_16 {dimension_numbers = #tpu.dot_dimension_numbers<[1], [1], [0], [0], [0, 0, 1, 0], [], []>} : vector<8x8xf32>, vector<8x8xf32>, vector<8x8xf32> -> vector<8x8xf32>
    %cst_17 = arith.constant dense<0xFF800000> : vector<8xf32>
    %25 = vector.multi_reduction <maximumf>, %24, %cst_17 [1] : vector<8x8xf32> to vector<8xf32>
    %26 = vector.shape_cast %25 : vector<8xf32> to vector<8x1xf32>
    %27 = vector.broadcast %26 : vector<8x1xf32> to vector<8x8xf32>
    %28 = arith.subf %24, %27 : vector<8x8xf32>
    %29 = math.exp %28 : vector<8x8xf32>
    %cst_18 = arith.constant dense<0.000000e+00> : vector<8xf32>
    %30 = vector.multi_reduction <add>, %29, %cst_18 [1] : vector<8x8xf32> to vector<8xf32>
    %31 = vector.shape_cast %30 : vector<8xf32> to vector<8x1xf32>
    %32 = tpu.reciprocal %31 {approx = true} : vector<8x1xf32> -> vector<8x1xf32>
    %33 = vector.broadcast %32 : vector<8x1xf32> to vector<8x8xf32>
    %34 = arith.mulf %29, %33 : vector<8x8xf32>
    %35 = vector.extract_strided_slice %21 {offsets = [0, 0], sizes = [8, 8], strides = [1, 1]} : vector<8x32xf32> to vector<8x8xf32>
    %cst_19 = arith.constant dense<0.000000e+00> : vector<8x8xf32>
    %36 = tpu.matmul %34, %35, %cst_19 {dimension_numbers = #tpu.dot_dimension_numbers<[1], [0], [0], [1], [0, 0, 1, 1], [], []>} : vector<8x8xf32>, vector<8x8xf32>, vector<8x8xf32> -> vector<8x8xf32>
    %37 = vector.extract_strided_slice %19 {offsets = [0, 8], sizes = [8, 8], strides = [1, 1]} : vector<8x32xf32> to vector<8x8xf32>
    %38 = vector.extract_strided_slice %20 {offsets = [0, 8], sizes = [8, 8], strides = [1, 1]} : vector<8x32xf32> to vector<8x8xf32>
    %cst_20 = arith.constant dense<0.000000e+00> : vector<8x8xf32>
    %39 = tpu.matmul %37, %38, %cst_20 {dimension_numbers = #tpu.dot_dimension_numbers<[1], [1], [0], [0], [0, 0, 1, 0], [], []>} : vector<8x8xf32>, vector<8x8xf32>, vector<8x8xf32> -> vector<8x8xf32>
    %cst_21 = arith.constant dense<0xFF800000> : vector<8xf32>
    %40 = vector.multi_reduction <maximumf>, %39, %cst_21 [1] : vector<8x8xf32> to vector<8xf32>
    %41 = vector.shape_cast %40 : vector<8xf32> to vector<8x1xf32>
    %42 = vector.broadcast %41 : vector<8x1xf32> to vector<8x8xf32>
    %43 = arith.subf %39, %42 : vector<8x8xf32>
    %44 = math.exp %43 : vector<8x8xf32>
    %cst_22 = arith.constant dense<0.000000e+00> : vector<8xf32>
    %45 = vector.multi_reduction <add>, %44, %cst_22 [1] : vector<8x8xf32> to vector<8xf32>
    %46 = vector.shape_cast %45 : vector<8xf32> to vector<8x1xf32>
    %47 = tpu.reciprocal %46 {approx = true} : vector<8x1xf32> -> vector<8x1xf32>
    %48 = vector.broadcast %47 : vector<8x1xf32> to vector<8x8xf32>
    %49 = arith.mulf %44, %48 : vector<8x8xf32>
    %50 = vector.extract_strided_slice %21 {offsets = [0, 8], sizes = [8, 8], strides = [1, 1]} : vector<8x32xf32> to vector<8x8xf32>
    %cst_23 = arith.constant dense<0.000000e+00> : vector<8x8xf32>
    %51 = tpu.matmul %49, %50, %cst_23 {dimension_numbers = #tpu.dot_dimension_numbers<[1], [0], [0], [1], [0, 0, 1, 1], [], []>} : vector<8x8xf32>, vector<8x8xf32>, vector<8x8xf32> -> vector<8x8xf32>
    %52 = vector.extract_strided_slice %19 {offsets = [0, 16], sizes = [8, 8], strides = [1, 1]} : vector<8x32xf32> to vector<8x8xf32>
    %53 = vector.extract_strided_slice %20 {offsets = [0, 16], sizes = [8, 8], strides = [1, 1]} : vector<8x32xf32> to vector<8x8xf32>
    %cst_24 = arith.constant dense<0.000000e+00> : vector<8x8xf32>
    %54 = tpu.matmul %52, %53, %cst_24 {dimension_numbers = #tpu.dot_dimension_numbers<[1], [1], [0], [0], [0, 0, 1, 0], [], []>} : vector<8x8xf32>, vector<8x8xf32>, vector<8x8xf32> -> vector<8x8xf32>
    %cst_25 = arith.constant dense<0xFF800000> : vector<8xf32>
    %55 = vector.multi_reduction <maximumf>, %54, %cst_25 [1] : vector<8x8xf32> to vector<8xf32>
    %56 = vector.shape_cast %55 : vector<8xf32> to vector<8x1xf32>
    %57 = vector.broadcast %56 : vector<8x1xf32> to vector<8x8xf32>
    %58 = arith.subf %54, %57 : vector<8x8xf32>
    %59 = math.exp %58 : vector<8x8xf32>
    %cst_26 = arith.constant dense<0.000000e+00> : vector<8xf32>
    %60 = vector.multi_reduction <add>, %59, %cst_26 [1] : vector<8x8xf32> to vector<8xf32>
    %61 = vector.shape_cast %60 : vector<8xf32> to vector<8x1xf32>
    %62 = tpu.reciprocal %61 {approx = true} : vector<8x1xf32> -> vector<8x1xf32>
    %63 = vector.broadcast %62 : vector<8x1xf32> to vector<8x8xf32>
    %64 = arith.mulf %59, %63 : vector<8x8xf32>
    %65 = vector.extract_strided_slice %21 {offsets = [0, 16], sizes = [8, 8], strides = [1, 1]} : vector<8x32xf32> to vector<8x8xf32>
    %cst_27 = arith.constant dense<0.000000e+00> : vector<8x8xf32>
    %66 = tpu.matmul %64, %65, %cst_27 {dimension_numbers = #tpu.dot_dimension_numbers<[1], [0], [0], [1], [0, 0, 1, 1], [], []>} : vector<8x8xf32>, vector<8x8xf32>, vector<8x8xf32> -> vector<8x8xf32>
    %67 = vector.extract_strided_slice %19 {offsets = [0, 24], sizes = [8, 8], strides = [1, 1]} : vector<8x32xf32> to vector<8x8xf32>
    %68 = vector.extract_strided_slice %20 {offsets = [0, 24], sizes = [8, 8], strides = [1, 1]} : vector<8x32xf32> to vector<8x8xf32>
    %cst_28 = arith.constant dense<0.000000e+00> : vector<8x8xf32>
    %69 = tpu.matmul %67, %68, %cst_28 {dimension_numbers = #tpu.dot_dimension_numbers<[1], [1], [0], [0], [0, 0, 1, 0], [], []>} : vector<8x8xf32>, vector<8x8xf32>, vector<8x8xf32> -> vector<8x8xf32>
    %cst_29 = arith.constant dense<0xFF800000> : vector<8xf32>
    %70 = vector.multi_reduction <maximumf>, %69, %cst_29 [1] : vector<8x8xf32> to vector<8xf32>
    %71 = vector.shape_cast %70 : vector<8xf32> to vector<8x1xf32>
    %72 = vector.broadcast %71 : vector<8x1xf32> to vector<8x8xf32>
    %73 = arith.subf %69, %72 : vector<8x8xf32>
    %74 = math.exp %73 : vector<8x8xf32>
    %cst_30 = arith.constant dense<0.000000e+00> : vector<8xf32>
    %75 = vector.multi_reduction <add>, %74, %cst_30 [1] : vector<8x8xf32> to vector<8xf32>
    %76 = vector.shape_cast %75 : vector<8xf32> to vector<8x1xf32>
    %77 = tpu.reciprocal %76 {approx = true} : vector<8x1xf32> -> vector<8x1xf32>
    %78 = vector.broadcast %77 : vector<8x1xf32> to vector<8x8xf32>
    %79 = arith.mulf %74, %78 : vector<8x8xf32>
    %80 = vector.extract_strided_slice %21 {offsets = [0, 24], sizes = [8, 8], strides = [1, 1]} : vector<8x32xf32> to vector<8x8xf32>
    %cst_31 = arith.constant dense<0.000000e+00> : vector<8x8xf32>
    %81 = tpu.matmul %79, %80, %cst_31 {dimension_numbers = #tpu.dot_dimension_numbers<[1], [0], [0], [1], [0, 0, 1, 1], [], []>} : vector<8x8xf32>, vector<8x8xf32>, vector<8x8xf32> -> vector<8x8xf32>
    %82 = tpu.concatenate %36, %51, %66, %81 in 1 : vector<8x8xf32>, vector<8x8xf32>, vector<8x8xf32>, vector<8x8xf32> -> vector<8x32xf32>
    %83 = vector.extract_strided_slice %16 {offsets = [8, 0], sizes = [8, 32], strides = [1, 1]} : vector<16x96xf32> to vector<8x32xf32>
    %cst_32 = arith.constant 0.353553385 : f32
    %84 = vector.broadcast %cst_32 : f32 to vector<8x32xf32>
    %85 = arith.mulf %83, %84 : vector<8x32xf32>
    %86 = vector.extract_strided_slice %16 {offsets = [8, 32], sizes = [8, 32], strides = [1, 1]} : vector<16x96xf32> to vector<8x32xf32>
    %87 = vector.extract_strided_slice %16 {offsets = [8, 64], sizes = [8, 32], strides = [1, 1]} : vector<16x96xf32> to vector<8x32xf32>
    %88 = vector.extract_strided_slice %85 {offsets = [0, 0], sizes = [8, 8], strides = [1, 1]} : vector<8x32xf32> to vector<8x8xf32>
    %89 = vector.extract_strided_slice %86 {offsets = [0, 0], sizes = [8, 8], strides = [1, 1]} : vector<8x32xf32> to vector<8x8xf32>
    %cst_33 = arith.constant dense<0.000000e+00> : vector<8x8xf32>
    %90 = tpu.matmul %88, %89, %cst_33 {dimension_numbers = #tpu.dot_dimension_numbers<[1], [1], [0], [0], [0, 0, 1, 0], [], []>} : vector<8x8xf32>, vector<8x8xf32>, vector<8x8xf32> -> vector<8x8xf32>
    %cst_34 = arith.constant dense<0xFF800000> : vector<8xf32>
    %91 = vector.multi_reduction <maximumf>, %90, %cst_34 [1] : vector<8x8xf32> to vector<8xf32>
    %92 = vector.shape_cast %91 : vector<8xf32> to vector<8x1xf32>
    %93 = vector.broadcast %92 : vector<8x1xf32> to vector<8x8xf32>
    %94 = arith.subf %90, %93 : vector<8x8xf32>
    %95 = math.exp %94 : vector<8x8xf32>
    %cst_35 = arith.constant dense<0.000000e+00> : vector<8xf32>
    %96 = vector.multi_reduction <add>, %95, %cst_35 [1] : vector<8x8xf32> to vector<8xf32>
    %97 = vector.shape_cast %96 : vector<8xf32> to vector<8x1xf32>
    %98 = tpu.reciprocal %97 {approx = true} : vector<8x1xf32> -> vector<8x1xf32>
    %99 = vector.broadcast %98 : vector<8x1xf32> to vector<8x8xf32>
    %100 = arith.mulf %95, %99 : vector<8x8xf32>
    %101 = vector.extract_strided_slice %87 {offsets = [0, 0], sizes = [8, 8], strides = [1, 1]} : vector<8x32xf32> to vector<8x8xf32>
    %cst_36 = arith.constant dense<0.000000e+00> : vector<8x8xf32>
    %102 = tpu.matmul %100, %101, %cst_36 {dimension_numbers = #tpu.dot_dimension_numbers<[1], [0], [0], [1], [0, 0, 1, 1], [], []>} : vector<8x8xf32>, vector<8x8xf32>, vector<8x8xf32> -> vector<8x8xf32>
    %103 = vector.extract_strided_slice %85 {offsets = [0, 8], sizes = [8, 8], strides = [1, 1]} : vector<8x32xf32> to vector<8x8xf32>
    %104 = vector.extract_strided_slice %86 {offsets = [0, 8], sizes = [8, 8], strides = [1, 1]} : vector<8x32xf32> to vector<8x8xf32>
    %cst_37 = arith.constant dense<0.000000e+00> : vector<8x8xf32>
    %105 = tpu.matmul %103, %104, %cst_37 {dimension_numbers = #tpu.dot_dimension_numbers<[1], [1], [0], [0], [0, 0, 1, 0], [], []>} : vector<8x8xf32>, vector<8x8xf32>, vector<8x8xf32> -> vector<8x8xf32>
    %cst_38 = arith.constant dense<0xFF800000> : vector<8xf32>
    %106 = vector.multi_reduction <maximumf>, %105, %cst_38 [1] : vector<8x8xf32> to vector<8xf32>
    %107 = vector.shape_cast %106 : vector<8xf32> to vector<8x1xf32>
    %108 = vector.broadcast %107 : vector<8x1xf32> to vector<8x8xf32>
    %109 = arith.subf %105, %108 : vector<8x8xf32>
    %110 = math.exp %109 : vector<8x8xf32>
    %cst_39 = arith.constant dense<0.000000e+00> : vector<8xf32>
    %111 = vector.multi_reduction <add>, %110, %cst_39 [1] : vector<8x8xf32> to vector<8xf32>
    %112 = vector.shape_cast %111 : vector<8xf32> to vector<8x1xf32>
    %113 = tpu.reciprocal %112 {approx = true} : vector<8x1xf32> -> vector<8x1xf32>
    %114 = vector.broadcast %113 : vector<8x1xf32> to vector<8x8xf32>
    %115 = arith.mulf %110, %114 : vector<8x8xf32>
    %116 = vector.extract_strided_slice %87 {offsets = [0, 8], sizes = [8, 8], strides = [1, 1]} : vector<8x32xf32> to vector<8x8xf32>
    %cst_40 = arith.constant dense<0.000000e+00> : vector<8x8xf32>
    %117 = tpu.matmul %115, %116, %cst_40 {dimension_numbers = #tpu.dot_dimension_numbers<[1], [0], [0], [1], [0, 0, 1, 1], [], []>} : vector<8x8xf32>, vector<8x8xf32>, vector<8x8xf32> -> vector<8x8xf32>
    %118 = vector.extract_strided_slice %85 {offsets = [0, 16], sizes = [8, 8], strides = [1, 1]} : vector<8x32xf32> to vector<8x8xf32>
    %119 = vector.extract_strided_slice %86 {offsets = [0, 16], sizes = [8, 8], strides = [1, 1]} : vector<8x32xf32> to vector<8x8xf32>
    %cst_41 = arith.constant dense<0.000000e+00> : vector<8x8xf32>
    %120 = tpu.matmul %118, %119, %cst_41 {dimension_numbers = #tpu.dot_dimension_numbers<[1], [1], [0], [0], [0, 0, 1, 0], [], []>} : vector<8x8xf32>, vector<8x8xf32>, vector<8x8xf32> -> vector<8x8xf32>
    %cst_42 = arith.constant dense<0xFF800000> : vector<8xf32>
    %121 = vector.multi_reduction <maximumf>, %120, %cst_42 [1] : vector<8x8xf32> to vector<8xf32>
    %122 = vector.shape_cast %121 : vector<8xf32> to vector<8x1xf32>
    %123 = vector.broadcast %122 : vector<8x1xf32> to vector<8x8xf32>
    %124 = arith.subf %120, %123 : vector<8x8xf32>
    %125 = math.exp %124 : vector<8x8xf32>
    %cst_43 = arith.constant dense<0.000000e+00> : vector<8xf32>
    %126 = vector.multi_reduction <add>, %125, %cst_43 [1] : vector<8x8xf32> to vector<8xf32>
    %127 = vector.shape_cast %126 : vector<8xf32> to vector<8x1xf32>
    %128 = tpu.reciprocal %127 {approx = true} : vector<8x1xf32> -> vector<8x1xf32>
    %129 = vector.broadcast %128 : vector<8x1xf32> to vector<8x8xf32>
    %130 = arith.mulf %125, %129 : vector<8x8xf32>
    %131 = vector.extract_strided_slice %87 {offsets = [0, 16], sizes = [8, 8], strides = [1, 1]} : vector<8x32xf32> to vector<8x8xf32>
    %cst_44 = arith.constant dense<0.000000e+00> : vector<8x8xf32>
    %132 = tpu.matmul %130, %131, %cst_44 {dimension_numbers = #tpu.dot_dimension_numbers<[1], [0], [0], [1], [0, 0, 1, 1], [], []>} : vector<8x8xf32>, vector<8x8xf32>, vector<8x8xf32> -> vector<8x8xf32>
    %133 = vector.extract_strided_slice %85 {offsets = [0, 24], sizes = [8, 8], strides = [1, 1]} : vector<8x32xf32> to vector<8x8xf32>
    %134 = vector.extract_strided_slice %86 {offsets = [0, 24], sizes = [8, 8], strides = [1, 1]} : vector<8x32xf32> to vector<8x8xf32>
    %cst_45 = arith.constant dense<0.000000e+00> : vector<8x8xf32>
    %135 = tpu.matmul %133, %134, %cst_45 {dimension_numbers = #tpu.dot_dimension_numbers<[1], [1], [0], [0], [0, 0, 1, 0], [], []>} : vector<8x8xf32>, vector<8x8xf32>, vector<8x8xf32> -> vector<8x8xf32>
    %cst_46 = arith.constant dense<0xFF800000> : vector<8xf32>
    %136 = vector.multi_reduction <maximumf>, %135, %cst_46 [1] : vector<8x8xf32> to vector<8xf32>
    %137 = vector.shape_cast %136 : vector<8xf32> to vector<8x1xf32>
    %138 = vector.broadcast %137 : vector<8x1xf32> to vector<8x8xf32>
    %139 = arith.subf %135, %138 : vector<8x8xf32>
    %140 = math.exp %139 : vector<8x8xf32>
    %cst_47 = arith.constant dense<0.000000e+00> : vector<8xf32>
    %141 = vector.multi_reduction <add>, %140, %cst_47 [1] : vector<8x8xf32> to vector<8xf32>
    %142 = vector.shape_cast %141 : vector<8xf32> to vector<8x1xf32>
    %143 = tpu.reciprocal %142 {approx = true} : vector<8x1xf32> -> vector<8x1xf32>
    %144 = vector.broadcast %143 : vector<8x1xf32> to vector<8x8xf32>
    %145 = arith.mulf %140, %144 : vector<8x8xf32>
    %146 = vector.extract_strided_slice %87 {offsets = [0, 24], sizes = [8, 8], strides = [1, 1]} : vector<8x32xf32> to vector<8x8xf32>
    %cst_48 = arith.constant dense<0.000000e+00> : vector<8x8xf32>
    %147 = tpu.matmul %145, %146, %cst_48 {dimension_numbers = #tpu.dot_dimension_numbers<[1], [0], [0], [1], [0, 0, 1, 1], [], []>} : vector<8x8xf32>, vector<8x8xf32>, vector<8x8xf32> -> vector<8x8xf32>
    %148 = tpu.concatenate %102, %117, %132, %147 in 1 : vector<8x8xf32>, vector<8x8xf32>, vector<8x8xf32>, vector<8x8xf32> -> vector<8x32xf32>
    %149 = tpu.concatenate %82, %148 in 0 : vector<8x32xf32>, vector<8x32xf32> -> vector<16x32xf32>
    %c0_49 = arith.constant 0 : index
    %c0_50 = arith.constant 0 : index
    %150 = vector.load %arg8[%c0_49, %c0_50] : memref<32x32xbf16, #tpu.memory_space<vmem>>, vector<32x32xbf16>
    %151 = arith.truncf %149 : vector<16x32xf32> to vector<16x32xbf16>
    %cst_51 = arith.constant dense<0.000000e+00> : vector<16x32xf32>
    %152 = tpu.matmul %151, %150, %cst_51 {dimension_numbers = #tpu.dot_dimension_numbers<[1], [0], [0], [1], [0, 0, 1, 1], [], []>} : vector<16x32xbf16>, vector<32x32xbf16>, vector<16x32xf32> -> vector<16x32xf32>
    %c0_52 = arith.constant 0 : index
    %c0_53 = arith.constant 0 : index
    %153 = vector.load %arg9[%c0_52, %c0_53] : memref<1x32xf32, #tpu.memory_space<vmem>>, vector<1x32xf32>
    %154 = vector.broadcast %153 : vector<1x32xf32> to vector<16x32xf32>
    %155 = arith.addf %152, %154 : vector<16x32xf32>
    %c0_54 = arith.constant 0 : index
    %c0_55 = arith.constant 0 : index
    %156 = vector.load %arg10[%c0_54, %c0_55] : memref<32x128xbf16, #tpu.memory_space<vmem>>, vector<32x128xbf16>
    %157 = arith.truncf %155 : vector<16x32xf32> to vector<16x32xbf16>
    %cst_56 = arith.constant dense<0.000000e+00> : vector<16x128xf32>
    %158 = tpu.matmul %157, %156, %cst_56 {dimension_numbers = #tpu.dot_dimension_numbers<[1], [0], [0], [1], [0, 0, 1, 1], [], []>} : vector<16x32xbf16>, vector<32x128xbf16>, vector<16x128xf32> -> vector<16x128xf32>
    %c0_57 = arith.constant 0 : index
    %c0_58 = arith.constant 0 : index
    %159 = vector.load %arg11[%c0_57, %c0_58] : memref<1x128xf32, #tpu.memory_space<vmem>>, vector<1x128xf32>
    %160 = vector.broadcast %159 : vector<1x128xf32> to vector<16x128xf32>
    %161 = arith.addf %158, %160 : vector<16x128xf32>
    %162 = vector.shape_cast %161 : vector<16x128xf32> to vector<2x8x128xf32>
    %163 = vector.extract_strided_slice %162 {offsets = [0, 0, 0], sizes = [2, 1, 128], strides = [1, 1, 1]} : vector<2x8x128xf32> to vector<2x1x128xf32>
    %164 = vector.shape_cast %163 : vector<2x1x128xf32> to vector<2x128xf32>
    %165 = arith.negf %164 : vector<2x128xf32>
    %166 = math.exp %165 : vector<2x128xf32>
    %cst_59 = arith.constant 1.000000e+00 : f32
    %167 = vector.broadcast %cst_59 : f32 to vector<2x128xf32>
    %168 = arith.addf %167, %166 : vector<2x128xf32>
    %169 = arith.divf %167, %168 : vector<2x128xf32>
    %170 = math.tanh %164 : vector<2x128xf32>
    %171 = vector.extract_strided_slice %169 {offsets = [0, 0], sizes = [2, 32], strides = [1, 1]} : vector<2x128xf32> to vector<2x32xf32>
    %172 = vector.extract_strided_slice %170 {offsets = [0, 64], sizes = [2, 32], strides = [1, 1]} : vector<2x128xf32> to vector<2x32xf32>
    %173 = vector.extract_strided_slice %169 {offsets = [0, 96], sizes = [2, 32], strides = [1, 1]} : vector<2x128xf32> to vector<2x32xf32>
    %174 = arith.mulf %171, %172 : vector<2x32xf32>
    %175 = math.tanh %174 : vector<2x32xf32>
    %176 = arith.mulf %173, %175 : vector<2x32xf32>
    %c0_60 = arith.constant 0 : index
    %c0_61 = arith.constant 0 : index
    %177 = vector.load %arg12[%c0_60, %c0_61] : memref<32x256xbf16, #tpu.memory_space<vmem>>, vector<32x256xbf16>
    %178 = arith.truncf %176 : vector<2x32xf32> to vector<2x32xbf16>
    %cst_62 = arith.constant dense<0.000000e+00> : vector<2x256xf32>
    %179 = tpu.matmul %178, %177, %cst_62 {dimension_numbers = #tpu.dot_dimension_numbers<[1], [0], [0], [1], [0, 0, 1, 1], [], []>} : vector<2x32xbf16>, vector<32x256xbf16>, vector<2x256xf32> -> vector<2x256xf32>
    %180 = vector.extract_strided_slice %179 {offsets = [0, 0], sizes = [2, 128], strides = [1, 1]} : vector<2x256xf32> to vector<2x128xf32>
    %c0_63 = arith.constant 0 : index
    %c0_64 = arith.constant 0 : index
    %181 = vector.load %arg14[%c0_63, %c0_64] : memref<1x128xf32, #tpu.memory_space<vmem>>, vector<1x128xf32>
    %182 = vector.broadcast %181 : vector<1x128xf32> to vector<2x128xf32>
    %183 = arith.addf %180, %182 : vector<2x128xf32>
    %184 = arith.negf %183 : vector<2x128xf32>
    %185 = math.exp %184 : vector<2x128xf32>
    %cst_65 = arith.constant 1.000000e+00 : f32
    %186 = vector.broadcast %cst_65 : f32 to vector<2x128xf32>
    %187 = arith.addf %186, %185 : vector<2x128xf32>
    %188 = arith.divf %186, %187 : vector<2x128xf32>
    %189 = math.tanh %183 : vector<2x128xf32>
    %190 = vector.extract_strided_slice %188 {offsets = [0, 0], sizes = [2, 32], strides = [1, 1]} : vector<2x128xf32> to vector<2x32xf32>
    %191 = vector.extract_strided_slice %189 {offsets = [0, 64], sizes = [2, 32], strides = [1, 1]} : vector<2x128xf32> to vector<2x32xf32>
    %192 = vector.extract_strided_slice %188 {offsets = [0, 96], sizes = [2, 32], strides = [1, 1]} : vector<2x128xf32> to vector<2x32xf32>
    %193 = arith.mulf %190, %191 : vector<2x32xf32>
    %194 = math.tanh %193 : vector<2x32xf32>
    %195 = arith.mulf %192, %194 : vector<2x32xf32>
    %196 = vector.extract_strided_slice %179 {offsets = [0, 128], sizes = [2, 128], strides = [1, 1]} : vector<2x256xf32> to vector<2x128xf32>
    %197 = vector.extract_strided_slice %162 {offsets = [0, 1, 0], sizes = [2, 1, 128], strides = [1, 1, 1]} : vector<2x8x128xf32> to vector<2x1x128xf32>
    %198 = vector.shape_cast %197 : vector<2x1x128xf32> to vector<2x128xf32>
    %199 = arith.addf %198, %196 : vector<2x128xf32>
    %200 = arith.negf %199 : vector<2x128xf32>
    %201 = math.exp %200 : vector<2x128xf32>
    %cst_66 = arith.constant 1.000000e+00 : f32
    %202 = vector.broadcast %cst_66 : f32 to vector<2x128xf32>
    %203 = arith.addf %202, %201 : vector<2x128xf32>
    %204 = arith.divf %202, %203 : vector<2x128xf32>
    %205 = math.tanh %199 : vector<2x128xf32>
    %206 = vector.extract_strided_slice %204 {offsets = [0, 0], sizes = [2, 32], strides = [1, 1]} : vector<2x128xf32> to vector<2x32xf32>
    %207 = vector.extract_strided_slice %204 {offsets = [0, 32], sizes = [2, 32], strides = [1, 1]} : vector<2x128xf32> to vector<2x32xf32>
    %208 = vector.extract_strided_slice %205 {offsets = [0, 64], sizes = [2, 32], strides = [1, 1]} : vector<2x128xf32> to vector<2x32xf32>
    %209 = vector.extract_strided_slice %204 {offsets = [0, 96], sizes = [2, 32], strides = [1, 1]} : vector<2x128xf32> to vector<2x32xf32>
    %210 = arith.mulf %207, %174 : vector<2x32xf32>
    %211 = arith.mulf %206, %208 : vector<2x32xf32>
    %212 = arith.addf %210, %211 : vector<2x32xf32>
    %213 = math.tanh %212 : vector<2x32xf32>
    %214 = arith.mulf %209, %213 : vector<2x32xf32>
    %c0_67 = arith.constant 0 : index
    %c0_68 = arith.constant 0 : index
    %215 = vector.load %arg12[%c0_67, %c0_68] : memref<32x256xbf16, #tpu.memory_space<vmem>>, vector<32x256xbf16>
    %216 = arith.truncf %214 : vector<2x32xf32> to vector<2x32xbf16>
    %cst_69 = arith.constant dense<0.000000e+00> : vector<2x256xf32>
    %217 = tpu.matmul %216, %215, %cst_69 {dimension_numbers = #tpu.dot_dimension_numbers<[1], [0], [0], [1], [0, 0, 1, 1], [], []>} : vector<2x32xbf16>, vector<32x256xbf16>, vector<2x256xf32> -> vector<2x256xf32>
    %218 = vector.extract_strided_slice %217 {offsets = [0, 0], sizes = [2, 128], strides = [1, 1]} : vector<2x256xf32> to vector<2x128xf32>
    %c0_70 = arith.constant 0 : index
    %c0_71 = arith.constant 0 : index
    %219 = vector.load %arg13[%c0_70, %c0_71] : memref<32x128xbf16, #tpu.memory_space<vmem>>, vector<32x128xbf16>
    %220 = arith.truncf %195 : vector<2x32xf32> to vector<2x32xbf16>
    %cst_72 = arith.constant dense<0.000000e+00> : vector<2x128xf32>
    %221 = tpu.matmul %220, %219, %cst_72 {dimension_numbers = #tpu.dot_dimension_numbers<[1], [0], [0], [1], [0, 0, 1, 1], [], []>} : vector<2x32xbf16>, vector<32x128xbf16>, vector<2x128xf32> -> vector<2x128xf32>
    %222 = arith.addf %218, %221 : vector<2x128xf32>
    %c0_73 = arith.constant 0 : index
    %c0_74 = arith.constant 0 : index
    %223 = vector.load %arg14[%c0_73, %c0_74] : memref<1x128xf32, #tpu.memory_space<vmem>>, vector<1x128xf32>
    %224 = vector.broadcast %223 : vector<1x128xf32> to vector<2x128xf32>
    %225 = arith.addf %222, %224 : vector<2x128xf32>
    %226 = arith.negf %225 : vector<2x128xf32>
    %227 = math.exp %226 : vector<2x128xf32>
    %cst_75 = arith.constant 1.000000e+00 : f32
    %228 = vector.broadcast %cst_75 : f32 to vector<2x128xf32>
    %229 = arith.addf %228, %227 : vector<2x128xf32>
    %230 = arith.divf %228, %229 : vector<2x128xf32>
    %231 = math.tanh %225 : vector<2x128xf32>
    %232 = vector.extract_strided_slice %230 {offsets = [0, 0], sizes = [2, 32], strides = [1, 1]} : vector<2x128xf32> to vector<2x32xf32>
    %233 = vector.extract_strided_slice %230 {offsets = [0, 32], sizes = [2, 32], strides = [1, 1]} : vector<2x128xf32> to vector<2x32xf32>
    %234 = vector.extract_strided_slice %231 {offsets = [0, 64], sizes = [2, 32], strides = [1, 1]} : vector<2x128xf32> to vector<2x32xf32>
    %235 = vector.extract_strided_slice %230 {offsets = [0, 96], sizes = [2, 32], strides = [1, 1]} : vector<2x128xf32> to vector<2x32xf32>
    %236 = arith.mulf %233, %193 : vector<2x32xf32>
    %237 = arith.mulf %232, %234 : vector<2x32xf32>
    %238 = arith.addf %236, %237 : vector<2x32xf32>
    %239 = math.tanh %238 : vector<2x32xf32>
    %240 = arith.mulf %235, %239 : vector<2x32xf32>
    %241 = vector.extract_strided_slice %217 {offsets = [0, 128], sizes = [2, 128], strides = [1, 1]} : vector<2x256xf32> to vector<2x128xf32>
    %242 = vector.extract_strided_slice %162 {offsets = [0, 2, 0], sizes = [2, 1, 128], strides = [1, 1, 1]} : vector<2x8x128xf32> to vector<2x1x128xf32>
    %243 = vector.shape_cast %242 : vector<2x1x128xf32> to vector<2x128xf32>
    %244 = arith.addf %243, %241 : vector<2x128xf32>
    %245 = arith.negf %244 : vector<2x128xf32>
    %246 = math.exp %245 : vector<2x128xf32>
    %cst_76 = arith.constant 1.000000e+00 : f32
    %247 = vector.broadcast %cst_76 : f32 to vector<2x128xf32>
    %248 = arith.addf %247, %246 : vector<2x128xf32>
    %249 = arith.divf %247, %248 : vector<2x128xf32>
    %250 = math.tanh %244 : vector<2x128xf32>
    %251 = vector.extract_strided_slice %249 {offsets = [0, 0], sizes = [2, 32], strides = [1, 1]} : vector<2x128xf32> to vector<2x32xf32>
    %252 = vector.extract_strided_slice %249 {offsets = [0, 32], sizes = [2, 32], strides = [1, 1]} : vector<2x128xf32> to vector<2x32xf32>
    %253 = vector.extract_strided_slice %250 {offsets = [0, 64], sizes = [2, 32], strides = [1, 1]} : vector<2x128xf32> to vector<2x32xf32>
    %254 = vector.extract_strided_slice %249 {offsets = [0, 96], sizes = [2, 32], strides = [1, 1]} : vector<2x128xf32> to vector<2x32xf32>
    %255 = arith.mulf %252, %212 : vector<2x32xf32>
    %256 = arith.mulf %251, %253 : vector<2x32xf32>
    %257 = arith.addf %255, %256 : vector<2x32xf32>
    %258 = math.tanh %257 : vector<2x32xf32>
    %259 = arith.mulf %254, %258 : vector<2x32xf32>
    %c0_77 = arith.constant 0 : index
    %c0_78 = arith.constant 0 : index
    %260 = vector.load %arg12[%c0_77, %c0_78] : memref<32x256xbf16, #tpu.memory_space<vmem>>, vector<32x256xbf16>
    %261 = arith.truncf %259 : vector<2x32xf32> to vector<2x32xbf16>
    %cst_79 = arith.constant dense<0.000000e+00> : vector<2x256xf32>
    %262 = tpu.matmul %261, %260, %cst_79 {dimension_numbers = #tpu.dot_dimension_numbers<[1], [0], [0], [1], [0, 0, 1, 1], [], []>} : vector<2x32xbf16>, vector<32x256xbf16>, vector<2x256xf32> -> vector<2x256xf32>
    %263 = vector.extract_strided_slice %262 {offsets = [0, 0], sizes = [2, 128], strides = [1, 1]} : vector<2x256xf32> to vector<2x128xf32>
    %c0_80 = arith.constant 0 : index
    %c0_81 = arith.constant 0 : index
    %264 = vector.load %arg13[%c0_80, %c0_81] : memref<32x128xbf16, #tpu.memory_space<vmem>>, vector<32x128xbf16>
    %265 = arith.truncf %240 : vector<2x32xf32> to vector<2x32xbf16>
    %cst_82 = arith.constant dense<0.000000e+00> : vector<2x128xf32>
    %266 = tpu.matmul %265, %264, %cst_82 {dimension_numbers = #tpu.dot_dimension_numbers<[1], [0], [0], [1], [0, 0, 1, 1], [], []>} : vector<2x32xbf16>, vector<32x128xbf16>, vector<2x128xf32> -> vector<2x128xf32>
    %267 = arith.addf %263, %266 : vector<2x128xf32>
    %c0_83 = arith.constant 0 : index
    %c0_84 = arith.constant 0 : index
    %268 = vector.load %arg14[%c0_83, %c0_84] : memref<1x128xf32, #tpu.memory_space<vmem>>, vector<1x128xf32>
    %269 = vector.broadcast %268 : vector<1x128xf32> to vector<2x128xf32>
    %270 = arith.addf %267, %269 : vector<2x128xf32>
    %271 = arith.negf %270 : vector<2x128xf32>
    %272 = math.exp %271 : vector<2x128xf32>
    %cst_85 = arith.constant 1.000000e+00 : f32
    %273 = vector.broadcast %cst_85 : f32 to vector<2x128xf32>
    %274 = arith.addf %273, %272 : vector<2x128xf32>
    %275 = arith.divf %273, %274 : vector<2x128xf32>
    %276 = math.tanh %270 : vector<2x128xf32>
    %277 = vector.extract_strided_slice %275 {offsets = [0, 0], sizes = [2, 32], strides = [1, 1]} : vector<2x128xf32> to vector<2x32xf32>
    %278 = vector.extract_strided_slice %275 {offsets = [0, 32], sizes = [2, 32], strides = [1, 1]} : vector<2x128xf32> to vector<2x32xf32>
    %279 = vector.extract_strided_slice %276 {offsets = [0, 64], sizes = [2, 32], strides = [1, 1]} : vector<2x128xf32> to vector<2x32xf32>
    %280 = vector.extract_strided_slice %275 {offsets = [0, 96], sizes = [2, 32], strides = [1, 1]} : vector<2x128xf32> to vector<2x32xf32>
    %281 = arith.mulf %278, %238 : vector<2x32xf32>
    %282 = arith.mulf %277, %279 : vector<2x32xf32>
    %283 = arith.addf %281, %282 : vector<2x32xf32>
    %284 = math.tanh %283 : vector<2x32xf32>
    %285 = arith.mulf %280, %284 : vector<2x32xf32>
    %286 = vector.extract_strided_slice %262 {offsets = [0, 128], sizes = [2, 128], strides = [1, 1]} : vector<2x256xf32> to vector<2x128xf32>
    %287 = vector.extract_strided_slice %162 {offsets = [0, 3, 0], sizes = [2, 1, 128], strides = [1, 1, 1]} : vector<2x8x128xf32> to vector<2x1x128xf32>
    %288 = vector.shape_cast %287 : vector<2x1x128xf32> to vector<2x128xf32>
    %289 = arith.addf %288, %286 : vector<2x128xf32>
    %290 = arith.negf %289 : vector<2x128xf32>
    %291 = math.exp %290 : vector<2x128xf32>
    %cst_86 = arith.constant 1.000000e+00 : f32
    %292 = vector.broadcast %cst_86 : f32 to vector<2x128xf32>
    %293 = arith.addf %292, %291 : vector<2x128xf32>
    %294 = arith.divf %292, %293 : vector<2x128xf32>
    %295 = math.tanh %289 : vector<2x128xf32>
    %296 = vector.extract_strided_slice %294 {offsets = [0, 0], sizes = [2, 32], strides = [1, 1]} : vector<2x128xf32> to vector<2x32xf32>
    %297 = vector.extract_strided_slice %294 {offsets = [0, 32], sizes = [2, 32], strides = [1, 1]} : vector<2x128xf32> to vector<2x32xf32>
    %298 = vector.extract_strided_slice %295 {offsets = [0, 64], sizes = [2, 32], strides = [1, 1]} : vector<2x128xf32> to vector<2x32xf32>
    %299 = vector.extract_strided_slice %294 {offsets = [0, 96], sizes = [2, 32], strides = [1, 1]} : vector<2x128xf32> to vector<2x32xf32>
    %300 = arith.mulf %297, %257 : vector<2x32xf32>
    %301 = arith.mulf %296, %298 : vector<2x32xf32>
    %302 = arith.addf %300, %301 : vector<2x32xf32>
    %303 = math.tanh %302 : vector<2x32xf32>
    %304 = arith.mulf %299, %303 : vector<2x32xf32>
    %c0_87 = arith.constant 0 : index
    %c0_88 = arith.constant 0 : index
    %305 = vector.load %arg12[%c0_87, %c0_88] : memref<32x256xbf16, #tpu.memory_space<vmem>>, vector<32x256xbf16>
    %306 = arith.truncf %304 : vector<2x32xf32> to vector<2x32xbf16>
    %cst_89 = arith.constant dense<0.000000e+00> : vector<2x256xf32>
    %307 = tpu.matmul %306, %305, %cst_89 {dimension_numbers = #tpu.dot_dimension_numbers<[1], [0], [0], [1], [0, 0, 1, 1], [], []>} : vector<2x32xbf16>, vector<32x256xbf16>, vector<2x256xf32> -> vector<2x256xf32>
    %308 = vector.extract_strided_slice %307 {offsets = [0, 0], sizes = [2, 128], strides = [1, 1]} : vector<2x256xf32> to vector<2x128xf32>
    %c0_90 = arith.constant 0 : index
    %c0_91 = arith.constant 0 : index
    %309 = vector.load %arg13[%c0_90, %c0_91] : memref<32x128xbf16, #tpu.memory_space<vmem>>, vector<32x128xbf16>
    %310 = arith.truncf %285 : vector<2x32xf32> to vector<2x32xbf16>
    %cst_92 = arith.constant dense<0.000000e+00> : vector<2x128xf32>
    %311 = tpu.matmul %310, %309, %cst_92 {dimension_numbers = #tpu.dot_dimension_numbers<[1], [0], [0], [1], [0, 0, 1, 1], [], []>} : vector<2x32xbf16>, vector<32x128xbf16>, vector<2x128xf32> -> vector<2x128xf32>
    %312 = arith.addf %308, %311 : vector<2x128xf32>
    %c0_93 = arith.constant 0 : index
    %c0_94 = arith.constant 0 : index
    %313 = vector.load %arg14[%c0_93, %c0_94] : memref<1x128xf32, #tpu.memory_space<vmem>>, vector<1x128xf32>
    %314 = vector.broadcast %313 : vector<1x128xf32> to vector<2x128xf32>
    %315 = arith.addf %312, %314 : vector<2x128xf32>
    %316 = arith.negf %315 : vector<2x128xf32>
    %317 = math.exp %316 : vector<2x128xf32>
    %cst_95 = arith.constant 1.000000e+00 : f32
    %318 = vector.broadcast %cst_95 : f32 to vector<2x128xf32>
    %319 = arith.addf %318, %317 : vector<2x128xf32>
    %320 = arith.divf %318, %319 : vector<2x128xf32>
    %321 = math.tanh %315 : vector<2x128xf32>
    %322 = vector.extract_strided_slice %320 {offsets = [0, 0], sizes = [2, 32], strides = [1, 1]} : vector<2x128xf32> to vector<2x32xf32>
    %323 = vector.extract_strided_slice %320 {offsets = [0, 32], sizes = [2, 32], strides = [1, 1]} : vector<2x128xf32> to vector<2x32xf32>
    %324 = vector.extract_strided_slice %321 {offsets = [0, 64], sizes = [2, 32], strides = [1, 1]} : vector<2x128xf32> to vector<2x32xf32>
    %325 = vector.extract_strided_slice %320 {offsets = [0, 96], sizes = [2, 32], strides = [1, 1]} : vector<2x128xf32> to vector<2x32xf32>
    %326 = arith.mulf %323, %283 : vector<2x32xf32>
    %327 = arith.mulf %322, %324 : vector<2x32xf32>
    %328 = arith.addf %326, %327 : vector<2x32xf32>
    %329 = math.tanh %328 : vector<2x32xf32>
    %330 = arith.mulf %325, %329 : vector<2x32xf32>
    %331 = vector.extract_strided_slice %307 {offsets = [0, 128], sizes = [2, 128], strides = [1, 1]} : vector<2x256xf32> to vector<2x128xf32>
    %332 = vector.extract_strided_slice %162 {offsets = [0, 4, 0], sizes = [2, 1, 128], strides = [1, 1, 1]} : vector<2x8x128xf32> to vector<2x1x128xf32>
    %333 = vector.shape_cast %332 : vector<2x1x128xf32> to vector<2x128xf32>
    %334 = arith.addf %333, %331 : vector<2x128xf32>
    %335 = arith.negf %334 : vector<2x128xf32>
    %336 = math.exp %335 : vector<2x128xf32>
    %cst_96 = arith.constant 1.000000e+00 : f32
    %337 = vector.broadcast %cst_96 : f32 to vector<2x128xf32>
    %338 = arith.addf %337, %336 : vector<2x128xf32>
    %339 = arith.divf %337, %338 : vector<2x128xf32>
    %340 = math.tanh %334 : vector<2x128xf32>
    %341 = vector.extract_strided_slice %339 {offsets = [0, 0], sizes = [2, 32], strides = [1, 1]} : vector<2x128xf32> to vector<2x32xf32>
    %342 = vector.extract_strided_slice %339 {offsets = [0, 32], sizes = [2, 32], strides = [1, 1]} : vector<2x128xf32> to vector<2x32xf32>
    %343 = vector.extract_strided_slice %340 {offsets = [0, 64], sizes = [2, 32], strides = [1, 1]} : vector<2x128xf32> to vector<2x32xf32>
    %344 = vector.extract_strided_slice %339 {offsets = [0, 96], sizes = [2, 32], strides = [1, 1]} : vector<2x128xf32> to vector<2x32xf32>
    %345 = arith.mulf %342, %302 : vector<2x32xf32>
    %346 = arith.mulf %341, %343 : vector<2x32xf32>
    %347 = arith.addf %345, %346 : vector<2x32xf32>
    %348 = math.tanh %347 : vector<2x32xf32>
    %349 = arith.mulf %344, %348 : vector<2x32xf32>
    %c0_97 = arith.constant 0 : index
    %c0_98 = arith.constant 0 : index
    %350 = vector.load %arg12[%c0_97, %c0_98] : memref<32x256xbf16, #tpu.memory_space<vmem>>, vector<32x256xbf16>
    %351 = arith.truncf %349 : vector<2x32xf32> to vector<2x32xbf16>
    %cst_99 = arith.constant dense<0.000000e+00> : vector<2x256xf32>
    %352 = tpu.matmul %351, %350, %cst_99 {dimension_numbers = #tpu.dot_dimension_numbers<[1], [0], [0], [1], [0, 0, 1, 1], [], []>} : vector<2x32xbf16>, vector<32x256xbf16>, vector<2x256xf32> -> vector<2x256xf32>
    %353 = vector.extract_strided_slice %352 {offsets = [0, 0], sizes = [2, 128], strides = [1, 1]} : vector<2x256xf32> to vector<2x128xf32>
    %c0_100 = arith.constant 0 : index
    %c0_101 = arith.constant 0 : index
    %354 = vector.load %arg13[%c0_100, %c0_101] : memref<32x128xbf16, #tpu.memory_space<vmem>>, vector<32x128xbf16>
    %355 = arith.truncf %330 : vector<2x32xf32> to vector<2x32xbf16>
    %cst_102 = arith.constant dense<0.000000e+00> : vector<2x128xf32>
    %356 = tpu.matmul %355, %354, %cst_102 {dimension_numbers = #tpu.dot_dimension_numbers<[1], [0], [0], [1], [0, 0, 1, 1], [], []>} : vector<2x32xbf16>, vector<32x128xbf16>, vector<2x128xf32> -> vector<2x128xf32>
    %357 = arith.addf %353, %356 : vector<2x128xf32>
    %c0_103 = arith.constant 0 : index
    %c0_104 = arith.constant 0 : index
    %358 = vector.load %arg14[%c0_103, %c0_104] : memref<1x128xf32, #tpu.memory_space<vmem>>, vector<1x128xf32>
    %359 = vector.broadcast %358 : vector<1x128xf32> to vector<2x128xf32>
    %360 = arith.addf %357, %359 : vector<2x128xf32>
    %361 = arith.negf %360 : vector<2x128xf32>
    %362 = math.exp %361 : vector<2x128xf32>
    %cst_105 = arith.constant 1.000000e+00 : f32
    %363 = vector.broadcast %cst_105 : f32 to vector<2x128xf32>
    %364 = arith.addf %363, %362 : vector<2x128xf32>
    %365 = arith.divf %363, %364 : vector<2x128xf32>
    %366 = math.tanh %360 : vector<2x128xf32>
    %367 = vector.extract_strided_slice %365 {offsets = [0, 0], sizes = [2, 32], strides = [1, 1]} : vector<2x128xf32> to vector<2x32xf32>
    %368 = vector.extract_strided_slice %365 {offsets = [0, 32], sizes = [2, 32], strides = [1, 1]} : vector<2x128xf32> to vector<2x32xf32>
    %369 = vector.extract_strided_slice %366 {offsets = [0, 64], sizes = [2, 32], strides = [1, 1]} : vector<2x128xf32> to vector<2x32xf32>
    %370 = vector.extract_strided_slice %365 {offsets = [0, 96], sizes = [2, 32], strides = [1, 1]} : vector<2x128xf32> to vector<2x32xf32>
    %371 = arith.mulf %368, %328 : vector<2x32xf32>
    %372 = arith.mulf %367, %369 : vector<2x32xf32>
    %373 = arith.addf %371, %372 : vector<2x32xf32>
    %374 = math.tanh %373 : vector<2x32xf32>
    %375 = arith.mulf %370, %374 : vector<2x32xf32>
    %376 = vector.extract_strided_slice %352 {offsets = [0, 128], sizes = [2, 128], strides = [1, 1]} : vector<2x256xf32> to vector<2x128xf32>
    %377 = vector.extract_strided_slice %162 {offsets = [0, 5, 0], sizes = [2, 1, 128], strides = [1, 1, 1]} : vector<2x8x128xf32> to vector<2x1x128xf32>
    %378 = vector.shape_cast %377 : vector<2x1x128xf32> to vector<2x128xf32>
    %379 = arith.addf %378, %376 : vector<2x128xf32>
    %380 = arith.negf %379 : vector<2x128xf32>
    %381 = math.exp %380 : vector<2x128xf32>
    %cst_106 = arith.constant 1.000000e+00 : f32
    %382 = vector.broadcast %cst_106 : f32 to vector<2x128xf32>
    %383 = arith.addf %382, %381 : vector<2x128xf32>
    %384 = arith.divf %382, %383 : vector<2x128xf32>
    %385 = math.tanh %379 : vector<2x128xf32>
    %386 = vector.extract_strided_slice %384 {offsets = [0, 0], sizes = [2, 32], strides = [1, 1]} : vector<2x128xf32> to vector<2x32xf32>
    %387 = vector.extract_strided_slice %384 {offsets = [0, 32], sizes = [2, 32], strides = [1, 1]} : vector<2x128xf32> to vector<2x32xf32>
    %388 = vector.extract_strided_slice %385 {offsets = [0, 64], sizes = [2, 32], strides = [1, 1]} : vector<2x128xf32> to vector<2x32xf32>
    %389 = vector.extract_strided_slice %384 {offsets = [0, 96], sizes = [2, 32], strides = [1, 1]} : vector<2x128xf32> to vector<2x32xf32>
    %390 = arith.mulf %387, %347 : vector<2x32xf32>
    %391 = arith.mulf %386, %388 : vector<2x32xf32>
    %392 = arith.addf %390, %391 : vector<2x32xf32>
    %393 = math.tanh %392 : vector<2x32xf32>
    %394 = arith.mulf %389, %393 : vector<2x32xf32>
    %c0_107 = arith.constant 0 : index
    %c0_108 = arith.constant 0 : index
    %395 = vector.load %arg12[%c0_107, %c0_108] : memref<32x256xbf16, #tpu.memory_space<vmem>>, vector<32x256xbf16>
    %396 = arith.truncf %394 : vector<2x32xf32> to vector<2x32xbf16>
    %cst_109 = arith.constant dense<0.000000e+00> : vector<2x256xf32>
    %397 = tpu.matmul %396, %395, %cst_109 {dimension_numbers = #tpu.dot_dimension_numbers<[1], [0], [0], [1], [0, 0, 1, 1], [], []>} : vector<2x32xbf16>, vector<32x256xbf16>, vector<2x256xf32> -> vector<2x256xf32>
    %398 = vector.extract_strided_slice %397 {offsets = [0, 0], sizes = [2, 128], strides = [1, 1]} : vector<2x256xf32> to vector<2x128xf32>
    %c0_110 = arith.constant 0 : index
    %c0_111 = arith.constant 0 : index
    %399 = vector.load %arg13[%c0_110, %c0_111] : memref<32x128xbf16, #tpu.memory_space<vmem>>, vector<32x128xbf16>
    %400 = arith.truncf %375 : vector<2x32xf32> to vector<2x32xbf16>
    %cst_112 = arith.constant dense<0.000000e+00> : vector<2x128xf32>
    %401 = tpu.matmul %400, %399, %cst_112 {dimension_numbers = #tpu.dot_dimension_numbers<[1], [0], [0], [1], [0, 0, 1, 1], [], []>} : vector<2x32xbf16>, vector<32x128xbf16>, vector<2x128xf32> -> vector<2x128xf32>
    %402 = arith.addf %398, %401 : vector<2x128xf32>
    %c0_113 = arith.constant 0 : index
    %c0_114 = arith.constant 0 : index
    %403 = vector.load %arg14[%c0_113, %c0_114] : memref<1x128xf32, #tpu.memory_space<vmem>>, vector<1x128xf32>
    %404 = vector.broadcast %403 : vector<1x128xf32> to vector<2x128xf32>
    %405 = arith.addf %402, %404 : vector<2x128xf32>
    %406 = arith.negf %405 : vector<2x128xf32>
    %407 = math.exp %406 : vector<2x128xf32>
    %cst_115 = arith.constant 1.000000e+00 : f32
    %408 = vector.broadcast %cst_115 : f32 to vector<2x128xf32>
    %409 = arith.addf %408, %407 : vector<2x128xf32>
    %410 = arith.divf %408, %409 : vector<2x128xf32>
    %411 = math.tanh %405 : vector<2x128xf32>
    %412 = vector.extract_strided_slice %410 {offsets = [0, 0], sizes = [2, 32], strides = [1, 1]} : vector<2x128xf32> to vector<2x32xf32>
    %413 = vector.extract_strided_slice %410 {offsets = [0, 32], sizes = [2, 32], strides = [1, 1]} : vector<2x128xf32> to vector<2x32xf32>
    %414 = vector.extract_strided_slice %411 {offsets = [0, 64], sizes = [2, 32], strides = [1, 1]} : vector<2x128xf32> to vector<2x32xf32>
    %415 = vector.extract_strided_slice %410 {offsets = [0, 96], sizes = [2, 32], strides = [1, 1]} : vector<2x128xf32> to vector<2x32xf32>
    %416 = arith.mulf %413, %373 : vector<2x32xf32>
    %417 = arith.mulf %412, %414 : vector<2x32xf32>
    %418 = arith.addf %416, %417 : vector<2x32xf32>
    %419 = math.tanh %418 : vector<2x32xf32>
    %420 = arith.mulf %415, %419 : vector<2x32xf32>
    %421 = vector.extract_strided_slice %397 {offsets = [0, 128], sizes = [2, 128], strides = [1, 1]} : vector<2x256xf32> to vector<2x128xf32>
    %422 = vector.extract_strided_slice %162 {offsets = [0, 6, 0], sizes = [2, 1, 128], strides = [1, 1, 1]} : vector<2x8x128xf32> to vector<2x1x128xf32>
    %423 = vector.shape_cast %422 : vector<2x1x128xf32> to vector<2x128xf32>
    %424 = arith.addf %423, %421 : vector<2x128xf32>
    %425 = arith.negf %424 : vector<2x128xf32>
    %426 = math.exp %425 : vector<2x128xf32>
    %cst_116 = arith.constant 1.000000e+00 : f32
    %427 = vector.broadcast %cst_116 : f32 to vector<2x128xf32>
    %428 = arith.addf %427, %426 : vector<2x128xf32>
    %429 = arith.divf %427, %428 : vector<2x128xf32>
    %430 = math.tanh %424 : vector<2x128xf32>
    %431 = vector.extract_strided_slice %429 {offsets = [0, 0], sizes = [2, 32], strides = [1, 1]} : vector<2x128xf32> to vector<2x32xf32>
    %432 = vector.extract_strided_slice %429 {offsets = [0, 32], sizes = [2, 32], strides = [1, 1]} : vector<2x128xf32> to vector<2x32xf32>
    %433 = vector.extract_strided_slice %430 {offsets = [0, 64], sizes = [2, 32], strides = [1, 1]} : vector<2x128xf32> to vector<2x32xf32>
    %434 = vector.extract_strided_slice %429 {offsets = [0, 96], sizes = [2, 32], strides = [1, 1]} : vector<2x128xf32> to vector<2x32xf32>
    %435 = arith.mulf %432, %392 : vector<2x32xf32>
    %436 = arith.mulf %431, %433 : vector<2x32xf32>
    %437 = arith.addf %435, %436 : vector<2x32xf32>
    %438 = math.tanh %437 : vector<2x32xf32>
    %439 = arith.mulf %434, %438 : vector<2x32xf32>
    %c0_117 = arith.constant 0 : index
    %c0_118 = arith.constant 0 : index
    %440 = vector.load %arg12[%c0_117, %c0_118] : memref<32x256xbf16, #tpu.memory_space<vmem>>, vector<32x256xbf16>
    %441 = arith.truncf %439 : vector<2x32xf32> to vector<2x32xbf16>
    %cst_119 = arith.constant dense<0.000000e+00> : vector<2x256xf32>
    %442 = tpu.matmul %441, %440, %cst_119 {dimension_numbers = #tpu.dot_dimension_numbers<[1], [0], [0], [1], [0, 0, 1, 1], [], []>} : vector<2x32xbf16>, vector<32x256xbf16>, vector<2x256xf32> -> vector<2x256xf32>
    %443 = vector.extract_strided_slice %442 {offsets = [0, 0], sizes = [2, 128], strides = [1, 1]} : vector<2x256xf32> to vector<2x128xf32>
    %c0_120 = arith.constant 0 : index
    %c0_121 = arith.constant 0 : index
    %444 = vector.load %arg13[%c0_120, %c0_121] : memref<32x128xbf16, #tpu.memory_space<vmem>>, vector<32x128xbf16>
    %445 = arith.truncf %420 : vector<2x32xf32> to vector<2x32xbf16>
    %cst_122 = arith.constant dense<0.000000e+00> : vector<2x128xf32>
    %446 = tpu.matmul %445, %444, %cst_122 {dimension_numbers = #tpu.dot_dimension_numbers<[1], [0], [0], [1], [0, 0, 1, 1], [], []>} : vector<2x32xbf16>, vector<32x128xbf16>, vector<2x128xf32> -> vector<2x128xf32>
    %447 = arith.addf %443, %446 : vector<2x128xf32>
    %c0_123 = arith.constant 0 : index
    %c0_124 = arith.constant 0 : index
    %448 = vector.load %arg14[%c0_123, %c0_124] : memref<1x128xf32, #tpu.memory_space<vmem>>, vector<1x128xf32>
    %449 = vector.broadcast %448 : vector<1x128xf32> to vector<2x128xf32>
    %450 = arith.addf %447, %449 : vector<2x128xf32>
    %451 = arith.negf %450 : vector<2x128xf32>
    %452 = math.exp %451 : vector<2x128xf32>
    %cst_125 = arith.constant 1.000000e+00 : f32
    %453 = vector.broadcast %cst_125 : f32 to vector<2x128xf32>
    %454 = arith.addf %453, %452 : vector<2x128xf32>
    %455 = arith.divf %453, %454 : vector<2x128xf32>
    %456 = math.tanh %450 : vector<2x128xf32>
    %457 = vector.extract_strided_slice %455 {offsets = [0, 0], sizes = [2, 32], strides = [1, 1]} : vector<2x128xf32> to vector<2x32xf32>
    %458 = vector.extract_strided_slice %455 {offsets = [0, 32], sizes = [2, 32], strides = [1, 1]} : vector<2x128xf32> to vector<2x32xf32>
    %459 = vector.extract_strided_slice %456 {offsets = [0, 64], sizes = [2, 32], strides = [1, 1]} : vector<2x128xf32> to vector<2x32xf32>
    %460 = vector.extract_strided_slice %455 {offsets = [0, 96], sizes = [2, 32], strides = [1, 1]} : vector<2x128xf32> to vector<2x32xf32>
    %461 = arith.mulf %458, %418 : vector<2x32xf32>
    %462 = arith.mulf %457, %459 : vector<2x32xf32>
    %463 = arith.addf %461, %462 : vector<2x32xf32>
    %464 = math.tanh %463 : vector<2x32xf32>
    %465 = arith.mulf %460, %464 : vector<2x32xf32>
    %466 = vector.extract_strided_slice %442 {offsets = [0, 128], sizes = [2, 128], strides = [1, 1]} : vector<2x256xf32> to vector<2x128xf32>
    %467 = vector.extract_strided_slice %162 {offsets = [0, 7, 0], sizes = [2, 1, 128], strides = [1, 1, 1]} : vector<2x8x128xf32> to vector<2x1x128xf32>
    %468 = vector.shape_cast %467 : vector<2x1x128xf32> to vector<2x128xf32>
    %469 = arith.addf %468, %466 : vector<2x128xf32>
    %470 = arith.negf %469 : vector<2x128xf32>
    %471 = math.exp %470 : vector<2x128xf32>
    %cst_126 = arith.constant 1.000000e+00 : f32
    %472 = vector.broadcast %cst_126 : f32 to vector<2x128xf32>
    %473 = arith.addf %472, %471 : vector<2x128xf32>
    %474 = arith.divf %472, %473 : vector<2x128xf32>
    %475 = math.tanh %469 : vector<2x128xf32>
    %476 = vector.extract_strided_slice %474 {offsets = [0, 0], sizes = [2, 32], strides = [1, 1]} : vector<2x128xf32> to vector<2x32xf32>
    %477 = vector.extract_strided_slice %474 {offsets = [0, 32], sizes = [2, 32], strides = [1, 1]} : vector<2x128xf32> to vector<2x32xf32>
    %478 = vector.extract_strided_slice %475 {offsets = [0, 64], sizes = [2, 32], strides = [1, 1]} : vector<2x128xf32> to vector<2x32xf32>
    %479 = vector.extract_strided_slice %474 {offsets = [0, 96], sizes = [2, 32], strides = [1, 1]} : vector<2x128xf32> to vector<2x32xf32>
    %480 = arith.mulf %477, %437 : vector<2x32xf32>
    %481 = arith.mulf %476, %478 : vector<2x32xf32>
    %482 = arith.addf %480, %481 : vector<2x32xf32>
    %483 = math.tanh %482 : vector<2x32xf32>
    %484 = arith.mulf %479, %483 : vector<2x32xf32>
    %c0_127 = arith.constant 0 : index
    %c0_128 = arith.constant 0 : index
    %485 = vector.load %arg12[%c0_127, %c0_128] : memref<32x256xbf16, #tpu.memory_space<vmem>>, vector<32x256xbf16>
    %486 = arith.truncf %484 : vector<2x32xf32> to vector<2x32xbf16>
    %cst_129 = arith.constant dense<0.000000e+00> : vector<2x256xf32>
    %487 = tpu.matmul %486, %485, %cst_129 {dimension_numbers = #tpu.dot_dimension_numbers<[1], [0], [0], [1], [0, 0, 1, 1], [], []>} : vector<2x32xbf16>, vector<32x256xbf16>, vector<2x256xf32> -> vector<2x256xf32>
    %488 = vector.extract_strided_slice %487 {offsets = [0, 0], sizes = [2, 128], strides = [1, 1]} : vector<2x256xf32> to vector<2x128xf32>
    %c0_130 = arith.constant 0 : index
    %c0_131 = arith.constant 0 : index
    %489 = vector.load %arg13[%c0_130, %c0_131] : memref<32x128xbf16, #tpu.memory_space<vmem>>, vector<32x128xbf16>
    %490 = arith.truncf %465 : vector<2x32xf32> to vector<2x32xbf16>
    %cst_132 = arith.constant dense<0.000000e+00> : vector<2x128xf32>
    %491 = tpu.matmul %490, %489, %cst_132 {dimension_numbers = #tpu.dot_dimension_numbers<[1], [0], [0], [1], [0, 0, 1, 1], [], []>} : vector<2x32xbf16>, vector<32x128xbf16>, vector<2x128xf32> -> vector<2x128xf32>
    %492 = arith.addf %488, %491 : vector<2x128xf32>
    %c0_133 = arith.constant 0 : index
    %c0_134 = arith.constant 0 : index
    %493 = vector.load %arg14[%c0_133, %c0_134] : memref<1x128xf32, #tpu.memory_space<vmem>>, vector<1x128xf32>
    %494 = vector.broadcast %493 : vector<1x128xf32> to vector<2x128xf32>
    %495 = arith.addf %492, %494 : vector<2x128xf32>
    %496 = arith.negf %495 : vector<2x128xf32>
    %497 = math.exp %496 : vector<2x128xf32>
    %cst_135 = arith.constant 1.000000e+00 : f32
    %498 = vector.broadcast %cst_135 : f32 to vector<2x128xf32>
    %499 = arith.addf %498, %497 : vector<2x128xf32>
    %500 = arith.divf %498, %499 : vector<2x128xf32>
    %501 = math.tanh %495 : vector<2x128xf32>
    %502 = vector.extract_strided_slice %500 {offsets = [0, 0], sizes = [2, 32], strides = [1, 1]} : vector<2x128xf32> to vector<2x32xf32>
    %503 = vector.extract_strided_slice %500 {offsets = [0, 32], sizes = [2, 32], strides = [1, 1]} : vector<2x128xf32> to vector<2x32xf32>
    %504 = vector.extract_strided_slice %501 {offsets = [0, 64], sizes = [2, 32], strides = [1, 1]} : vector<2x128xf32> to vector<2x32xf32>
    %505 = vector.extract_strided_slice %500 {offsets = [0, 96], sizes = [2, 32], strides = [1, 1]} : vector<2x128xf32> to vector<2x32xf32>
    %506 = arith.mulf %503, %463 : vector<2x32xf32>
    %507 = arith.mulf %502, %504 : vector<2x32xf32>
    %508 = arith.addf %506, %507 : vector<2x32xf32>
    %509 = math.tanh %508 : vector<2x32xf32>
    %510 = arith.mulf %505, %509 : vector<2x32xf32>
    %c0_136 = arith.constant 0 : index
    %c0_137 = arith.constant 0 : index
    %511 = vector.load %arg15[%c0_136, %c0_137] : memref<32x32xbf16, #tpu.memory_space<vmem>>, vector<32x32xbf16>
    %512 = arith.truncf %510 : vector<2x32xf32> to vector<2x32xbf16>
    %cst_138 = arith.constant dense<0.000000e+00> : vector<2x32xf32>
    %513 = tpu.matmul %512, %511, %cst_138 {dimension_numbers = #tpu.dot_dimension_numbers<[1], [0], [0], [1], [0, 0, 1, 1], [], []>} : vector<2x32xbf16>, vector<32x32xbf16>, vector<2x32xf32> -> vector<2x32xf32>
    %c0_139 = arith.constant 0 : index
    %c0_140 = arith.constant 0 : index
    %514 = vector.load %arg16[%c0_139, %c0_140] : memref<1x32xf32, #tpu.memory_space<vmem>>, vector<1x32xf32>
    %515 = vector.broadcast %514 : vector<1x32xf32> to vector<2x32xf32>
    %516 = arith.addf %513, %515 : vector<2x32xf32>
    %c0_141 = arith.constant 0 : index
    %c0_142 = arith.constant 0 : index
    %517 = vector.load %arg27[%c0_141, %c0_142] : memref<2x32xf32, #tpu.memory_space<vmem>>, vector<2x32xf32>
    tpu.vector_store %arg27[%c0_141, %c0_142], %516 {strides = array<i32>} : memref<2x32xf32, #tpu.memory_space<vmem>>, vector<2x32xf32>,
    %518 = vector.extract_strided_slice %516 {offsets = [0, 0], sizes = [2, 16], strides = [1, 1]} : vector<2x32xf32> to vector<2x16xf32>
    %519 = vector.extract_strided_slice %516 {offsets = [0, 16], sizes = [2, 16], strides = [1, 1]} : vector<2x32xf32> to vector<2x16xf32>
    %cst_143 = arith.constant 5.000000e-01 : f32
    %520 = vector.broadcast %cst_143 : f32 to vector<2x16xf32>
    %521 = arith.mulf %520, %519 : vector<2x16xf32>
    %522 = math.exp %521 : vector<2x16xf32>
    %c0_144 = arith.constant 0 : index
    %c0_145 = arith.constant 0 : index
    %523 = vector.load %arg4[%c0_144, %c0_145] : memref<2x16xf32, #tpu.memory_space<vmem>>, vector<2x16xf32>
    %524 = arith.mulf %522, %523 : vector<2x16xf32>
    %525 = arith.addf %518, %524 : vector<2x16xf32>
    %c0_146 = arith.constant 0 : index
    %c0_147 = arith.constant 0 : index
    %526 = vector.load %arg17[%c0_146, %c0_147] : memref<16x32xbf16, #tpu.memory_space<vmem>>, vector<16x32xbf16>
    %527 = arith.truncf %525 : vector<2x16xf32> to vector<2x16xbf16>
    %cst_148 = arith.constant dense<0.000000e+00> : vector<2x32xf32>
    %528 = tpu.matmul %527, %526, %cst_148 {dimension_numbers = #tpu.dot_dimension_numbers<[1], [0], [0], [1], [0, 0, 1, 1], [], []>} : vector<2x16xbf16>, vector<16x32xbf16>, vector<2x32xf32> -> vector<2x32xf32>
    %c0_149 = arith.constant 0 : index
    %c0_150 = arith.constant 0 : index
    %529 = vector.load %arg18[%c0_149, %c0_150] : memref<1x32xf32, #tpu.memory_space<vmem>>, vector<1x32xf32>
    %530 = vector.broadcast %529 : vector<1x32xf32> to vector<2x32xf32>
    %531 = arith.addf %528, %530 : vector<2x32xf32>
    %cst_151 = arith.constant 0.000000e+00 : f32
    %532 = vector.broadcast %cst_151 : f32 to vector<2x32xf32>
    %533 = arith.maximumf %531, %532 : vector<2x32xf32>
    %c0_152 = arith.constant 0 : index
    %c0_153 = arith.constant 0 : index
    %534 = vector.load %arg19[%c0_152, %c0_153] : memref<32x128xbf16, #tpu.memory_space<vmem>>, vector<32x128xbf16>
    %535 = arith.truncf %533 : vector<2x32xf32> to vector<2x32xbf16>
    %cst_154 = arith.constant dense<0.000000e+00> : vector<2x128xf32>
    %536 = tpu.matmul %535, %534, %cst_154 {dimension_numbers = #tpu.dot_dimension_numbers<[1], [0], [0], [1], [0, 0, 1, 1], [], []>} : vector<2x32xbf16>, vector<32x128xbf16>, vector<2x128xf32> -> vector<2x128xf32>
    %c0_155 = arith.constant 0 : index
    %c0_156 = arith.constant 0 : index
    %537 = vector.load %arg20[%c0_155, %c0_156] : memref<1x128xf32, #tpu.memory_space<vmem>>, vector<1x128xf32>
    %538 = vector.broadcast %537 : vector<1x128xf32> to vector<2x128xf32>
    %539 = arith.addf %536, %538 : vector<2x128xf32>
    %540 = arith.negf %539 : vector<2x128xf32>
    %541 = math.exp %540 : vector<2x128xf32>
    %cst_157 = arith.constant 1.000000e+00 : f32
    %542 = vector.broadcast %cst_157 : f32 to vector<2x128xf32>
    %543 = arith.addf %542, %541 : vector<2x128xf32>
    %544 = arith.divf %542, %543 : vector<2x128xf32>
    %545 = math.tanh %539 : vector<2x128xf32>
    %546 = vector.extract_strided_slice %544 {offsets = [0, 0], sizes = [2, 32], strides = [1, 1]} : vector<2x128xf32> to vector<2x32xf32>
    %547 = vector.extract_strided_slice %545 {offsets = [0, 64], sizes = [2, 32], strides = [1, 1]} : vector<2x128xf32> to vector<2x32xf32>
    %548 = vector.extract_strided_slice %544 {offsets = [0, 96], sizes = [2, 32], strides = [1, 1]} : vector<2x128xf32> to vector<2x32xf32>
    %549 = arith.mulf %546, %547 : vector<2x32xf32>
    %550 = math.tanh %549 : vector<2x32xf32>
    %551 = arith.mulf %548, %550 : vector<2x32xf32>
    %c0_158 = arith.constant 0 : index
    %c0_159 = arith.constant 0 : index
    %552 = vector.load %arg21[%c0_158, %c0_159] : memref<32x256xbf16, #tpu.memory_space<vmem>>, vector<32x256xbf16>
    %553 = arith.truncf %551 : vector<2x32xf32> to vector<2x32xbf16>
    %cst_160 = arith.constant dense<0.000000e+00> : vector<2x256xf32>
    %554 = tpu.matmul %553, %552, %cst_160 {dimension_numbers = #tpu.dot_dimension_numbers<[1], [0], [0], [1], [0, 0, 1, 1], [], []>} : vector<2x32xbf16>, vector<32x256xbf16>, vector<2x256xf32> -> vector<2x256xf32>
    %555 = vector.extract_strided_slice %554 {offsets = [0, 0], sizes = [2, 128], strides = [1, 1]} : vector<2x256xf32> to vector<2x128xf32>
    %c0_161 = arith.constant 0 : index
    %c0_162 = arith.constant 0 : index
    %556 = vector.load %arg23[%c0_161, %c0_162] : memref<1x128xf32, #tpu.memory_space<vmem>>, vector<1x128xf32>
    %557 = vector.broadcast %556 : vector<1x128xf32> to vector<2x128xf32>
    %558 = arith.addf %555, %557 : vector<2x128xf32>
    %559 = arith.negf %558 : vector<2x128xf32>
    %560 = math.exp %559 : vector<2x128xf32>
    %cst_163 = arith.constant 1.000000e+00 : f32
    %561 = vector.broadcast %cst_163 : f32 to vector<2x128xf32>
    %562 = arith.addf %561, %560 : vector<2x128xf32>
    %563 = arith.divf %561, %562 : vector<2x128xf32>
    %564 = math.tanh %558 : vector<2x128xf32>
    %565 = vector.extract_strided_slice %563 {offsets = [0, 0], sizes = [2, 32], strides = [1, 1]} : vector<2x128xf32> to vector<2x32xf32>
    %566 = vector.extract_strided_slice %564 {offsets = [0, 64], sizes = [2, 32], strides = [1, 1]} : vector<2x128xf32> to vector<2x32xf32>
    %567 = vector.extract_strided_slice %563 {offsets = [0, 96], sizes = [2, 32], strides = [1, 1]} : vector<2x128xf32> to vector<2x32xf32>
    %568 = arith.mulf %565, %566 : vector<2x32xf32>
    %569 = math.tanh %568 : vector<2x32xf32>
    %570 = arith.mulf %567, %569 : vector<2x32xf32>
    %571 = vector.extract_strided_slice %554 {offsets = [0, 128], sizes = [2, 128], strides = [1, 1]} : vector<2x256xf32> to vector<2x128xf32>
    %572 = arith.addf %539, %571 : vector<2x128xf32>
    %573 = arith.negf %572 : vector<2x128xf32>
    %574 = math.exp %573 : vector<2x128xf32>
    %cst_164 = arith.constant 1.000000e+00 : f32
    %575 = vector.broadcast %cst_164 : f32 to vector<2x128xf32>
    %576 = arith.addf %575, %574 : vector<2x128xf32>
    %577 = arith.divf %575, %576 : vector<2x128xf32>
    %578 = math.tanh %572 : vector<2x128xf32>
    %579 = vector.extract_strided_slice %577 {offsets = [0, 0], sizes = [2, 32], strides = [1, 1]} : vector<2x128xf32> to vector<2x32xf32>
    %580 = vector.extract_strided_slice %577 {offsets = [0, 32], sizes = [2, 32], strides = [1, 1]} : vector<2x128xf32> to vector<2x32xf32>
    %581 = vector.extract_strided_slice %578 {offsets = [0, 64], sizes = [2, 32], strides = [1, 1]} : vector<2x128xf32> to vector<2x32xf32>
    %582 = vector.extract_strided_slice %577 {offsets = [0, 96], sizes = [2, 32], strides = [1, 1]} : vector<2x128xf32> to vector<2x32xf32>
    %583 = arith.mulf %580, %549 : vector<2x32xf32>
    %584 = arith.mulf %579, %581 : vector<2x32xf32>
    %585 = arith.addf %583, %584 : vector<2x32xf32>
    %586 = math.tanh %585 : vector<2x32xf32>
    %587 = arith.mulf %582, %586 : vector<2x32xf32>
    %c0_165 = arith.constant 0 : index
    %c0_166 = arith.constant 0 : index
    %588 = vector.load %arg21[%c0_165, %c0_166] : memref<32x256xbf16, #tpu.memory_space<vmem>>, vector<32x256xbf16>
    %589 = arith.truncf %587 : vector<2x32xf32> to vector<2x32xbf16>
    %cst_167 = arith.constant dense<0.000000e+00> : vector<2x256xf32>
    %590 = tpu.matmul %589, %588, %cst_167 {dimension_numbers = #tpu.dot_dimension_numbers<[1], [0], [0], [1], [0, 0, 1, 1], [], []>} : vector<2x32xbf16>, vector<32x256xbf16>, vector<2x256xf32> -> vector<2x256xf32>
    %591 = vector.extract_strided_slice %590 {offsets = [0, 0], sizes = [2, 128], strides = [1, 1]} : vector<2x256xf32> to vector<2x128xf32>
    %c0_168 = arith.constant 0 : index
    %c0_169 = arith.constant 0 : index
    %592 = vector.load %arg22[%c0_168, %c0_169] : memref<32x128xbf16, #tpu.memory_space<vmem>>, vector<32x128xbf16>
    %593 = arith.truncf %570 : vector<2x32xf32> to vector<2x32xbf16>
    %cst_170 = arith.constant dense<0.000000e+00> : vector<2x128xf32>
    %594 = tpu.matmul %593, %592, %cst_170 {dimension_numbers = #tpu.dot_dimension_numbers<[1], [0], [0], [1], [0, 0, 1, 1], [], []>} : vector<2x32xbf16>, vector<32x128xbf16>, vector<2x128xf32> -> vector<2x128xf32>
    %595 = arith.addf %591, %594 : vector<2x128xf32>
    %c0_171 = arith.constant 0 : index
    %c0_172 = arith.constant 0 : index
    %596 = vector.load %arg23[%c0_171, %c0_172] : memref<1x128xf32, #tpu.memory_space<vmem>>, vector<1x128xf32>
    %597 = vector.broadcast %596 : vector<1x128xf32> to vector<2x128xf32>
    %598 = arith.addf %595, %597 : vector<2x128xf32>
    %599 = arith.negf %598 : vector<2x128xf32>
    %600 = math.exp %599 : vector<2x128xf32>
    %cst_173 = arith.constant 1.000000e+00 : f32
    %601 = vector.broadcast %cst_173 : f32 to vector<2x128xf32>
    %602 = arith.addf %601, %600 : vector<2x128xf32>
    %603 = arith.divf %601, %602 : vector<2x128xf32>
    %604 = math.tanh %598 : vector<2x128xf32>
    %605 = vector.extract_strided_slice %603 {offsets = [0, 0], sizes = [2, 32], strides = [1, 1]} : vector<2x128xf32> to vector<2x32xf32>
    %606 = vector.extract_strided_slice %603 {offsets = [0, 32], sizes = [2, 32], strides = [1, 1]} : vector<2x128xf32> to vector<2x32xf32>
    %607 = vector.extract_strided_slice %604 {offsets = [0, 64], sizes = [2, 32], strides = [1, 1]} : vector<2x128xf32> to vector<2x32xf32>
    %608 = vector.extract_strided_slice %603 {offsets = [0, 96], sizes = [2, 32], strides = [1, 1]} : vector<2x128xf32> to vector<2x32xf32>
    %609 = arith.mulf %606, %568 : vector<2x32xf32>
    %610 = arith.mulf %605, %607 : vector<2x32xf32>
    %611 = arith.addf %609, %610 : vector<2x32xf32>
    %612 = math.tanh %611 : vector<2x32xf32>
    %613 = arith.mulf %608, %612 : vector<2x32xf32>
    %614 = vector.extract_strided_slice %590 {offsets = [0, 128], sizes = [2, 128], strides = [1, 1]} : vector<2x256xf32> to vector<2x128xf32>
    %615 = arith.addf %539, %614 : vector<2x128xf32>
    %616 = arith.negf %615 : vector<2x128xf32>
    %617 = math.exp %616 : vector<2x128xf32>
    %cst_174 = arith.constant 1.000000e+00 : f32
    %618 = vector.broadcast %cst_174 : f32 to vector<2x128xf32>
    %619 = arith.addf %618, %617 : vector<2x128xf32>
    %620 = arith.divf %618, %619 : vector<2x128xf32>
    %621 = math.tanh %615 : vector<2x128xf32>
    %622 = vector.extract_strided_slice %620 {offsets = [0, 0], sizes = [2, 32], strides = [1, 1]} : vector<2x128xf32> to vector<2x32xf32>
    %623 = vector.extract_strided_slice %620 {offsets = [0, 32], sizes = [2, 32], strides = [1, 1]} : vector<2x128xf32> to vector<2x32xf32>
    %624 = vector.extract_strided_slice %621 {offsets = [0, 64], sizes = [2, 32], strides = [1, 1]} : vector<2x128xf32> to vector<2x32xf32>
    %625 = vector.extract_strided_slice %620 {offsets = [0, 96], sizes = [2, 32], strides = [1, 1]} : vector<2x128xf32> to vector<2x32xf32>
    %626 = arith.mulf %623, %585 : vector<2x32xf32>
    %627 = arith.mulf %622, %624 : vector<2x32xf32>
    %628 = arith.addf %626, %627 : vector<2x32xf32>
    %629 = math.tanh %628 : vector<2x32xf32>
    %630 = arith.mulf %625, %629 : vector<2x32xf32>
    %c0_175 = arith.constant 0 : index
    %c0_176 = arith.constant 0 : index
    %631 = vector.load %arg21[%c0_175, %c0_176] : memref<32x256xbf16, #tpu.memory_space<vmem>>, vector<32x256xbf16>
    %632 = arith.truncf %630 : vector<2x32xf32> to vector<2x32xbf16>
    %cst_177 = arith.constant dense<0.000000e+00> : vector<2x256xf32>
    %633 = tpu.matmul %632, %631, %cst_177 {dimension_numbers = #tpu.dot_dimension_numbers<[1], [0], [0], [1], [0, 0, 1, 1], [], []>} : vector<2x32xbf16>, vector<32x256xbf16>, vector<2x256xf32> -> vector<2x256xf32>
    %634 = vector.extract_strided_slice %633 {offsets = [0, 0], sizes = [2, 128], strides = [1, 1]} : vector<2x256xf32> to vector<2x128xf32>
    %c0_178 = arith.constant 0 : index
    %c0_179 = arith.constant 0 : index
    %635 = vector.load %arg22[%c0_178, %c0_179] : memref<32x128xbf16, #tpu.memory_space<vmem>>, vector<32x128xbf16>
    %636 = arith.truncf %613 : vector<2x32xf32> to vector<2x32xbf16>
    %cst_180 = arith.constant dense<0.000000e+00> : vector<2x128xf32>
    %637 = tpu.matmul %636, %635, %cst_180 {dimension_numbers = #tpu.dot_dimension_numbers<[1], [0], [0], [1], [0, 0, 1, 1], [], []>} : vector<2x32xbf16>, vector<32x128xbf16>, vector<2x128xf32> -> vector<2x128xf32>
    %638 = arith.addf %634, %637 : vector<2x128xf32>
    %c0_181 = arith.constant 0 : index
    %c0_182 = arith.constant 0 : index
    %639 = vector.load %arg23[%c0_181, %c0_182] : memref<1x128xf32, #tpu.memory_space<vmem>>, vector<1x128xf32>
    %640 = vector.broadcast %639 : vector<1x128xf32> to vector<2x128xf32>
    %641 = arith.addf %638, %640 : vector<2x128xf32>
    %642 = arith.negf %641 : vector<2x128xf32>
    %643 = math.exp %642 : vector<2x128xf32>
    %cst_183 = arith.constant 1.000000e+00 : f32
    %644 = vector.broadcast %cst_183 : f32 to vector<2x128xf32>
    %645 = arith.addf %644, %643 : vector<2x128xf32>
    %646 = arith.divf %644, %645 : vector<2x128xf32>
    %647 = math.tanh %641 : vector<2x128xf32>
    %648 = vector.extract_strided_slice %646 {offsets = [0, 0], sizes = [2, 32], strides = [1, 1]} : vector<2x128xf32> to vector<2x32xf32>
    %649 = vector.extract_strided_slice %646 {offsets = [0, 32], sizes = [2, 32], strides = [1, 1]} : vector<2x128xf32> to vector<2x32xf32>
    %650 = vector.extract_strided_slice %647 {offsets = [0, 64], sizes = [2, 32], strides = [1, 1]} : vector<2x128xf32> to vector<2x32xf32>
    %651 = vector.extract_strided_slice %646 {offsets = [0, 96], sizes = [2, 32], strides = [1, 1]} : vector<2x128xf32> to vector<2x32xf32>
    %652 = arith.mulf %649, %611 : vector<2x32xf32>
    %653 = arith.mulf %648, %650 : vector<2x32xf32>
    %654 = arith.addf %652, %653 : vector<2x32xf32>
    %655 = math.tanh %654 : vector<2x32xf32>
    %656 = arith.mulf %651, %655 : vector<2x32xf32>
    %657 = vector.extract_strided_slice %633 {offsets = [0, 128], sizes = [2, 128], strides = [1, 1]} : vector<2x256xf32> to vector<2x128xf32>
    %658 = arith.addf %539, %657 : vector<2x128xf32>
    %659 = arith.negf %658 : vector<2x128xf32>
    %660 = math.exp %659 : vector<2x128xf32>
    %cst_184 = arith.constant 1.000000e+00 : f32
    %661 = vector.broadcast %cst_184 : f32 to vector<2x128xf32>
    %662 = arith.addf %661, %660 : vector<2x128xf32>
    %663 = arith.divf %661, %662 : vector<2x128xf32>
    %664 = math.tanh %658 : vector<2x128xf32>
    %665 = vector.extract_strided_slice %663 {offsets = [0, 0], sizes = [2, 32], strides = [1, 1]} : vector<2x128xf32> to vector<2x32xf32>
    %666 = vector.extract_strided_slice %663 {offsets = [0, 32], sizes = [2, 32], strides = [1, 1]} : vector<2x128xf32> to vector<2x32xf32>
    %667 = vector.extract_strided_slice %664 {offsets = [0, 64], sizes = [2, 32], strides = [1, 1]} : vector<2x128xf32> to vector<2x32xf32>
    %668 = vector.extract_strided_slice %663 {offsets = [0, 96], sizes = [2, 32], strides = [1, 1]} : vector<2x128xf32> to vector<2x32xf32>
    %669 = arith.mulf %666, %628 : vector<2x32xf32>
    %670 = arith.mulf %665, %667 : vector<2x32xf32>
    %671 = arith.addf %669, %670 : vector<2x32xf32>
    %672 = math.tanh %671 : vector<2x32xf32>
    %673 = arith.mulf %668, %672 : vector<2x32xf32>
    %c0_185 = arith.constant 0 : index
    %c0_186 = arith.constant 0 : index
    %674 = vector.load %arg21[%c0_185, %c0_186] : memref<32x256xbf16, #tpu.memory_space<vmem>>, vector<32x256xbf16>
    %675 = arith.truncf %673 : vector<2x32xf32> to vector<2x32xbf16>
    %cst_187 = arith.constant dense<0.000000e+00> : vector<2x256xf32>
    %676 = tpu.matmul %675, %674, %cst_187 {dimension_numbers = #tpu.dot_dimension_numbers<[1], [0], [0], [1], [0, 0, 1, 1], [], []>} : vector<2x32xbf16>, vector<32x256xbf16>, vector<2x256xf32> -> vector<2x256xf32>
    %677 = vector.extract_strided_slice %676 {offsets = [0, 0], sizes = [2, 128], strides = [1, 1]} : vector<2x256xf32> to vector<2x128xf32>
    %c0_188 = arith.constant 0 : index
    %c0_189 = arith.constant 0 : index
    %678 = vector.load %arg22[%c0_188, %c0_189] : memref<32x128xbf16, #tpu.memory_space<vmem>>, vector<32x128xbf16>
    %679 = arith.truncf %656 : vector<2x32xf32> to vector<2x32xbf16>
    %cst_190 = arith.constant dense<0.000000e+00> : vector<2x128xf32>
    %680 = tpu.matmul %679, %678, %cst_190 {dimension_numbers = #tpu.dot_dimension_numbers<[1], [0], [0], [1], [0, 0, 1, 1], [], []>} : vector<2x32xbf16>, vector<32x128xbf16>, vector<2x128xf32> -> vector<2x128xf32>
    %681 = arith.addf %677, %680 : vector<2x128xf32>
    %c0_191 = arith.constant 0 : index
    %c0_192 = arith.constant 0 : index
    %682 = vector.load %arg23[%c0_191, %c0_192] : memref<1x128xf32, #tpu.memory_space<vmem>>, vector<1x128xf32>
    %683 = vector.broadcast %682 : vector<1x128xf32> to vector<2x128xf32>
    %684 = arith.addf %681, %683 : vector<2x128xf32>
    %685 = arith.negf %684 : vector<2x128xf32>
    %686 = math.exp %685 : vector<2x128xf32>
    %cst_193 = arith.constant 1.000000e+00 : f32
    %687 = vector.broadcast %cst_193 : f32 to vector<2x128xf32>
    %688 = arith.addf %687, %686 : vector<2x128xf32>
    %689 = arith.divf %687, %688 : vector<2x128xf32>
    %690 = math.tanh %684 : vector<2x128xf32>
    %691 = vector.extract_strided_slice %689 {offsets = [0, 0], sizes = [2, 32], strides = [1, 1]} : vector<2x128xf32> to vector<2x32xf32>
    %692 = vector.extract_strided_slice %689 {offsets = [0, 32], sizes = [2, 32], strides = [1, 1]} : vector<2x128xf32> to vector<2x32xf32>
    %693 = vector.extract_strided_slice %690 {offsets = [0, 64], sizes = [2, 32], strides = [1, 1]} : vector<2x128xf32> to vector<2x32xf32>
    %694 = vector.extract_strided_slice %689 {offsets = [0, 96], sizes = [2, 32], strides = [1, 1]} : vector<2x128xf32> to vector<2x32xf32>
    %695 = arith.mulf %692, %654 : vector<2x32xf32>
    %696 = arith.mulf %691, %693 : vector<2x32xf32>
    %697 = arith.addf %695, %696 : vector<2x32xf32>
    %698 = math.tanh %697 : vector<2x32xf32>
    %699 = arith.mulf %694, %698 : vector<2x32xf32>
    %700 = vector.extract_strided_slice %676 {offsets = [0, 128], sizes = [2, 128], strides = [1, 1]} : vector<2x256xf32> to vector<2x128xf32>
    %701 = arith.addf %539, %700 : vector<2x128xf32>
    %702 = arith.negf %701 : vector<2x128xf32>
    %703 = math.exp %702 : vector<2x128xf32>
    %cst_194 = arith.constant 1.000000e+00 : f32
    %704 = vector.broadcast %cst_194 : f32 to vector<2x128xf32>
    %705 = arith.addf %704, %703 : vector<2x128xf32>
    %706 = arith.divf %704, %705 : vector<2x128xf32>
    %707 = math.tanh %701 : vector<2x128xf32>
    %708 = vector.extract_strided_slice %706 {offsets = [0, 0], sizes = [2, 32], strides = [1, 1]} : vector<2x128xf32> to vector<2x32xf32>
    %709 = vector.extract_strided_slice %706 {offsets = [0, 32], sizes = [2, 32], strides = [1, 1]} : vector<2x128xf32> to vector<2x32xf32>
    %710 = vector.extract_strided_slice %707 {offsets = [0, 64], sizes = [2, 32], strides = [1, 1]} : vector<2x128xf32> to vector<2x32xf32>
    %711 = vector.extract_strided_slice %706 {offsets = [0, 96], sizes = [2, 32], strides = [1, 1]} : vector<2x128xf32> to vector<2x32xf32>
    %712 = arith.mulf %709, %671 : vector<2x32xf32>
    %713 = arith.mulf %708, %710 : vector<2x32xf32>
    %714 = arith.addf %712, %713 : vector<2x32xf32>
    %715 = math.tanh %714 : vector<2x32xf32>
    %716 = arith.mulf %711, %715 : vector<2x32xf32>
    %c0_195 = arith.constant 0 : index
    %c0_196 = arith.constant 0 : index
    %717 = vector.load %arg21[%c0_195, %c0_196] : memref<32x256xbf16, #tpu.memory_space<vmem>>, vector<32x256xbf16>
    %718 = arith.truncf %716 : vector<2x32xf32> to vector<2x32xbf16>
    %cst_197 = arith.constant dense<0.000000e+00> : vector<2x256xf32>
    %719 = tpu.matmul %718, %717, %cst_197 {dimension_numbers = #tpu.dot_dimension_numbers<[1], [0], [0], [1], [0, 0, 1, 1], [], []>} : vector<2x32xbf16>, vector<32x256xbf16>, vector<2x256xf32> -> vector<2x256xf32>
    %720 = vector.extract_strided_slice %719 {offsets = [0, 0], sizes = [2, 128], strides = [1, 1]} : vector<2x256xf32> to vector<2x128xf32>
    %c0_198 = arith.constant 0 : index
    %c0_199 = arith.constant 0 : index
    %721 = vector.load %arg22[%c0_198, %c0_199] : memref<32x128xbf16, #tpu.memory_space<vmem>>, vector<32x128xbf16>
    %722 = arith.truncf %699 : vector<2x32xf32> to vector<2x32xbf16>
    %cst_200 = arith.constant dense<0.000000e+00> : vector<2x128xf32>
    %723 = tpu.matmul %722, %721, %cst_200 {dimension_numbers = #tpu.dot_dimension_numbers<[1], [0], [0], [1], [0, 0, 1, 1], [], []>} : vector<2x32xbf16>, vector<32x128xbf16>, vector<2x128xf32> -> vector<2x128xf32>
    %724 = arith.addf %720, %723 : vector<2x128xf32>
    %c0_201 = arith.constant 0 : index
    %c0_202 = arith.constant 0 : index
    %725 = vector.load %arg23[%c0_201, %c0_202] : memref<1x128xf32, #tpu.memory_space<vmem>>, vector<1x128xf32>
    %726 = vector.broadcast %725 : vector<1x128xf32> to vector<2x128xf32>
    %727 = arith.addf %724, %726 : vector<2x128xf32>
    %728 = arith.negf %727 : vector<2x128xf32>
    %729 = math.exp %728 : vector<2x128xf32>
    %cst_203 = arith.constant 1.000000e+00 : f32
    %730 = vector.broadcast %cst_203 : f32 to vector<2x128xf32>
    %731 = arith.addf %730, %729 : vector<2x128xf32>
    %732 = arith.divf %730, %731 : vector<2x128xf32>
    %733 = math.tanh %727 : vector<2x128xf32>
    %734 = vector.extract_strided_slice %732 {offsets = [0, 0], sizes = [2, 32], strides = [1, 1]} : vector<2x128xf32> to vector<2x32xf32>
    %735 = vector.extract_strided_slice %732 {offsets = [0, 32], sizes = [2, 32], strides = [1, 1]} : vector<2x128xf32> to vector<2x32xf32>
    %736 = vector.extract_strided_slice %733 {offsets = [0, 64], sizes = [2, 32], strides = [1, 1]} : vector<2x128xf32> to vector<2x32xf32>
    %737 = vector.extract_strided_slice %732 {offsets = [0, 96], sizes = [2, 32], strides = [1, 1]} : vector<2x128xf32> to vector<2x32xf32>
    %738 = arith.mulf %735, %697 : vector<2x32xf32>
    %739 = arith.mulf %734, %736 : vector<2x32xf32>
    %740 = arith.addf %738, %739 : vector<2x32xf32>
    %741 = math.tanh %740 : vector<2x32xf32>
    %742 = arith.mulf %737, %741 : vector<2x32xf32>
    %743 = vector.extract_strided_slice %719 {offsets = [0, 128], sizes = [2, 128], strides = [1, 1]} : vector<2x256xf32> to vector<2x128xf32>
    %744 = arith.addf %539, %743 : vector<2x128xf32>
    %745 = arith.negf %744 : vector<2x128xf32>
    %746 = math.exp %745 : vector<2x128xf32>
    %cst_204 = arith.constant 1.000000e+00 : f32
    %747 = vector.broadcast %cst_204 : f32 to vector<2x128xf32>
    %748 = arith.addf %747, %746 : vector<2x128xf32>
    %749 = arith.divf %747, %748 : vector<2x128xf32>
    %750 = math.tanh %744 : vector<2x128xf32>
    %751 = vector.extract_strided_slice %749 {offsets = [0, 0], sizes = [2, 32], strides = [1, 1]} : vector<2x128xf32> to vector<2x32xf32>
    %752 = vector.extract_strided_slice %749 {offsets = [0, 32], sizes = [2, 32], strides = [1, 1]} : vector<2x128xf32> to vector<2x32xf32>
    %753 = vector.extract_strided_slice %750 {offsets = [0, 64], sizes = [2, 32], strides = [1, 1]} : vector<2x128xf32> to vector<2x32xf32>
    %754 = vector.extract_strided_slice %749 {offsets = [0, 96], sizes = [2, 32], strides = [1, 1]} : vector<2x128xf32> to vector<2x32xf32>
    %755 = arith.mulf %752, %714 : vector<2x32xf32>
    %756 = arith.mulf %751, %753 : vector<2x32xf32>
    %757 = arith.addf %755, %756 : vector<2x32xf32>
    %758 = math.tanh %757 : vector<2x32xf32>
    %759 = arith.mulf %754, %758 : vector<2x32xf32>
    %c0_205 = arith.constant 0 : index
    %c0_206 = arith.constant 0 : index
    %760 = vector.load %arg21[%c0_205, %c0_206] : memref<32x256xbf16, #tpu.memory_space<vmem>>, vector<32x256xbf16>
    %761 = arith.truncf %759 : vector<2x32xf32> to vector<2x32xbf16>
    %cst_207 = arith.constant dense<0.000000e+00> : vector<2x256xf32>
    %762 = tpu.matmul %761, %760, %cst_207 {dimension_numbers = #tpu.dot_dimension_numbers<[1], [0], [0], [1], [0, 0, 1, 1], [], []>} : vector<2x32xbf16>, vector<32x256xbf16>, vector<2x256xf32> -> vector<2x256xf32>
    %763 = vector.extract_strided_slice %762 {offsets = [0, 0], sizes = [2, 128], strides = [1, 1]} : vector<2x256xf32> to vector<2x128xf32>
    %c0_208 = arith.constant 0 : index
    %c0_209 = arith.constant 0 : index
    %764 = vector.load %arg22[%c0_208, %c0_209] : memref<32x128xbf16, #tpu.memory_space<vmem>>, vector<32x128xbf16>
    %765 = arith.truncf %742 : vector<2x32xf32> to vector<2x32xbf16>
    %cst_210 = arith.constant dense<0.000000e+00> : vector<2x128xf32>
    %766 = tpu.matmul %765, %764, %cst_210 {dimension_numbers = #tpu.dot_dimension_numbers<[1], [0], [0], [1], [0, 0, 1, 1], [], []>} : vector<2x32xbf16>, vector<32x128xbf16>, vector<2x128xf32> -> vector<2x128xf32>
    %767 = arith.addf %763, %766 : vector<2x128xf32>
    %c0_211 = arith.constant 0 : index
    %c0_212 = arith.constant 0 : index
    %768 = vector.load %arg23[%c0_211, %c0_212] : memref<1x128xf32, #tpu.memory_space<vmem>>, vector<1x128xf32>
    %769 = vector.broadcast %768 : vector<1x128xf32> to vector<2x128xf32>
    %770 = arith.addf %767, %769 : vector<2x128xf32>
    %771 = arith.negf %770 : vector<2x128xf32>
    %772 = math.exp %771 : vector<2x128xf32>
    %cst_213 = arith.constant 1.000000e+00 : f32
    %773 = vector.broadcast %cst_213 : f32 to vector<2x128xf32>
    %774 = arith.addf %773, %772 : vector<2x128xf32>
    %775 = arith.divf %773, %774 : vector<2x128xf32>
    %776 = math.tanh %770 : vector<2x128xf32>
    %777 = vector.extract_strided_slice %775 {offsets = [0, 0], sizes = [2, 32], strides = [1, 1]} : vector<2x128xf32> to vector<2x32xf32>
    %778 = vector.extract_strided_slice %775 {offsets = [0, 32], sizes = [2, 32], strides = [1, 1]} : vector<2x128xf32> to vector<2x32xf32>
    %779 = vector.extract_strided_slice %776 {offsets = [0, 64], sizes = [2, 32], strides = [1, 1]} : vector<2x128xf32> to vector<2x32xf32>
    %780 = vector.extract_strided_slice %775 {offsets = [0, 96], sizes = [2, 32], strides = [1, 1]} : vector<2x128xf32> to vector<2x32xf32>
    %781 = arith.mulf %778, %740 : vector<2x32xf32>
    %782 = arith.mulf %777, %779 : vector<2x32xf32>
    %783 = arith.addf %781, %782 : vector<2x32xf32>
    %784 = math.tanh %783 : vector<2x32xf32>
    %785 = arith.mulf %780, %784 : vector<2x32xf32>
    %786 = vector.extract_strided_slice %762 {offsets = [0, 128], sizes = [2, 128], strides = [1, 1]} : vector<2x256xf32> to vector<2x128xf32>
    %787 = arith.addf %539, %786 : vector<2x128xf32>
    %788 = arith.negf %787 : vector<2x128xf32>
    %789 = math.exp %788 : vector<2x128xf32>
    %cst_214 = arith.constant 1.000000e+00 : f32
    %790 = vector.broadcast %cst_214 : f32 to vector<2x128xf32>
    %791 = arith.addf %790, %789 : vector<2x128xf32>
    %792 = arith.divf %790, %791 : vector<2x128xf32>
    %793 = math.tanh %787 : vector<2x128xf32>
    %794 = vector.extract_strided_slice %792 {offsets = [0, 0], sizes = [2, 32], strides = [1, 1]} : vector<2x128xf32> to vector<2x32xf32>
    %795 = vector.extract_strided_slice %792 {offsets = [0, 32], sizes = [2, 32], strides = [1, 1]} : vector<2x128xf32> to vector<2x32xf32>
    %796 = vector.extract_strided_slice %793 {offsets = [0, 64], sizes = [2, 32], strides = [1, 1]} : vector<2x128xf32> to vector<2x32xf32>
    %797 = vector.extract_strided_slice %792 {offsets = [0, 96], sizes = [2, 32], strides = [1, 1]} : vector<2x128xf32> to vector<2x32xf32>
    %798 = arith.mulf %795, %757 : vector<2x32xf32>
    %799 = arith.mulf %794, %796 : vector<2x32xf32>
    %800 = arith.addf %798, %799 : vector<2x32xf32>
    %801 = math.tanh %800 : vector<2x32xf32>
    %802 = arith.mulf %797, %801 : vector<2x32xf32>
    %c0_215 = arith.constant 0 : index
    %c0_216 = arith.constant 0 : index
    %803 = vector.load %arg21[%c0_215, %c0_216] : memref<32x256xbf16, #tpu.memory_space<vmem>>, vector<32x256xbf16>
    %804 = arith.truncf %802 : vector<2x32xf32> to vector<2x32xbf16>
    %cst_217 = arith.constant dense<0.000000e+00> : vector<2x256xf32>
    %805 = tpu.matmul %804, %803, %cst_217 {dimension_numbers = #tpu.dot_dimension_numbers<[1], [0], [0], [1], [0, 0, 1, 1], [], []>} : vector<2x32xbf16>, vector<32x256xbf16>, vector<2x256xf32> -> vector<2x256xf32>
    %806 = vector.extract_strided_slice %805 {offsets = [0, 0], sizes = [2, 128], strides = [1, 1]} : vector<2x256xf32> to vector<2x128xf32>
    %c0_218 = arith.constant 0 : index
    %c0_219 = arith.constant 0 : index
    %807 = vector.load %arg22[%c0_218, %c0_219] : memref<32x128xbf16, #tpu.memory_space<vmem>>, vector<32x128xbf16>
    %808 = arith.truncf %785 : vector<2x32xf32> to vector<2x32xbf16>
    %cst_220 = arith.constant dense<0.000000e+00> : vector<2x128xf32>
    %809 = tpu.matmul %808, %807, %cst_220 {dimension_numbers = #tpu.dot_dimension_numbers<[1], [0], [0], [1], [0, 0, 1, 1], [], []>} : vector<2x32xbf16>, vector<32x128xbf16>, vector<2x128xf32> -> vector<2x128xf32>
    %810 = arith.addf %806, %809 : vector<2x128xf32>
    %c0_221 = arith.constant 0 : index
    %c0_222 = arith.constant 0 : index
    %811 = vector.load %arg23[%c0_221, %c0_222] : memref<1x128xf32, #tpu.memory_space<vmem>>, vector<1x128xf32>
    %812 = vector.broadcast %811 : vector<1x128xf32> to vector<2x128xf32>
    %813 = arith.addf %810, %812 : vector<2x128xf32>
    %814 = arith.negf %813 : vector<2x128xf32>
    %815 = math.exp %814 : vector<2x128xf32>
    %cst_223 = arith.constant 1.000000e+00 : f32
    %816 = vector.broadcast %cst_223 : f32 to vector<2x128xf32>
    %817 = arith.addf %816, %815 : vector<2x128xf32>
    %818 = arith.divf %816, %817 : vector<2x128xf32>
    %819 = math.tanh %813 : vector<2x128xf32>
    %820 = vector.extract_strided_slice %818 {offsets = [0, 0], sizes = [2, 32], strides = [1, 1]} : vector<2x128xf32> to vector<2x32xf32>
    %821 = vector.extract_strided_slice %818 {offsets = [0, 32], sizes = [2, 32], strides = [1, 1]} : vector<2x128xf32> to vector<2x32xf32>
    %822 = vector.extract_strided_slice %819 {offsets = [0, 64], sizes = [2, 32], strides = [1, 1]} : vector<2x128xf32> to vector<2x32xf32>
    %823 = vector.extract_strided_slice %818 {offsets = [0, 96], sizes = [2, 32], strides = [1, 1]} : vector<2x128xf32> to vector<2x32xf32>
    %824 = arith.mulf %821, %783 : vector<2x32xf32>
    %825 = arith.mulf %820, %822 : vector<2x32xf32>
    %826 = arith.addf %824, %825 : vector<2x32xf32>
    %827 = math.tanh %826 : vector<2x32xf32>
    %828 = arith.mulf %823, %827 : vector<2x32xf32>
    %829 = vector.extract_strided_slice %805 {offsets = [0, 128], sizes = [2, 128], strides = [1, 1]} : vector<2x256xf32> to vector<2x128xf32>
    %830 = arith.addf %539, %829 : vector<2x128xf32>
    %831 = arith.negf %830 : vector<2x128xf32>
    %832 = math.exp %831 : vector<2x128xf32>
    %cst_224 = arith.constant 1.000000e+00 : f32
    %833 = vector.broadcast %cst_224 : f32 to vector<2x128xf32>
    %834 = arith.addf %833, %832 : vector<2x128xf32>
    %835 = arith.divf %833, %834 : vector<2x128xf32>
    %836 = math.tanh %830 : vector<2x128xf32>
    %837 = vector.extract_strided_slice %835 {offsets = [0, 0], sizes = [2, 32], strides = [1, 1]} : vector<2x128xf32> to vector<2x32xf32>
    %838 = vector.extract_strided_slice %835 {offsets = [0, 32], sizes = [2, 32], strides = [1, 1]} : vector<2x128xf32> to vector<2x32xf32>
    %839 = vector.extract_strided_slice %836 {offsets = [0, 64], sizes = [2, 32], strides = [1, 1]} : vector<2x128xf32> to vector<2x32xf32>
    %840 = vector.extract_strided_slice %835 {offsets = [0, 96], sizes = [2, 32], strides = [1, 1]} : vector<2x128xf32> to vector<2x32xf32>
    %841 = arith.mulf %838, %800 : vector<2x32xf32>
    %842 = arith.mulf %837, %839 : vector<2x32xf32>
    %843 = arith.addf %841, %842 : vector<2x32xf32>
    %844 = math.tanh %843 : vector<2x32xf32>
    %845 = arith.mulf %840, %844 : vector<2x32xf32>
    %c0_225 = arith.constant 0 : index
    %c0_226 = arith.constant 0 : index
    %846 = vector.load %arg21[%c0_225, %c0_226] : memref<32x256xbf16, #tpu.memory_space<vmem>>, vector<32x256xbf16>
    %847 = arith.truncf %845 : vector<2x32xf32> to vector<2x32xbf16>
    %cst_227 = arith.constant dense<0.000000e+00> : vector<2x256xf32>
    %848 = tpu.matmul %847, %846, %cst_227 {dimension_numbers = #tpu.dot_dimension_numbers<[1], [0], [0], [1], [0, 0, 1, 1], [], []>} : vector<2x32xbf16>, vector<32x256xbf16>, vector<2x256xf32> -> vector<2x256xf32>
    %849 = vector.extract_strided_slice %848 {offsets = [0, 0], sizes = [2, 128], strides = [1, 1]} : vector<2x256xf32> to vector<2x128xf32>
    %c0_228 = arith.constant 0 : index
    %c0_229 = arith.constant 0 : index
    %850 = vector.load %arg22[%c0_228, %c0_229] : memref<32x128xbf16, #tpu.memory_space<vmem>>, vector<32x128xbf16>
    %851 = arith.truncf %828 : vector<2x32xf32> to vector<2x32xbf16>
    %cst_230 = arith.constant dense<0.000000e+00> : vector<2x128xf32>
    %852 = tpu.matmul %851, %850, %cst_230 {dimension_numbers = #tpu.dot_dimension_numbers<[1], [0], [0], [1], [0, 0, 1, 1], [], []>} : vector<2x32xbf16>, vector<32x128xbf16>, vector<2x128xf32> -> vector<2x128xf32>
    %853 = arith.addf %849, %852 : vector<2x128xf32>
    %c0_231 = arith.constant 0 : index
    %c0_232 = arith.constant 0 : index
    %854 = vector.load %arg23[%c0_231, %c0_232] : memref<1x128xf32, #tpu.memory_space<vmem>>, vector<1x128xf32>
    %855 = vector.broadcast %854 : vector<1x128xf32> to vector<2x128xf32>
    %856 = arith.addf %853, %855 : vector<2x128xf32>
    %857 = arith.negf %856 : vector<2x128xf32>
    %858 = math.exp %857 : vector<2x128xf32>
    %cst_233 = arith.constant 1.000000e+00 : f32
    %859 = vector.broadcast %cst_233 : f32 to vector<2x128xf32>
    %860 = arith.addf %859, %858 : vector<2x128xf32>
    %861 = arith.divf %859, %860 : vector<2x128xf32>
    %862 = math.tanh %856 : vector<2x128xf32>
    %863 = vector.extract_strided_slice %861 {offsets = [0, 0], sizes = [2, 32], strides = [1, 1]} : vector<2x128xf32> to vector<2x32xf32>
    %864 = vector.extract_strided_slice %861 {offsets = [0, 32], sizes = [2, 32], strides = [1, 1]} : vector<2x128xf32> to vector<2x32xf32>
    %865 = vector.extract_strided_slice %862 {offsets = [0, 64], sizes = [2, 32], strides = [1, 1]} : vector<2x128xf32> to vector<2x32xf32>
    %866 = vector.extract_strided_slice %861 {offsets = [0, 96], sizes = [2, 32], strides = [1, 1]} : vector<2x128xf32> to vector<2x32xf32>
    %867 = arith.mulf %864, %826 : vector<2x32xf32>
    %868 = arith.mulf %863, %865 : vector<2x32xf32>
    %869 = arith.addf %867, %868 : vector<2x32xf32>
    %870 = math.tanh %869 : vector<2x32xf32>
    %871 = arith.mulf %866, %870 : vector<2x32xf32>
    %872 = tpu.concatenate %570, %613, %656, %699, %742, %785, %828, %871 in 1 : vector<2x32xf32>, vector<2x32xf32>, vector<2x32xf32>, vector<2x32xf32>, vector<2x32xf32>, vector<2x32xf32>, vector<2x32xf32>, vector<2x32xf32> -> vector<2x256xf32>
    %c0_234 = arith.constant 0 : index
    %c0_235 = arith.constant 0 : index
    %873 = vector.load %arg24[%c0_234, %c0_235] : memref<256x768xbf16, #tpu.memory_space<vmem>>, vector<256x768xbf16>
    %874 = arith.truncf %872 : vector<2x256xf32> to vector<2x256xbf16>
    %cst_236 = arith.constant dense<0.000000e+00> : vector<2x768xf32>
    %875 = tpu.matmul %874, %873, %cst_236 {dimension_numbers = #tpu.dot_dimension_numbers<[1], [0], [0], [1], [0, 0, 1, 1], [], []>} : vector<2x256xbf16>, vector<256x768xbf16>, vector<2x768xf32> -> vector<2x768xf32>
    %c0_237 = arith.constant 0 : index
    %c0_238 = arith.constant 0 : index
    %876 = vector.load %arg25[%c0_237, %c0_238] : memref<1x768xf32, #tpu.memory_space<vmem>>, vector<1x768xf32>
    %877 = vector.broadcast %876 : vector<1x768xf32> to vector<2x768xf32>
    %878 = arith.addf %875, %877 : vector<2x768xf32>
    %c0_239 = arith.constant 0 : index
    %c0_240 = arith.constant 0 : index
    %879 = vector.load %arg26[%c0_239, %c0_240] : memref<2x768xf32, #tpu.memory_space<vmem>>, vector<2x768xf32>
    tpu.vector_store %arg26[%c0_239, %c0_240], %878 {strides = array<i32>} : memref<2x768xf32, #tpu.memory_space<vmem>>, vector<2x768xf32>,
    return
  }
  func.func @transform_0(%arg0: i32) -> (i32, i32, i32) {
    %c0_i32 = arith.constant 0 : i32
    %c0_i32_0 = arith.constant 0 : i32
    %c0_i32_1 = arith.constant 0 : i32
    return %arg0, %c0_i32, %c0_i32_0 : i32, i32, i32
  }
  func.func @transform_1(%arg0: i32) -> (i32, i32, i32) {
    %c0_i32 = arith.constant 0 : i32
    %c0_i32_0 = arith.constant 0 : i32
    %c0_i32_1 = arith.constant 0 : i32
    return %arg0, %c0_i32, %c0_i32_0 : i32, i32, i32
  }
  func.func @transform_2(%arg0: i32) -> (i32, i32, i32) {
    %c0_i32 = arith.constant 0 : i32
    %c0_i32_0 = arith.constant 0 : i32
    %c0_i32_1 = arith.constant 0 : i32
    return %arg0, %c0_i32, %c0_i32_0 : i32, i32, i32
  }
  func.func @transform_3(%arg0: i32) -> (i32, i32) {
    %c0_i32 = arith.constant 0 : i32
    %c0_i32_0 = arith.constant 0 : i32
    return %arg0, %c0_i32 : i32, i32
  }
  func.func @transform_4(%arg0: i32) -> (i32, i32) {
    %c0_i32 = arith.constant 0 : i32
    %c0_i32_0 = arith.constant 0 : i32
    %c0_i32_1 = arith.constant 0 : i32
    return %c0_i32, %c0_i32_0 : i32, i32
  }
  func.func @transform_5(%arg0: i32) -> (i32, i32) {
    %c0_i32 = arith.constant 0 : i32
    %c0_i32_0 = arith.constant 0 : i32
    %c0_i32_1 = arith.constant 0 : i32
    return %c0_i32, %c0_i32_0 : i32, i32
  }
  func.func @transform_6(%arg0: i32) -> (i32, i32) {
    %c0_i32 = arith.constant 0 : i32
    %c0_i32_0 = arith.constant 0 : i32
    %c0_i32_1 = arith.constant 0 : i32
    return %c0_i32, %c0_i32_0 : i32, i32
  }
  func.func @transform_7(%arg0: i32) -> (i32, i32) {
    %c0_i32 = arith.constant 0 : i32
    %c0_i32_0 = arith.constant 0 : i32
    %c0_i32_1 = arith.constant 0 : i32
    return %c0_i32, %c0_i32_0 : i32, i32
  }
  func.func @transform_8(%arg0: i32) -> (i32, i32) {
    %c0_i32 = arith.constant 0 : i32
    %c0_i32_0 = arith.constant 0 : i32
    %c0_i32_1 = arith.constant 0 : i32
    return %c0_i32, %c0_i32_0 : i32, i32
  }
  func.func @transform_9(%arg0: i32) -> (i32, i32) {
    %c0_i32 = arith.constant 0 : i32
    %c0_i32_0 = arith.constant 0 : i32
    %c0_i32_1 = arith.constant 0 : i32
    return %c0_i32, %c0_i32_0 : i32, i32
  }
  func.func @transform_10(%arg0: i32) -> (i32, i32) {
    %c0_i32 = arith.constant 0 : i32
    %c0_i32_0 = arith.constant 0 : i32
    %c0_i32_1 = arith.constant 0 : i32
    return %c0_i32, %c0_i32_0 : i32, i32
  }
  func.func @transform_11(%arg0: i32) -> (i32, i32) {
    %c0_i32 = arith.constant 0 : i32
    %c0_i32_0 = arith.constant 0 : i32
    %c0_i32_1 = arith.constant 0 : i32
    return %c0_i32, %c0_i32_0 : i32, i32
  }
  func.func @transform_12(%arg0: i32) -> (i32, i32) {
    %c0_i32 = arith.constant 0 : i32
    %c0_i32_0 = arith.constant 0 : i32
    %c0_i32_1 = arith.constant 0 : i32
    return %c0_i32, %c0_i32_0 : i32, i32
  }
  func.func @transform_13(%arg0: i32) -> (i32, i32) {
    %c0_i32 = arith.constant 0 : i32
    %c0_i32_0 = arith.constant 0 : i32
    %c0_i32_1 = arith.constant 0 : i32
    return %c0_i32, %c0_i32_0 : i32, i32
  }
  func.func @transform_14(%arg0: i32) -> (i32, i32) {
    %c0_i32 = arith.constant 0 : i32
    %c0_i32_0 = arith.constant 0 : i32
    %c0_i32_1 = arith.constant 0 : i32
    return %c0_i32, %c0_i32_0 : i32, i32
  }
  func.func @transform_15(%arg0: i32) -> (i32, i32) {
    %c0_i32 = arith.constant 0 : i32
    %c0_i32_0 = arith.constant 0 : i32
    %c0_i32_1 = arith.constant 0 : i32
    return %c0_i32, %c0_i32_0 : i32, i32
  }
  func.func @transform_16(%arg0: i32) -> (i32, i32) {
    %c0_i32 = arith.constant 0 : i32
    %c0_i32_0 = arith.constant 0 : i32
    %c0_i32_1 = arith.constant 0 : i32
    return %c0_i32, %c0_i32_0 : i32, i32
  }
  func.func @transform_17(%arg0: i32) -> (i32, i32) {
    %c0_i32 = arith.constant 0 : i32
    %c0_i32_0 = arith.constant 0 : i32
    %c0_i32_1 = arith.constant 0 : i32
    return %c0_i32, %c0_i32_0 : i32, i32
  }
  func.func @transform_18(%arg0: i32) -> (i32, i32) {
    %c0_i32 = arith.constant 0 : i32
    %c0_i32_0 = arith.constant 0 : i32
    %c0_i32_1 = arith.constant 0 : i32
    return %c0_i32, %c0_i32_0 : i32, i32
  }
  func.func @transform_19(%arg0: i32) -> (i32, i32) {
    %c0_i32 = arith.constant 0 : i32
    %c0_i32_0 = arith.constant 0 : i32
    %c0_i32_1 = arith.constant 0 : i32
    return %c0_i32, %c0_i32_0 : i32, i32
  }
  func.func @transform_20(%arg0: i32) -> (i32, i32) {
    %c0_i32 = arith.constant 0 : i32
    %c0_i32_0 = arith.constant 0 : i32
    %c0_i32_1 = arith.constant 0 : i32
    return %c0_i32, %c0_i32_0 : i32, i32
  }
  func.func @transform_21(%arg0: i32) -> (i32, i32) {
    %c0_i32 = arith.constant 0 : i32
    %c0_i32_0 = arith.constant 0 : i32
    %c0_i32_1 = arith.constant 0 : i32
    return %c0_i32, %c0_i32_0 : i32, i32
  }
  func.func @transform_22(%arg0: i32) -> (i32, i32) {
    %c0_i32 = arith.constant 0 : i32
    %c0_i32_0 = arith.constant 0 : i32
    %c0_i32_1 = arith.constant 0 : i32
    return %c0_i32, %c0_i32_0 : i32, i32
  }
  func.func @transform_23(%arg0: i32) -> (i32, i32) {
    %c0_i32 = arith.constant 0 : i32
    %c0_i32_0 = arith.constant 0 : i32
    %c0_i32_1 = arith.constant 0 : i32
    return %c0_i32, %c0_i32_0 : i32, i32
  }
  func.func @transform_24(%arg0: i32) -> (i32, i32) {
    %c0_i32 = arith.constant 0 : i32
    %c0_i32_0 = arith.constant 0 : i32
    %c0_i32_1 = arith.constant 0 : i32
    return %c0_i32, %c0_i32_0 : i32, i32
  }
  func.func @transform_25(%arg0: i32) -> (i32, i32) {
    %c0_i32 = arith.constant 0 : i32
    %c0_i32_0 = arith.constant 0 : i32
    return %arg0, %c0_i32 : i32, i32
  }
  func.func @transform_26(%arg0: i32) -> (i32, i32) {
    %c0_i32 = arith.constant 0 : i32
    %c0_i32_0 = arith.constant 0 : i32
    return %arg0, %c0_i32 : i32, i32
  }
}

</mosaic_0001>

<bundles_post_ra>
// kernel: vae_for_duet_forward.1
= control target key start
LH: loop header
LB: loop body
LE: loop exit
PB: predicated region body
PF: predicated region fallthrough
CT: control target
= control target key end

     0   :  { %s6492_s0 = inlined_call_operand.vmem [shape: f32[2,8,87], index: 0, kind: input, shape index: {}]   ;;  %s6493_s1 = inlined_call_operand.vmem [shape: f32[2,8,87], index: 1, kind: input, shape index: {}]   ;;  %s6494_s2 = inlined_call_operand.vmem [shape: f32[2,8,32], index: 2, kind: input, shape index: {}]   ;;  %s6495_s3 = inlined_call_operand.vmem [shape: f32[2,16], index: 3, kind: input, shape index: {}]   ;;  %s6496_s4 = inlined_call_operand.vmem [shape: bf16[87,32], index: 4, kind: input, shape index: {}]   ;;  %s6497_s5 = inlined_call_operand.vmem [shape: bf16[32,96], index: 5, kind: input, shape index: {}]   ;;  %s6498_s6 = inlined_call_operand.vmem [shape: f32[1,96], index: 6, kind: input, shape index: {}]   ;;  %s6499_s7 = inlined_call_operand.vmem [shape: bf16[32,32], index: 7, kind: input, shape index: {}]   ;;  %s6500_s8 = inlined_call_operand.vmem [shape: f32[1,32], index: 8, kind: input, shape index: {}]   ;;  %s6501_s9 = inlined_call_operand.vmem [shape: bf16[32,128], index: 9, kind: input, shape index: {}]   ;;  %s6502_s10 = inlined_call_operand.vmem [shape: f32[1,128], index: 10, kind: input, shape index: {}]   ;;  %s6503_s11 = inlined_call_operand.vmem [shape: bf16[32,256], index: 11, kind: input, shape index: {}]   ;;  %s6504_s12 = inlined_call_operand.vmem [shape: bf16[32,128], index: 12, kind: input, shape index: {}]   ;;  %s6505_s13 = inlined_call_operand.vmem [shape: f32[1,128], index: 13, kind: input, shape index: {}]   ;;  %s6506_s14 = inlined_call_operand.vmem [shape: bf16[32,32], index: 14, kind: input, shape index: {}]   ;;  %s6507_s15 = inlined_call_operand.vmem [shape: f32[1,32], index: 15, kind: input, shape index: {}]   ;;  %s6508_s16 = inlined_call_operand.vmem [shape: bf16[16,32], index: 16, kind: input, shape index: {}]   ;;  %s6509_s17 = inlined_call_operand.vmem [shape: f32[1,32], index: 17, kind: input, shape index: {}]   ;;  %s6510_s18 = inlined_call_operand.vmem [shape: bf16[32,128], index: 18, kind: input, shape index: {}]   ;;  %s6511_s19 = inlined_call_operand.vmem [shape: f32[1,128], index: 19, kind: input, shape index: {}]   ;;  %s6512_s20 = inlined_call_operand.vmem [shape: bf16[32,256], index: 20, kind: input, shape index: {}]   ;;  %s6513_s21 = inlined_call_operand.vmem [shape: bf16[32,128], index: 21, kind: input, shape index: {}]   ;;  %s6514_s22 = inlined_call_operand.vmem [shape: f32[1,128], index: 22, kind: input, shape index: {}]   ;;  %s6515_s23 = inlined_call_operand.hbm [shape: bf16[256,768], index: 23, kind: input, shape index: {}]   ;;  %s6516_s24 = inlined_call_operand.vmem [shape: f32[1,768], index: 24, kind: input, shape index: {}]   ;;  %s6517_s25 = inlined_call_operand.vmem [shape: f32[2,768], index: 25, kind: output, shape index: {0}]   ;;  %s6518_s26 = inlined_call_operand.vmem [shape: f32[2,32], index: 26, kind: output, shape index: {1}]  }
   0x1   :  { %6526 = sst [smem:[#allocation5_spill]] %s6492_s0 }
   0x2   :  { %6527 = sst [smem:[#allocation6_spill]] %s6493_s1 }
   0x3   :  { %6528 = sst [smem:[#allocation7_spill]] %s6494_s2 }
   0x4   :  { %6529 = sst [smem:[#allocation8_spill]] %s6495_s3 }
   0x5   :  { %6530 = sst [smem:[#allocation9_spill]] %s6496_s4 }
   0x6   :  { %6531 = sst [smem:[#allocation10_spill]] %s6497_s5 }
   0x7   :  { %6532 = sst [smem:[#allocation11_spill]] %s6498_s6 }
   0x8   :  { %6533 = sst [smem:[#allocation12_spill]] %s6499_s7 }
   0x9   :  { %6534 = sst [smem:[#allocation13_spill]] %s6500_s8 }
   0xa   :  { %6535 = sst [smem:[#allocation14_spill]] %s6501_s9 }
   0xb   :  { %6536 = sst [smem:[#allocation15_spill]] %s6502_s10 }
   0xc   :  { %32 = vsyncpa [#allocation3], 0  ;;  %s83_s7 = sshll.u32 %s6515_s23, 4  ;;  %s5480_s28 = smov [#allocation2]   ;;  %s84_s7 = int_to_ptr.hbm [resolvable:$true] %s83_s7 }
   0xd   :  { %s85_s8 = sshll.u32 %s5480_s28, 4  ;;  %s5481_s4 = smov 384   ;;  %s86_s8 = int_to_ptr.vmem [resolvable:$true] %s85_s8 }
   0xe   :  { %s5482_s29 = smov 24  }
   0xf   :  { %91 = dma.hbm_to_vmem [thread:$0]  %s84_s7, 12288, %s86_s8, [#allocation3], %s5481_s4, %s5481_s4, %s5482_s29  }
  0x10   :  { %5478 = dma.done.wait [#allocation3], 12288  }
  0x11   :  { %5479 = vsyncadd [#allocation3], 4294955008  ;;  %vm158_vm0 = vcmask 1042432   ;;  %vm159_vm1 = vcmask 1043456   ;;  %v5483_v0 = vmov 65535   ;;  %s6537_s30 = sld [smem:[#allocation9_spill]] }
  0x12   :  { %v160_v1 = vsel %vm158_vm0, 4294967295, %v5483_v0  ;;  %s6538_s7 = sld [smem:[#allocation5_spill]]  ;;  %vm154_vm2 = vcmask 711680   ;;  %vm200_vm3 = vcmask 261120   ;;  %s5484_s6 = smov 88   ;;  %vm222_vm4 = vcmask 64512  }
  0x13   :  { %v161_v4 = vsel %vm159_vm1, %v160_v1, 0  ;;  %s6539_s9 = sld [smem:[#allocation6_spill]]  ;;  %s5485_s1 = smov 96   ;;  %vm493_vm5 = vcmask 130048   ;;  %vm495_vm6 = vcmask 195584   ;;  %vm922_vm15 = vcmask 1041409  }
  0x14   :  { %s6542_s10 = sld [smem:[#allocation11_spill]]  ;;  %s5486_s27 = smov 120  }
  0x15   :  { %s5487_s3 = smov 80   ;;  %s5489_s28 = smov 56  }
  0x16   :  { %s5490_s8 = smov 48   ;;  %s5491_s4 = smov 64  }
  0x17   :  { %v117_v2 = vld [vmem:[%s6537_s30 + $0x28] sm:$0xf]  ;;  %v4922_v7 = vld [vmem:[%s6537_s30 + $0x20] sm:$0xff]  ;;  %v4921_v8 = vld [vmem:[%s6537_s30 + $0x18] sm:$0xff]  ;;  %s5492_s0 = smov 72   ;;  %s5495_s23 = smov 8  }
  0x18   :  { %v142_v3 = vunpack.c.l.b16 %v117_v2  ;;  %v4920_v9 = vld [vmem:[%s6537_s30 + $0x10] sm:$0xff]  ;;  %v99_v10 = vld [vmem:[%s6538_s7] sm:$0xff]  ;;  %v100_v11 = vld [vmem:[%s6538_s7 + $0x8] sm:$0xff]  ;;  %s6540_s7 = sld [smem:[#allocation10_spill]] }
  0x19   :  { %v101_v12 = vld [vmem:[%s6539_s9] sm:$0xff]  ;;  %v102_v13 = vld [vmem:[%s6539_s9 + $0x8] sm:$0xff]  ;;  %s6541_s9 = sld [smem:[#allocation7_spill]] }
  0x1a   :  { %v148_v5 = vpack.c.b16 %v142_v3, %v142_v3  ;;  %v103_v14 = vsub.f32 %v99_v10, %v101_v12  ;;  %v104_v15 = vsub.f32 %v100_v11, %v102_v13  ;;  %v4919_v16 = vld [vmem:[%s6537_s30 + $0x8] sm:$0xff]  ;;  %v4918_v19 = vld [vmem:[%s6537_s30] sm:$0xff]  ;;  %s5494_s30 = smov 40   ;;  %s6545_s2 = sld [smem:[#allocation13_spill]] }
  0x1b   :  { %v5684_v30 = vld [vmem:[%s6542_s10] ss:$0 sm:$0xff]  ;;  %s6543_s10 = sld [smem:[#allocation12_spill]] }
  0x1c   :  { %v163_v6 = vand.u32 %v161_v4, %v148_v5  ;;  %v105_v17 = vand.u32 2147483647, %v103_v14  ;;  %v106_v18 = vand.u32 2147483647, %v104_v15 }
  0x1e   :  { %167 = vmatpush.bf16.msra.mxu0 %v163_v6  ;;  %v118_v20 = vpack.c.bf16 %v106_v18, %v105_v17  ;;  %v4924_v21 = vld [vmem:[%s6540_s7 + $0x8] sm:$0xff]  ;;  %v4923_v22 = vld [vmem:[%s6540_s7] sm:$0xff]  ;;  %s5488_s7 = smov 112  }
  0x1f   :  { %210 = vmatpush.bf16.msra.mxu1 %v4924_v21  ;;  %v119_v24 = vld [vmem:[%s6541_s9] sm:$0xff]  ;;  %v120_v25 = vld [vmem:[%s6541_s9 + $0x8] sm:$0xff]  ;;  %s5493_s9 = smov 104  }
  0x22   :  { %168 = vmatpush.bf16.msra.mxu0 %v4922_v7 }
  0x23   :  { %211 = vmatpush.bf16.msra.mxu1 %v4923_v22 }
  0x26   :  { %169 = vmatpush.bf16.msra.mxu0 %v4921_v8 }
  0x2a   :  { %170 = vmatpush.bf16.msra.mxu0 %v4920_v9 }
  0x2e   :  { %171 = vmatpush.bf16.msra.mxu0 %v4919_v16 }
  0x32   :  { %172 = vmatpush.bf16.msra.mxu0 %v4918_v19 }
  0x35   :  { %4327 = vmatmul.msk.bf16.vlgmr.msra.gmra.mxu0 %vm154_vm2, %v118_v20 }
  0xb2   :  { %v174_v23 = vpop.f32.mrf.mxu0 }
  0xb3   :  { %v175_v27 = vadd.f32 %v174_v23, %v119_v24 }
  0xba   :  { %v176_v26 = vpop.f32.mrf.mxu0 }
  0xbb   :  { %v177_v28 = vadd.f32 %v176_v26, %v120_v25 }
  0xbd   :  { %v183_v29 = vpack.c.bf16 %v177_v28, %v175_v27 }
  0xbf   :  { %4336 = vmatmul.msk.bf16.vlgmr.msra.gmra.mxu1 %vm200_vm3, %v183_v29 }
 0x13c   :  { %v213_v31 = vpop.f32.mrf.mxu1 }
 0x13d   :  { %v5687_v32 = vadd.f32 %v5684_v30, %v213_v31 }
 0x13f   :  { %287 = vrot.lane.b32.xlu2 %v5687_v32, %s5484_s6  ;;  %220 = vrot.lane.b32.xlu0 %v5687_v32, %s5485_s1  ;;  %v218_v33 = vmul.f32 0.35355338, %v5687_v32 }
 0x144   :  { %v215_v5 = vpop.f32.mrf.mxu1 }
 0x145   :  { %v5725_v6 = vadd.f32 %v5684_v30, %v215_v5 }
 0x147   :  { %285 = vrot.lane.b32.xlu2 %v218_v33, %s5486_s27  ;;  %v497_v14 = vmul.f32 0.35355338, %v5725_v6 }
 0x14f   :  { %352 = vrot.lane.b32.xlu2 %v5687_v32, %s5487_s3 }
 0x157   :  { %350 = vrot.lane.b32.xlu2 %v218_v33, %s5488_s7 }
 0x199   :  { %v288_v44 = vpop.permute.xlu2 %287 }
 0x1a1   :  { %v286_v46 = vpop.permute.xlu2 %285 }
 0x1a9   :  { %v353_v50 = vpop.permute.xlu2 %352 }
 0x1b1   :  { %v221_v34 = vpop.permute.xlu0 %220  ;;  %v351_v51 = vpop.permute.xlu2 %350 }
 0x1b2   :  { %4337 = vmatpush.xpose.msk.msra.mxu2 %vm222_vm4, %v221_v34 }
 0x1b5   :  { %4338 = vmatmul.msk.f32.vlgmr.msra.gmra.mxu2 %vm222_vm4, %v218_v33 }
 0x238   :  { %v245_v35 = vpop.f32.mrf.mxu2 }
 0x239   :  { %v248_v36 = vsel %vm222_vm4, %v245_v35, -inf }
 0x23a   :  { %249 = vmax.xlane.f32.xlu0 %v248_v36 }
 0x24e   :  { %324 = vrot.lane.b32.xlu0 %v5687_v32, %s5489_s28 }
 0x256   :  { %389 = vrot.lane.b32.xlu0 %v5687_v32, %s5490_s8 }
 0x2ad   :  { %v250_v37 = vpop.xlane.xlu0 %249 }
 0x2ae   :  { %v251_v38 = vsub.f32 %v245_v35, %v250_v37 }
 0x2b0   :  { %v252_v39 = vmul.f32 1.442695, %v251_v38 }
 0x2b2   :  { %5098 = vpow2.f32 %v252_v39 }
 0x2b8   :  { %v5099_v40 = vpop.eup %5098 }
 0x2b9   :  { %v254_v41 = vsel %vm222_vm4, %v5099_v40, 0.0 }
 0x2ba   :  { %255 = vadd.xlane.f32.xlu1 %v254_v41 }
 0x2c0   :  { %v325_v42 = vpop.permute.xlu0 %324 }
 0x2c1   :  { %345 = vmatpush.msrb.mxu2 %v325_v42 }
 0x2c8   :  { %v390_v43 = vpop.permute.xlu0 %389 }
 0x2c9   :  { %410 = vmatpush.msra.mxu2 %v390_v43 }
 0x2d3   :  { %259 = vrot.lane.b32.xlu1 %v5687_v32, %s5491_s4 }
 0x32d   :  { %v256_v45 = vpop.xlane.xlu1 %255 }
 0x32e   :  { %5100 = vrcp.f32 %v256_v45 }
 0x334   :  { %v5101_v47 = vpop.eup %5100 }
 0x335   :  { %v258_v49 = vmul.f32 %v5101_v47, %v5099_v40 }
 0x345   :  { %v260_v48 = vpop.permute.xlu1 %259 }
 0x346   :  { %280 = vmatpush.msra.mxu3 %v260_v48 }
 0x347   :  { %4339 = vmatmul.msk.f32.vlgmr.msra.gmra.mxu3 %vm222_vm4, %v258_v49 }
 0x348   :  { %4340 = vmatpush.xpose.msk.msrb.mxu3 %vm222_vm4, %v288_v44 }
 0x34c   :  { %4343 = vmatpush.xpose.msk.msra.mxu3 %vm222_vm4, %v353_v50 }
 0x34f   :  { %4341 = vmatmul.msk.f32.vlgmr.msrb.gmra.mxu3 %vm222_vm4, %v286_v46 }
 0x357   :  { %4344 = vmatmul.msk.f32.vlgmr.msra.gmra.mxu3 %vm222_vm4, %v351_v51 }
 0x3ca   :  { %v5713_v52 = vpop.f32.mrf.mxu3 }
 0x3d2   :  { %v310_v53 = vpop.f32.mrf.mxu3 }
 0x3d3   :  { %v313_v54 = vsel %vm222_vm4, %v310_v53, -inf }
 0x3d4   :  { %314 = vmax.xlane.f32.xlu2 %v313_v54 }
 0x3da   :  { %v375_v55 = vpop.f32.mrf.mxu3 }
 0x3db   :  { %v378_v56 = vsel %vm222_vm4, %v375_v55, -inf }
 0x3dc   :  { %379 = vmax.xlane.f32.xlu1 %v378_v56 }
 0x3ec   :  { %417 = vrot.lane.b32.xlu2 %v5687_v32, %s5492_s0 }
 0x3f5   :  { %415 = vrot.lane.b32.xlu1 %v218_v33, %s5493_s9 }
 0x447   :  { %v315_v57 = vpop.xlane.xlu2 %314 }
 0x448   :  { %v316_v58 = vsub.f32 %v310_v53, %v315_v57 }
 0x44a   :  { %v317_v59 = vmul.f32 1.442695, %v316_v58 }
 0x44c   :  { %5102 = vpow2.f32 %v317_v59 }
 0x44f   :  { %v380_v60 = vpop.xlane.xlu1 %379  ;;  %v418_v61 = vpop.permute.xlu2 %417 }
 0x450   :  { %v381_v62 = vsub.f32 %v375_v55, %v380_v60  ;;  %4346 = vmatpush.xpose.msk.msrb.mxu1 %vm222_vm4, %v418_v61 }
 0x452   :  { %v5103_v63 = vpop.eup %5102  ;;  %v382_v0 = vmul.f32 1.442695, %v381_v62 }
 0x453   :  { %v319_v1 = vsel %vm222_vm4, %v5103_v63, 0.0 }
 0x454   :  { %5104 = vpow2.f32 %v382_v0  ;;  %320 = vadd.xlane.f32.xlu0 %v319_v1 }
 0x45a   :  { %v5105_v2 = vpop.eup %5104 }
 0x45b   :  { %v384_v3 = vsel %vm222_vm4, %v5105_v2, 0.0 }
 0x45c   :  { %385 = vadd.xlane.f32.xlu0 %v384_v3 }
 0x467   :  { %v416_v4 = vpop.permute.xlu1 %415 }
 0x468   :  { %4347 = vmatmul.msk.f32.vlgmr.msrb.gmra.mxu1 %vm222_vm4, %v416_v4 }
 0x470   :  { %499 = vrot.lane.b32.xlu0 %v5725_v6, %s5485_s1 }
 0x4c7   :  { %v321_v7 = vpop.xlane.xlu0 %320 }
 0x4c8   :  { %5106 = vrcp.f32 %v321_v7 }
 0x4ce   :  { %v5107_v8 = vpop.eup %5106 }
 0x4cf   :  { %v386_v9 = vpop.xlane.xlu0 %385  ;;  %v323_v10 = vmul.f32 %v5107_v8, %v5103_v63 }
 0x4d0   :  { %5108 = vrcp.f32 %v386_v9 }
 0x4d1   :  { %4342 = vmatmul.msk.f32.vlgmr.msrb.gmra.mxu2 %vm222_vm4, %v323_v10 }
 0x4d6   :  { %v5109_v11 = vpop.eup %5108 }
 0x4d7   :  { %v388_v12 = vmul.f32 %v5109_v11, %v5105_v2 }
 0x4d9   :  { %4345 = vmatmul.msk.f32.vlgmr.msra.gmra.mxu2 %vm222_vm4, %v388_v12 }
 0x4e2   :  { %v500_v13 = vpop.permute.xlu0 %499 }
 0x4e3   :  { %4349 = vmatpush.xpose.msk.msrb.mxu2 %vm222_vm4, %v500_v13 }
 0x4e5   :  { %v440_v15 = vpop.f32.mrf.mxu1 }
 0x4e6   :  { %4350 = vmatmul.msk.f32.vlgmr.msrb.gmra.mxu2 %vm222_vm4, %v497_v14  ;;  %v443_v16 = vsel %vm222_vm4, %v440_v15, -inf }
 0x4e7   :  { %444 = vmax.xlane.f32.xlu2 %v443_v16 }
 0x4ff   :  { %454 = vrot.lane.b32.xlu2 %v5687_v32, %s5494_s30 }
 0x554   :  { %v5737_v17 = vpop.f32.mrf.mxu2 }
 0x55a   :  { %v445_v18 = vpop.xlane.xlu2 %444 }
 0x55b   :  { %v446_v19 = vsub.f32 %v440_v15, %v445_v18 }
 0x55c   :  { %v5739_v21 = vpop.f32.mrf.mxu2 }
 0x55d   :  { %v447_v20 = vmul.f32 1.442695, %v446_v19 }
 0x55f   :  { %5110 = vpow2.f32 %v447_v20 }
 0x562   :  { %v455_v22 = vpop.permute.xlu2 %454 }
 0x563   :  { %475 = vmatpush.msrb.mxu3 %v455_v22 }
 0x565   :  { %v5111_v23 = vpop.eup %5110 }
 0x566   :  { %v449_v24 = vsel %vm222_vm4, %v5111_v23, 0.0 }
 0x567   :  { %450 = vadd.xlane.f32.xlu0 %v449_v24 }
 0x569   :  { %v523_v25 = vpop.f32.mrf.mxu2 }
 0x56a   :  { %v526_v26 = vsel %vm222_vm4, %v523_v25, -inf }
 0x56b   :  { %527 = vmax.xlane.f32.xlu1 %v526_v26 }
 0x57b   :  { %563 = vrot.lane.b32.xlu0 %v497_v14, %s5486_s27  ;;  %s6546_s27 = sld [smem:[#allocation15_spill]] }
 0x583   :  { %695 = vrot.lane.b32.xlu0 %v5725_v6, %s5492_s0  ;;  %s6547_s0 = sld [smem:[#allocation8_spill]] }
 0x584   :  { %565 = vrot.lane.b32.xlu1 %v5725_v6, %s5484_s6  ;;  %s5496_s6 = smov 16  }
 0x58b   :  { %537 = vrot.lane.b32.xlu0 %v5725_v6, %s5491_s4 }
 0x58c   :  { %693 = vrot.lane.b32.xlu1 %v497_v14, %s5493_s9 }
 0x593   :  { %628 = vrot.lane.b32.xlu0 %v497_v14, %s5488_s7 }
 0x594   :  { %630 = vrot.lane.b32.xlu1 %v5725_v6, %s5487_s3 }
 0x5da   :  { %v451_v27 = vpop.xlane.xlu0 %450 }
 0x5db   :  { %5112 = vrcp.f32 %v451_v27 }
 0x5de   :  { %v528_v28 = vpop.xlane.xlu1 %527 }
 0x5df   :  { %v529_v29 = vsub.f32 %v523_v25, %v528_v28 }
 0x5e1   :  { %v5113_v30 = vpop.eup %5112  ;;  %v530_v31 = vmul.f32 1.442695, %v529_v29 }
 0x5e2   :  { %v453_v32 = vmul.f32 %v5113_v30, %v5111_v23 }
 0x5e3   :  { %5114 = vpow2.f32 %v530_v31 }
 0x5e4   :  { %4348 = vmatmul.msk.f32.vlgmr.msrb.gmra.mxu3 %vm222_vm4, %v453_v32 }
 0x5e9   :  { %v5115_v33 = vpop.eup %5114 }
 0x5ea   :  { %v532_v34 = vsel %vm222_vm4, %v5115_v33, 0.0 }
 0x5eb   :  { %533 = vadd.xlane.f32.xlu2 %v532_v34 }
 0x5ed   :  { %v564_v35 = vpop.permute.xlu0 %563 }
 0x5f5   :  { %v696_v36 = vpop.permute.xlu0 %695 }
 0x5f6   :  { %v566_v37 = vpop.permute.xlu1 %565 }
 0x5f7   :  { %4352 = vmatpush.xpose.msk.msra.mxu3 %vm222_vm4, %v566_v37 }
 0x5fa   :  { %4353 = vmatmul.msk.f32.vlgmr.msra.gmra.mxu3 %vm222_vm4, %v564_v35 }
 0x5fb   :  { %4358 = vmatpush.xpose.msk.msrb.mxu3 %vm222_vm4, %v696_v36 }
 0x5fd   :  { %v538_v38 = vpop.permute.xlu0 %537 }
 0x5fe   :  { %v694_v39 = vpop.permute.xlu1 %693  ;;  %558 = vmatpush.msra.mxu1 %v538_v38 }
 0x602   :  { %4359 = vmatmul.msk.f32.vlgmr.msrb.gmra.mxu3 %vm222_vm4, %v694_v39 }
 0x605   :  { %v629_v44 = vpop.permute.xlu0 %628 }
 0x606   :  { %v631_v40 = vpop.permute.xlu1 %630 }
 0x607   :  { %4355 = vmatpush.xpose.msk.msrb.mxu1 %vm222_vm4, %v631_v40 }
 0x65e   :  { %v534_v41 = vpop.xlane.xlu2 %533 }
 0x65f   :  { %5116 = vrcp.f32 %v534_v41 }
 0x665   :  { %v5117_v42 = vpop.eup %5116 }
 0x666   :  { %v536_v43 = vmul.f32 %v5117_v42, %v5115_v33 }
 0x667   :  { %v477_v45 = vpop.f32.mrf.mxu3 }
 0x668   :  { %4351 = vmatmul.msk.f32.vlgmr.msra.gmra.mxu1 %vm222_vm4, %v536_v43  ;;  %v5091_v43 = vld [vmem:[%s6545_s2] ss:$0 sm:$0xff] }
 0x670   :  { %4356 = vmatmul.msk.f32.vlgmr.msrb.gmra.mxu1 %vm222_vm4, %v629_v44 }
 0x67d   :  { %v588_v46 = vpop.f32.mrf.mxu3 }
 0x67e   :  { %v591_v47 = vsel %vm222_vm4, %v588_v46, -inf }
 0x67f   :  { %592 = vmax.xlane.f32.xlu1 %v591_v47 }
 0x685   :  { %v718_v48 = vpop.f32.mrf.mxu3 }
 0x686   :  { %v721_v49 = vsel %vm222_vm4, %v718_v48, -inf }
 0x687   :  { %722 = vmax.xlane.f32.xlu0 %v721_v49 }
 0x698   :  { %602 = vrot.lane.b32.xlu1 %v5725_v6, %s5489_s28 }
 0x69b   :  { %732 = vrot.lane.b32.xlu0 %v5725_v6, %s5494_s30 }
 0x6e5   :  { %v5769_v50 = vpop.f32.mrf.mxu1 }
 0x6ed   :  { %v653_v51 = vpop.f32.mrf.mxu1 }
 0x6ee   :  { %v656_v53 = vsel %vm222_vm4, %v653_v51, -inf }
 0x6ef   :  { %657 = vmax.xlane.f32.xlu2 %v656_v53 }
 0x6f2   :  { %v593_v54 = vpop.xlane.xlu1 %592 }
 0x6f3   :  { %v594_v55 = vsub.f32 %v588_v46, %v593_v54 }
 0x6f5   :  { %v595_v56 = vmul.f32 1.442695, %v594_v55 }
 0x6f7   :  { %5118 = vpow2.f32 %v595_v56 }
 0x6fa   :  { %v723_v57 = vpop.xlane.xlu0 %722 }
 0x6fb   :  { %v724_v58 = vsub.f32 %v718_v48, %v723_v57  ;;  %v5092_v48 = vld [vmem:[%s6546_s27] ss:$0 sm:$0xff] }
 0x6fd   :  { %v5119_v59 = vpop.eup %5118  ;;  %v725_v60 = vmul.f32 1.442695, %v724_v58 }
 0x6fe   :  { %v597_v61 = vsel %vm222_vm4, %v5119_v59, 0.0 }
 0x6ff   :  { %5120 = vpow2.f32 %v725_v60  ;;  %598 = vadd.xlane.f32.xlu2 %v597_v61 }
 0x705   :  { %v5121_v62 = vpop.eup %5120 }
 0x706   :  { %v727_v63 = vsel %vm222_vm4, %v5121_v62, 0.0 }
 0x707   :  { %728 = vadd.xlane.f32.xlu2 %v727_v63 }
 0x70a   :  { %v603_v0 = vpop.permute.xlu1 %602 }
 0x70b   :  { %623 = vmatpush.msra.mxu2 %v603_v0 }
 0x70d   :  { %v733_v1 = vpop.permute.xlu0 %732 }
 0x70e   :  { %753 = vmatpush.msrb.mxu2 %v733_v1 }
 0x762   :  { %v658_v2 = vpop.xlane.xlu2 %657 }
 0x763   :  { %v659_v3 = vsub.f32 %v653_v51, %v658_v2 }
 0x765   :  { %v660_v4 = vmul.f32 1.442695, %v659_v3 }
 0x767   :  { %5122 = vpow2.f32 %v660_v4 }
 0x76d   :  { %v5123_v5 = vpop.eup %5122 }
 0x76e   :  { %v662_v7 = vsel %vm222_vm4, %v5123_v5, 0.0 }
 0x76f   :  { %663 = vadd.xlane.f32.xlu2 %v662_v7 }
 0x772   :  { %v599_v8 = vpop.xlane.xlu2 %598 }
 0x773   :  { %5124 = vrcp.f32 %v599_v8 }
 0x779   :  { %v5125_v9 = vpop.eup %5124 }
 0x77a   :  { %v601_v10 = vmul.f32 %v5125_v9, %v5119_v59  ;;  %v729_v11 = vpop.xlane.xlu2 %728 }
 0x77b   :  { %5126 = vrcp.f32 %v729_v11 }
 0x77c   :  { %4354 = vmatmul.msk.f32.vlgmr.msra.gmra.mxu2 %vm222_vm4, %v601_v10 }
 0x781   :  { %v5127_v12 = vpop.eup %5126 }
 0x782   :  { %v731_v13 = vmul.f32 %v5127_v12, %v5121_v62 }
 0x784   :  { %4360 = vmatmul.msk.f32.vlgmr.msrb.gmra.mxu2 %vm222_vm4, %v731_v13 }
 0x787   :  { %667 = vrot.lane.b32.xlu2 %v5725_v6, %s5490_s8  ;;  %v4926_v6 = vld [vmem:[%s6543_s10 + $0x8] sm:$0xff]  ;;  %s6544_s8 = sld [smem:[#allocation14_spill]] }
 0x788   :  { %803 = vmatpush.bf16.msrb.mxu0 %v4926_v6 }
 0x78d   :  { %v4928_v41 = vld [vmem:[%s6544_s8 + $0x8] sm:$0xff] }
 0x7e2   :  { %v664_v14 = vpop.xlane.xlu2 %663 }
 0x7e3   :  { %5128 = vrcp.f32 %v664_v14 }
 0x7e9   :  { %v5129_v15 = vpop.eup %5128 }
 0x7ea   :  { %v666_v16 = vmul.f32 %v5129_v15, %v5123_v5  ;;  %v668_v18 = vpop.permute.xlu2 %667 }
 0x7eb   :  { %688 = vmatpush.msra.mxu1 %v668_v18 }
 0x7ec   :  { %4357 = vmatmul.msk.f32.vlgmr.msra.gmra.mxu1 %vm222_vm4, %v666_v16 }
 0x7ed   :  { %841 = vmatpush.bf16.msrb.mxu1 %v4928_v41 }
 0x7ff   :  { %v625_v19 = vpop.f32.mrf.mxu2 }
 0x800   :  { %v5060_v20 = vpack.i.bf16 %v625_v19, %v5737_v17  ;;  %v4925_v17 = vld [vmem:[%s6543_s10] sm:$0xff] }
 0x801   :  { %804 = vmatpush.bf16.msrb.mxu0 %v4925_v17  ;;  %v4391_v17 = vld [vmem:[%s6503_s11 + $0x10] sm:$0xf] }
 0x802   :  { %5061 = vrot.lane.b32.xlu0 %v5060_v20, %s5495_s23 }
 0x807   :  { %v755_v22 = vpop.f32.mrf.mxu2 }
 0x808   :  { %v5070_v23 = vpack.i.bf16 %v755_v22, %v477_v45 }
 0x80a   :  { %5071 = vrot.lane.b32.xlu0 %v5070_v23, %s5482_s29 }
 0x869   :  { %v690_v24 = vpop.f32.mrf.mxu1 }
 0x86a   :  { %v5065_v25 = vpack.i.bf16 %v690_v24, %v5739_v21 }
 0x86c   :  { %5066 = vrot.lane.b32.xlu1 %v5065_v25, %s5496_s6 }
 0x874   :  { %v5062_v26 = vpop.permute.xlu0 %5061 }
 0x875   :  { %v5064_v27 = vunpack.i.h.bf16 %v5062_v26  ;;  %v5063_v28 = vunpack.i.l.bf16 %v5062_v26  ;;  %v4932_v26 = vld [vmem:[%s6503_s11 + $0x14] sm:$0xf0] }
 0x877   :  { %v770_v21 = vsel %vm222_vm4, %v5769_v50, %v5064_v27  ;;  %v492_v33 = vsel %vm222_vm4, %v5713_v52, %v5063_v28  ;;  %v4927_v52 = vld [vmem:[%s6544_s8] sm:$0xff]  ;;  %v4931_v27 = vld [vmem:[%s6503_s11 + $0x14] sm:$0xf]  ;;  %v5837_v28 = vor.u32 %v4932_v26, %v4391_v17 }
 0x878   :  { %842 = vmatpush.bf16.msrb.mxu1 %v4927_v52 }
 0x879   :  { %956 = vmatpush.bf16.msra.mxu3 %v5837_v28  ;;  %1122 = vmatpush.bf16.msra.mxu0 %v5837_v28 }
 0x87c   :  { %v5072_v29 = vpop.permute.xlu0 %5071 }
 0x87d   :  { %v5074_v34 = vunpack.i.h.bf16 %v5072_v29  ;;  %v5073_v35 = vunpack.i.l.bf16 %v5072_v29  ;;  %v4393_v29 = vld [vmem:[%s6503_s11 + $0x18] sm:$0xf0] }
 0x8de   :  { %v5067_v30 = vpop.permute.xlu1 %5066 }
 0x8df   :  { %v5069_v31 = vunpack.i.h.bf16 %v5067_v30  ;;  %v5068_v32 = vunpack.i.l.bf16 %v5067_v30  ;;  %v4383_v30 = vld [vmem:[%s6503_s11] sm:$0xf] }
 0x8e1   :  { %v494_v36 = vsel %vm493_vm5, %v492_v33, %v5068_v32  ;;  %v771_v37 = vsel %vm493_vm5, %v770_v21, %v5069_v31  ;;  %v4930_v31 = vld [vmem:[%s6503_s11 + $0x4] sm:$0xf0]  ;;  %v5848_v32 = vor.u32 %v4931_v27, %v4393_v29  ;;  %v4929_v21 = vld [vmem:[%s6503_s11 + $0x4] sm:$0xf]  ;;  %v4385_v33 = vld [vmem:[%s6503_s11 + $0x8] sm:$0xf0] }
 0x8e2   :  { %v496_v38 = vsel %vm495_vm6, %v494_v36, %v5073_v35  ;;  %v772_v39 = vsel %vm495_vm6, %v771_v37, %v5074_v34  ;;  %v5857_v34 = vor.u32 %v4930_v31, %v4383_v30  ;;  %v5861_v35 = vor.u32 %v4929_v21, %v4385_v33  ;;  %s5497_s11 = smov 32  }
 0x8e3   :  { %v777_v40 = vpack.c.bf16 %v772_v39, %v496_v38  ;;  %969 = vmatpush.bf16.msra.mxu2 %v5848_v32  ;;  %1135 = vmatpush.bf16.msra.mxu1 %v5848_v32 }
 0x8e4   :  { %957 = vmatpush.bf16.msra.mxu3 %v5857_v34  ;;  %1123 = vmatpush.bf16.msra.mxu0 %v5857_v34 }
 0x8e5   :  { %4369 = vmatmul.msk.bf16.vlgmr.msrb.gmra.mxu0 %vm200_vm3, %v777_v40 }
 0x8e7   :  { %970 = vmatpush.bf16.msra.mxu2 %v5861_v35  ;;  %1136 = vmatpush.bf16.msra.mxu1 %v5861_v35 }
 0x8e8   :  { %1342 = vmatpush.bf16.msrb.mxu0 %v5848_v32 }
 0x8eb   :  { %1329 = vmatpush.bf16.msrb.mxu2 %v5837_v28 }
 0x8ec   :  { %1343 = vmatpush.bf16.msrb.mxu0 %v5861_v35 }
 0x8ef   :  { %1330 = vmatpush.bf16.msrb.mxu2 %v5857_v34 }
 0x962   :  { %v806_v42 = vpop.f32.mrf.mxu0 }
 0x963   :  { %v807_v45 = vadd.f32 %v5091_v43, %v806_v42 }
 0x96a   :  { %v808_v44 = vpop.f32.mrf.mxu0 }
 0x96b   :  { %v809_v46 = vadd.f32 %v5091_v43, %v808_v44 }
 0x96d   :  { %v815_v47 = vpack.c.bf16 %v809_v46, %v807_v45 }
 0x96f   :  { %4378 = vmatmul.msk.bf16.vlgmr.msrb.gmra.mxu1 %vm200_vm3, %v815_v47 }
 0x9ec   :  { %v844_v49 = vpop.f32.mrf.mxu1 }
 0x9ed   :  { %v5810_v50 = vadd.f32 %v5092_v48, %v844_v49 }
 0x9ef   :  { %5130 = vtanh.f32 %v5810_v50  ;;  %v4379_v56 = vmul.f32 -1.442695, %v5810_v50 }
 0x9f4   :  { %v846_v51 = vpop.f32.mrf.mxu1 }
 0x9f5   :  { %v5131_v53 = vpop.eup %5130  ;;  %v5813_v54 = vadd.f32 %v5092_v48, %v846_v51 }
 0x9f6   :  { %891 = vrot.lane.b32.xlu2 %v5131_v53, %s5491_s4 }
 0x9f7   :  { %5132 = vtanh.f32 %v5813_v54  ;;  %v4380_v62 = vmul.f32 -1.442695, %v5813_v54 }
 0x9f8   :  { %5134 = vpow2.f32 %v4379_v56 }
 0x9fd   :  { %v5133_v55 = vpop.eup %5132 }
 0x9fe   :  { %893 = vrot.lane.b32.xlu1 %v5133_v55, %s5491_s4  ;;  %v5135_v57 = vpop.eup %5134 }
 0x9ff   :  { %v855_v58 = vadd.f32 1.0, %v5135_v57 }
 0xa01   :  { %5136 = vrcp.f32 %v855_v58  ;;  %v868_v1 = vand.u32 2147483648, %v855_v58  ;;  %vm862_vm8 = vweird.f32 %v855_v58  ;;  %v866_v2 = vand.u32 2147483647, %v855_v58 }
 0xa02   :  { %5138 = vpow2.f32 %v4380_v62 }
 0xa03   :  { %v869_v5 = vor.u32 1.1754944e-38, %v868_v1  ;;  %vm867_vm10 = vcmp.eq.f32.partialorder %v866_v2, 8.507059e+37 }
 0xa07   :  { %v5137_v59 = vpop.eup %5136 }
 0xa08   :  { %v858_v60 = vmul.f32 %v5137_v59, %v855_v58  ;;  %vm863_vm7 = vweird.f32 %v5137_v59  ;;  %v5139_v3 = vpop.eup %5138 }
 0xa09   :  { %vm864_vm9 = vmor %vm862_vm8, %vm863_vm7  ;;  %v856_v9 = vadd.f32 1.0, %v5139_v3 }
 0xa0a   :  { %v859_v61 = vsub.f32 1.0, %v858_v60  ;;  %v5887_v60 = vld [vmem:[%s6505_s13] ss:$0 sm:$0xff] }
 0xa0b   :  { %v883_v18 = vand.u32 2147483648, %v856_v9  ;;  %vm877_vm12 = vweird.f32 %v856_v9  ;;  %v881_v19 = vand.u32 2147483647, %v856_v9 }
 0xa0c   :  { %v860_v63 = vmul.f32 %v5137_v59, %v859_v61 }
 0xa0d   :  { %v884_v22 = vor.u32 1.1754944e-38, %v883_v18  ;;  %vm882_vm14 = vcmp.eq.f32.partialorder %v881_v19, 8.507059e+37 }
 0xa0e   :  { %v861_v0 = vadd.f32 %v5137_v59, %v860_v63 }
 0xa10   :  { %v865_v4 = vsel %vm864_vm9, %v5137_v59, %v861_v0 }
 0xa11   :  { %v870_v8 = vsel %vm867_vm10, %v869_v5, %v865_v4 }
 0xa50   :  { %v892_v7 = vpop.permute.xlu2 %891 }
 0xa51   :  { %v5820_v10 = vmul.f32 %v892_v7, %v870_v8 }
 0xa53   :  { %5140 = vtanh.f32 %v5820_v10  ;;  %v1060_v46 = vrot.slane %v5820_v10, 7 }
 0xa54   :  { %5142 = vrcp.f32 %v856_v9 }
 0xa59   :  { %v5141_v11 = vpop.eup %5140 }
 0xa5a   :  { %v5143_v12 = vpop.eup %5142  ;;  %903 = vrot.lane.b32.xlu1 %v5141_v11, %s5485_s1 }
 0xa5b   :  { %v873_v13 = vmul.f32 %v5143_v12, %v856_v9  ;;  %vm878_vm11 = vweird.f32 %v5143_v12 }
 0xa5c   :  { %vm879_vm13 = vmor %vm877_vm12, %vm878_vm11 }
 0xa5d   :  { %v874_v14 = vsub.f32 1.0, %v873_v13 }
 0xa5f   :  { %v875_v15 = vmul.f32 %v5143_v12, %v874_v14 }
 0xa61   :  { %v876_v16 = vadd.f32 %v5143_v12, %v875_v15 }
 0xa63   :  { %v880_v20 = vsel %vm879_vm13, %v5143_v12, %v876_v16 }
 0xa64   :  { %v885_v6 = vsel %vm882_vm14, %v884_v22, %v880_v20 }
 0xa70   :  { %v894_v23 = vpop.permute.xlu1 %893 }
 0xa71   :  { %v5824_v24 = vmul.f32 %v894_v23, %v885_v6 }
 0xa73   :  { %5144 = vtanh.f32 %v5824_v24  ;;  %v1061_v62 = vrot.slane %v5824_v24, 7 }
 0xa79   :  { %v5145_v25 = vpop.eup %5144 }
 0xa7a   :  { %905 = vrot.lane.b32.xlu0 %v5145_v25, %s5485_s1 }
 0xacc   :  { %v904_v36 = vpop.permute.xlu1 %903 }
 0xacd   :  { %v909_v37 = vmul.f32 %v904_v36, %v870_v8 }
 0xacf   :  { %v915_v40 = vpack.c.bf16 %v909_v37, %v909_v37 }
 0xad1   :  { %v919_v42 = vunpack.c.l.b16 %v915_v40 }
 0xaec   :  { %v906_v38 = vpop.permute.xlu0 %905 }
 0xaed   :  { %v910_v39 = vmul.f32 %v906_v38, %v885_v6 }
 0xaef   :  { %v916_v41 = vpack.c.bf16 %v910_v39, %v910_v39 }
 0xaf1   :  { %v920_v52 = vunpack.c.l.b16 %v916_v41 }
 0xaf3   :  { %v921_v43 = vrot.slane %v920_v52, 7 }
 0xaf5   :  { %v923_v44 = vsel %vm922_vm15, %v921_v43, %v919_v42 }
 0xaf6   :  { %v924_v45 = vpack.c.b16 %v923_v44, %v923_v44 }
 0xaf8   :  { %925 = vrot.lane.b32.xlu2 %v924_v45, %s5497_s11 }
 0xb00   :  { %1062 = vrot.lane.b32.xlu2 %v1060_v46, %s5497_s11 }
 0xb52   :  { %v926_v47 = vpop.permute.xlu2 %925 }
 0xb53   :  { %4397 = vmatmul.msk.bf16.vlgmr.msra.gmra.mxu3 %vm200_vm3, %v926_v47  ;;  %4398 = vmatmul.msk.bf16.vlgmr.msra.gmra.mxu2 %vm200_vm3, %v926_v47 }
 0xb54   :  { %1529 = vmatpush.bf16.msra.mxu2 %v5848_v32 }
 0xb58   :  { %1530 = vmatpush.bf16.msra.mxu2 %v5861_v35 }
 0xbd6   :  { %v959_v48 = vpop.f32.mrf.mxu3  ;;  %v972_v49 = vpop.f32.mrf.mxu2 }
 0xbd7   :  { %v1013_v51 = vrot.slane %v972_v49, 7  ;;  %v1017_v53 = vadd.f32 %v972_v49, %v5813_v54  ;;  %v980_v61 = vadd.f32 %v5887_v60, %v959_v48 }
 0xbd9   :  { %v1016_v55 = vadd.f32 %v1013_v51, %v5810_v50  ;;  %5146 = vtanh.f32 %v1017_v53  ;;  %v4401_v0 = vmul.f32 -1.442695, %v1017_v53  ;;  %v4399_v7 = vmul.f32 -1.442695, %v980_v61  ;;  %v1063_v51 = vpop.permute.xlu2 %1062 }
 0xbdb   :  { %5148 = vtanh.f32 %v1016_v55  ;;  %v4400_v1 = vmul.f32 -1.442695, %v1016_v55 }
 0xbdc   :  { %5150 = vtanh.f32 %v980_v61 }
 0xbdd   :  { %5152 = vpow2.f32 %v4401_v0 }
 0xbde   :  { %v961_v56 = vpop.f32.mrf.mxu3  ;;  %v974_v57 = vpop.f32.mrf.mxu2  ;;  %5154 = vpow2.f32 %v4400_v1 }
 0xbdf   :  { %v5147_v58 = vpop.eup %5146 }
 0xbe0   :  { %1074 = vrot.lane.b32.xlu1 %v5147_v58, %s5491_s4 }
 0xbe1   :  { %v5149_v59 = vpop.eup %5148 }
 0xbe2   :  { %1072 = vrot.lane.b32.xlu0 %v5149_v59, %s5491_s4  ;;  %v5151_v63 = vpop.eup %5150 }
 0xbe3   :  { %v5153_v2 = vpop.eup %5152 }
 0xbe4   :  { %v1025_v3 = vadd.f32 1.0, %v5153_v2  ;;  %v5155_v4 = vpop.eup %5154  ;;  %v5911_v2 = vld [vmem:[%s6504_s12 + $0x8] sm:$0xff] }
 0xbe5   :  { %v1024_v5 = vadd.f32 1.0, %v5155_v4  ;;  %1171 = vmatpush.bf16.msrb.mxu3 %v5911_v2  ;;  %1362 = vmatpush.bf16.msrb.mxu1 %v5911_v2 }
 0xbe6   :  { %5156 = vrcp.f32 %v1025_v3  ;;  %v1052_v20 = vand.u32 2147483648, %v1025_v3  ;;  %vm1046_vm2 = vweird.f32 %v1025_v3  ;;  %v1050_v22 = vand.u32 2147483647, %v1025_v3 }
 0xbe7   :  { %5158 = vrcp.f32 %v1024_v5  ;;  %v1037_v17 = vand.u32 2147483648, %v1024_v5  ;;  %vm1031_vm8 = vweird.f32 %v1024_v5  ;;  %v1035_v26 = vand.u32 2147483647, %v1024_v5 }
 0xbe8   :  { %5160 = vpow2.f32 %v4399_v7  ;;  %v1053_v25 = vor.u32 1.1754944e-38, %v1052_v20  ;;  %vm1051_vm7 = vcmp.eq.f32.partialorder %v1050_v22, 8.507059e+37 }
 0xbe9   :  { %v1038_v33 = vor.u32 1.1754944e-38, %v1037_v17  ;;  %vm1036_vm10 = vcmp.eq.f32.partialorder %v1035_v26, 8.507059e+37 }
 0xbea   :  { %1064 = vrot.lane.b32.xlu0 %v1061_v62, %s5497_s11 }
 0xbec   :  { %v5157_v8 = vpop.eup %5156 }
 0xbed   :  { %v1042_v9 = vmul.f32 %v5157_v8, %v1025_v3  ;;  %v5159_v10 = vpop.eup %5158  ;;  %vm1047_vm0 = vweird.f32 %v5157_v8  ;;  %v5917_v3 = vld [vmem:[%s6504_s12] sm:$0xff] }
 0xbee   :  { %v5161_v11 = vpop.eup %5160  ;;  %v1027_v13 = vmul.f32 %v5159_v10, %v1024_v5  ;;  %vm1048_vm4 = vmor %vm1046_vm2, %vm1047_vm0  ;;  %vm1032_vm6 = vweird.f32 %v5159_v10  ;;  %1172 = vmatpush.bf16.msrb.mxu3 %v5917_v3  ;;  %1363 = vmatpush.bf16.msrb.mxu1 %v5917_v3 }
 0xbef   :  { %v1043_v12 = vsub.f32 1.0, %v1042_v9  ;;  %v984_v14 = vadd.f32 1.0, %v5161_v11  ;;  %vm1033_vm9 = vmor %vm1031_vm8, %vm1032_vm6 }
 0xbf0   :  { %v1028_v16 = vsub.f32 1.0, %v1027_v13 }
 0xbf1   :  { %v1044_v15 = vmul.f32 %v5157_v8, %v1043_v12  ;;  %5162 = vrcp.f32 %v984_v14  ;;  %v996_v42 = vand.u32 2147483648, %v984_v14  ;;  %vm990_vm12 = vweird.f32 %v984_v14 }
 0xbf2   :  { %1002 = vrot.lane.b32.xlu0 %v5151_v63, %s5491_s4  ;;  %v1029_v19 = vmul.f32 %v5159_v10, %v1028_v16  ;;  %v994_v43 = vand.u32 2147483647, %v984_v14  ;;  %1516 = vmatpush.bf16.msra.mxu3 %v5837_v28 }
 0xbf3   :  { %v1045_v18 = vadd.f32 %v5157_v8, %v1044_v15  ;;  %v997_v45 = vor.u32 1.1754944e-38, %v996_v42 }
 0xbf4   :  { %v1030_v6 = vadd.f32 %v5159_v10, %v1029_v19  ;;  %vm995_vm14 = vcmp.eq.f32.partialorder %v994_v43, 8.507059e+37 }
 0xbf5   :  { %v1049_v23 = vsel %vm1048_vm4, %v5157_v8, %v1045_v18 }
 0xbf6   :  { %v1054_v29 = vsel %vm1051_vm7, %v1053_v25, %v1049_v23  ;;  %v1034_v31 = vsel %vm1033_vm9, %v5159_v10, %v1030_v6  ;;  %1517 = vmatpush.bf16.msra.mxu3 %v5857_v34 }
 0xbf7   :  { %v5163_v24 = vpop.eup %5162  ;;  %v1039_v37 = vsel %vm1036_vm10, %v1038_v33, %v1034_v31 }
 0xbf8   :  { %v986_v21 = vmul.f32 %v5163_v24, %v984_v14  ;;  %vm991_vm11 = vweird.f32 %v5163_v24  ;;  %v1068_v58 = vmul.f32 %v1063_v51, %v1039_v37 }
 0xbf9   :  { %vm992_vm13 = vmor %vm990_vm12, %vm991_vm11 }
 0xbfa   :  { %v987_v39 = vsub.f32 1.0, %v986_v21 }
 0xbfc   :  { %v988_v40 = vmul.f32 %v5163_v24, %v987_v39 }
 0xbfe   :  { %v989_v52 = vadd.f32 %v5163_v24, %v988_v40 }
 0xc00   :  { %v993_v44 = vsel %vm992_vm13, %v5163_v24, %v989_v52 }
 0xc01   :  { %v998_v47 = vsel %vm995_vm14, %v997_v45, %v993_v44 }
 0xc52   :  { %v1075_v27 = vpop.permute.xlu1 %1074 }
 0xc53   :  { %v1079_v30 = vmul.f32 %v1075_v27, %v1054_v29 }
 0xc54   :  { %v1073_v36 = vpop.permute.xlu0 %1072 }
 0xc55   :  { %1084 = vrot.lane.b32.xlu2 %v1079_v30, %s5497_s11  ;;  %v1078_v38 = vmul.f32 %v1073_v36, %v1039_v37 }
 0xc57   :  { %1082 = vrot.lane.b32.xlu1 %v1078_v38, %s5497_s11 }
 0xc5c   :  { %v1065_v41 = vpop.permute.xlu0 %1064 }
 0xc5d   :  { %v1069_v53 = vmul.f32 %v1065_v41, %v1054_v29 }
 0xc64   :  { %v1003_v46 = vpop.permute.xlu0 %1002 }
 0xc65   :  { %v5895_v48 = vmul.f32 %v1003_v46, %v998_v47 }
 0xc67   :  { %5164 = vtanh.f32 %v5895_v48 }
 0xc6d   :  { %v5165_v49 = vpop.eup %5164 }
 0xc6e   :  { %1008 = vrot.lane.b32.xlu0 %v5165_v49, %s5485_s1 }
 0xcaf   :  { %v1085_v55 = vpop.permute.xlu2 %1084 }
 0xcb0   :  { %v5899_v56 = vadd.f32 %v1085_v55, %v1069_v53 }
 0xcb2   :  { %5166 = vtanh.f32 %v5899_v56 }
 0xcb8   :  { %v5167_v57 = vpop.eup %5166 }
 0xcb9   :  { %1096 = vrot.lane.b32.xlu2 %v5167_v57, %s5491_s4 }
 0xcc9   :  { %v1083_v59 = vpop.permute.xlu1 %1082 }
 0xcca   :  { %v5903_v61 = vadd.f32 %v1083_v59, %v1068_v58 }
 0xccc   :  { %5168 = vtanh.f32 %v5903_v61 }
 0xcd2   :  { %v5169_v62 = vpop.eup %5168 }
 0xcd3   :  { %1094 = vrot.lane.b32.xlu1 %v5169_v62, %s5491_s4 }
 0xce0   :  { %v1009_v63 = vpop.permute.xlu0 %1008 }
 0xce1   :  { %v1011_v0 = vmul.f32 %v1009_v63, %v998_v47 }
 0xce3   :  { %v1146_v1 = vpack.c.bf16 %v1011_v0, %v1011_v0 }
 0xce5   :  { %1148 = vrot.lane.b32.xlu2 %v1146_v1, %s5497_s11 }
 0xd13   :  { %v1097_v4 = vpop.permute.xlu2 %1096 }
 0xd14   :  { %v1101_v7 = vmul.f32 %v1097_v4, %v1054_v29 }
 0xd16   :  { %v1103_v10 = vpack.c.bf16 %v1101_v7, %v1101_v7 }
 0xd18   :  { %v1107_v13 = vunpack.c.l.b16 %v1103_v10 }
 0xd3f   :  { %v1149_v5 = vpop.permute.xlu2 %1148 }
 0xd40   :  { %4412 = vmatmul.msk.bf16.vlgmr.msrb.gmra.mxu3 %vm200_vm3, %v1149_v5 }
 0xd41   :  { %1716 = vmatpush.bf16.msrb.mxu3 %v5848_v32 }
 0xd45   :  { %v1095_v8 = vpop.permute.xlu1 %1094  ;;  %1717 = vmatpush.bf16.msrb.mxu3 %v5861_v35 }
 0xd46   :  { %v1100_v9 = vmul.f32 %v1095_v8, %v1039_v37 }
 0xd48   :  { %v1102_v11 = vpack.c.bf16 %v1100_v9, %v1100_v9 }
 0xd4a   :  { %v1106_v12 = vunpack.c.l.b16 %v1102_v11 }
 0xd4c   :  { %v1108_v14 = vrot.slane %v1106_v12, 1 }
 0xd4e   :  { %v1109_v15 = vsel %vm922_vm15, %v1107_v13, %v1108_v14 }
 0xd4f   :  { %v1110_v16 = vpack.c.b16 %v1109_v15, %v1109_v15 }
 0xd51   :  { %1111 = vrot.lane.b32.xlu1 %v1110_v16, %s5497_s11 }
 0xdc3   :  { %v1112_v18 = vpop.permute.xlu1 %1111  ;;  %v1174_v19 = vpop.f32.mrf.mxu3 }
 0xdc4   :  { %4402 = vmatmul.msk.bf16.vlgmr.msra.gmra.mxu0 %vm200_vm3, %v1112_v18  ;;  %4403 = vmatmul.msk.bf16.vlgmr.msra.gmra.mxu1 %vm200_vm3, %v1112_v18 }
 0xdc5   :  { %1549 = vmatpush.bf16.msra.mxu0 %v5911_v2  ;;  %1703 = vmatpush.bf16.msra.mxu1 %v5837_v28 }
 0xdc9   :  { %1550 = vmatpush.bf16.msra.mxu0 %v5917_v3  ;;  %1704 = vmatpush.bf16.msra.mxu1 %v5857_v34 }
 0xdcb   :  { %v1176_v20 = vpop.f32.mrf.mxu3 }
 0xe41   :  { %v1125_v22 = vpop.f32.mrf.mxu0  ;;  %v1138_v23 = vpop.f32.mrf.mxu1 }
 0xe42   :  { %v1222_v6 = vrot.slane %v1138_v23, 6  ;;  %v1223_v24 = vrot.slane %v1138_v23, 7  ;;  %v1178_v29 = vadd.f32 %v1174_v19, %v1125_v22 }
 0xe44   :  { %v1226_v25 = vadd.f32 %v1222_v6, %v5810_v50  ;;  %v1227_v17 = vadd.f32 %v1223_v24, %v5813_v54  ;;  %v1179_v31 = vadd.f32 %v5887_v60, %v1178_v29 }
 0xe46   :  { %5170 = vtanh.f32 %v1226_v25  ;;  %v4414_v36 = vmul.f32 -1.442695, %v1226_v25  ;;  %v4415_v37 = vmul.f32 -1.442695, %v1227_v17  ;;  %v4413_v39 = vmul.f32 -1.442695, %v1179_v31 }
 0xe47   :  { %5172 = vtanh.f32 %v1227_v17 }
 0xe48   :  { %5174 = vtanh.f32 %v1179_v31 }
 0xe49   :  { %v1127_v26 = vpop.f32.mrf.mxu0  ;;  %v1140_v27 = vpop.f32.mrf.mxu1  ;;  %5176 = vpow2.f32 %v4414_v36 }
 0xe4a   :  { %5178 = vpow2.f32 %v4415_v37  ;;  %v1270_v26 = vrot.slane %v5903_v61, 7 }
 0xe4b   :  { %5180 = vpow2.f32 %v4413_v39 }
 0xe4c   :  { %v5171_v30 = vpop.eup %5170 }
 0xe4d   :  { %1278 = vrot.lane.b32.xlu0 %v5171_v30, %s5491_s4  ;;  %v5173_v21 = vpop.eup %5172 }
 0xe4e   :  { %1280 = vrot.lane.b32.xlu1 %v5173_v21, %s5491_s4  ;;  %v5175_v33 = vpop.eup %5174  ;;  %v1271_v21 = vrot.slane %v5899_v56, 7 }
 0xe4f   :  { %v5177_v38 = vpop.eup %5176 }
 0xe50   :  { %v1234_v40 = vadd.f32 1.0, %v5177_v38  ;;  %v5179_v41 = vpop.eup %5178 }
 0xe51   :  { %v1235_v52 = vadd.f32 1.0, %v5179_v41  ;;  %v5181_v42 = vpop.eup %5180 }
 0xe52   :  { %5182 = vrcp.f32 %v1234_v40  ;;  %v1183_v44 = vadd.f32 1.0, %v5181_v42  ;;  %v1247_v62 = vand.u32 2147483648, %v1234_v40  ;;  %vm1241_vm2 = vweird.f32 %v1234_v40 }
 0xe53   :  { %5184 = vrcp.f32 %v1235_v52  ;;  %v1245_v63 = vand.u32 2147483647, %v1234_v40  ;;  %v1262_v5 = vand.u32 2147483648, %v1235_v52  ;;  %vm1256_vm7 = vweird.f32 %v1235_v52 }
 0xe54   :  { %5186 = vrcp.f32 %v1183_v44  ;;  %v1248_v7 = vor.u32 1.1754944e-38, %v1247_v62  ;;  %v1260_v8 = vand.u32 2147483647, %v1235_v52  ;;  %v1195_v20 = vand.u32 2147483648, %v1183_v44 }
 0xe55   :  { %vm1246_vm8 = vcmp.eq.f32.partialorder %v1245_v63, 8.507059e+37  ;;  %v1263_v14 = vor.u32 1.1754944e-38, %v1262_v5  ;;  %vm1189_vm12 = vweird.f32 %v1183_v44  ;;  %v1193_v22 = vand.u32 2147483647, %v1183_v44 }
 0xe56   :  { %1206 = vrot.lane.b32.xlu1 %v5175_v33, %s5491_s4  ;;  %vm1261_vm10 = vcmp.eq.f32.partialorder %v1260_v8, 8.507059e+37  ;;  %v1196_v6 = vor.u32 1.1754944e-38, %v1195_v20 }
 0xe57   :  { %vm1194_vm14 = vcmp.eq.f32.partialorder %v1193_v22, 8.507059e+37 }
 0xe58   :  { %v5183_v43 = vpop.eup %5182 }
 0xe59   :  { %v1237_v45 = vmul.f32 %v5183_v43, %v1234_v40  ;;  %v5185_v46 = vpop.eup %5184  ;;  %vm1242_vm0 = vweird.f32 %v5183_v43 }
 0xe5a   :  { %v1252_v47 = vmul.f32 %v5185_v46, %v1235_v52  ;;  %v5187_v55 = vpop.eup %5186  ;;  %vm1243_vm4 = vmor %vm1241_vm2, %vm1242_vm0  ;;  %vm1257_vm6 = vweird.f32 %v5185_v46 }
 0xe5b   :  { %v1238_v49 = vsub.f32 1.0, %v1237_v45  ;;  %v1185_v59 = vmul.f32 %v5187_v55, %v1183_v44  ;;  %vm1258_vm9 = vmor %vm1256_vm7, %vm1257_vm6  ;;  %vm1190_vm11 = vweird.f32 %v5187_v55 }
 0xe5c   :  { %v1253_v51 = vsub.f32 1.0, %v1252_v47  ;;  %vm1191_vm13 = vmor %vm1189_vm12, %vm1190_vm11 }
 0xe5d   :  { %v1239_v53 = vmul.f32 %v5183_v43, %v1238_v49  ;;  %v1186_v4 = vsub.f32 1.0, %v1185_v59 }
 0xe5e   :  { %v1254_v57 = vmul.f32 %v5185_v46, %v1253_v51 }
 0xe5f   :  { %v1240_v58 = vadd.f32 %v5183_v43, %v1239_v53  ;;  %v1187_v13 = vmul.f32 %v5187_v55, %v1186_v4 }
 0xe60   :  { %v1255_v0 = vadd.f32 %v5185_v46, %v1254_v57 }
 0xe61   :  { %v1244_v1 = vsel %vm1243_vm4, %v5183_v43, %v1240_v58  ;;  %v1188_v19 = vadd.f32 %v5187_v55, %v1187_v13 }
 0xe62   :  { %v1249_v10 = vsel %vm1246_vm8, %v1248_v7, %v1244_v1  ;;  %v1259_v11 = vsel %vm1258_vm9, %v5185_v46, %v1255_v0 }
 0xe63   :  { %v1264_v16 = vsel %vm1261_vm10, %v1263_v14, %v1259_v11  ;;  %v1192_v23 = vsel %vm1191_vm13, %v5187_v55, %v1188_v19  ;;  %v1274_v27 = vmul.f32 %v1270_v26, %v1249_v10 }
 0xe64   :  { %v1197_v25 = vsel %vm1194_vm14, %v1196_v6, %v1192_v23  ;;  %v1275_v33 = vmul.f32 %v1271_v21, %v1264_v16 }
 0xebf   :  { %v1279_v9 = vpop.permute.xlu0 %1278 }
 0xec0   :  { %v1284_v12 = vmul.f32 %v1279_v9, %v1249_v10  ;;  %v1281_v15 = vpop.permute.xlu1 %1280 }
 0xec1   :  { %v1285_v18 = vmul.f32 %v1281_v15, %v1264_v16 }
 0xec2   :  { %1288 = vrot.lane.b32.xlu2 %v1284_v12, %s5497_s11 }
 0xec3   :  { %1290 = vrot.lane.b32.xlu0 %v1285_v18, %s5497_s11 }
 0xec8   :  { %v1207_v24 = vpop.permute.xlu1 %1206 }
 0xec9   :  { %v1209_v17 = vmul.f32 %v1207_v24, %v1197_v25 }
 0xeca   :  { %1201 = vrot.lane.b32.xlu2 %v5895_v48, %s5497_s11 }
 0xecb   :  { %1211 = vrot.lane.b32.xlu0 %v1209_v17, %s5497_s11 }
 0xf1c   :  { %v1289_v29 = vpop.permute.xlu2 %1288 }
 0xf1d   :  { %v5947_v30 = vadd.f32 %v1289_v29, %v1274_v27 }
 0xf1f   :  { %5188 = vtanh.f32 %v5947_v30 }
 0xf24   :  { %v1202_v37 = vpop.permute.xlu2 %1201 }
 0xf25   :  { %v5189_v31 = vpop.eup %5188  ;;  %v1204_v38 = vmul.f32 %v1202_v37, %v1197_v25 }
 0xf26   :  { %1300 = vrot.lane.b32.xlu1 %v5189_v31, %s5491_s4 }
 0xf35   :  { %v1291_v48 = vpop.permute.xlu0 %1290 }
 0xf36   :  { %v5952_v36 = vadd.f32 %v1291_v48, %v1275_v33 }
 0xf38   :  { %5190 = vtanh.f32 %v5952_v36 }
 0xf3d   :  { %v1212_v61 = vpop.permute.xlu0 %1211 }
 0xf3e   :  { %v5191_v39 = vpop.eup %5190  ;;  %v5955_v40 = vadd.f32 %v1212_v61, %v1204_v38 }
 0xf3f   :  { %1302 = vrot.lane.b32.xlu2 %v5191_v39, %s5491_s4 }
 0xf40   :  { %5192 = vtanh.f32 %v5955_v40 }
 0xf46   :  { %v5193_v41 = vpop.eup %5192 }
 0xf47   :  { %1217 = vrot.lane.b32.xlu0 %v5193_v41, %s5491_s4 }
 0xf98   :  { %v1301_v56 = vpop.permute.xlu1 %1300 }
 0xf99   :  { %v1306_v52 = vmul.f32 %v1301_v56, %v1249_v10  ;;  %v1303_v43 = vpop.permute.xlu2 %1302 }
 0xf9a   :  { %v1307_v45 = vmul.f32 %v1303_v43, %v1264_v16 }
 0xf9b   :  { %v1308_v42 = vpack.c.bf16 %v1306_v52, %v1306_v52 }
 0xf9c   :  { %v1309_v46 = vpack.c.bf16 %v1307_v45, %v1307_v45 }
 0xf9d   :  { %v1312_v44 = vunpack.c.l.b16 %v1308_v42 }
 0xf9e   :  { %v1313_v49 = vunpack.c.l.b16 %v1309_v46 }
 0xf9f   :  { %v1314_v47 = vrot.slane %v1312_v44, 2 }
 0xfa0   :  { %v1315_v51 = vrot.slane %v1313_v49, 1 }
 0xfa2   :  { %v1316_v53 = vsel %vm922_vm15, %v1315_v51, %v1314_v47 }
 0xfa3   :  { %v1317_v55 = vpack.c.b16 %v1316_v53, %v1316_v53 }
 0xfa5   :  { %1318 = vrot.lane.b32.xlu1 %v1317_v55, %s5497_s11 }
 0xfb9   :  { %v1218_v57 = vpop.permute.xlu0 %1217 }
 0xfba   :  { %v1220_v58 = vmul.f32 %v1218_v57, %v1197_v25 }
 0xfbc   :  { %v1349_v59 = vpack.c.bf16 %v1220_v58, %v1220_v58 }
 0xfbe   :  { %1351 = vrot.lane.b32.xlu2 %v1349_v59, %s5497_s11 }
0x1017   :  { %v1319_v62 = vpop.permute.xlu1 %1318 }
0x1018   :  { %4416 = vmatmul.msk.bf16.vlgmr.msrb.gmra.mxu2 %vm200_vm3, %v1319_v62  ;;  %4417 = vmatmul.msk.bf16.vlgmr.msrb.gmra.mxu0 %vm200_vm3, %v1319_v62  ;;  %v1352_v63 = vpop.permute.xlu2 %1351 }
0x1019   :  { %4418 = vmatmul.msk.bf16.vlgmr.msrb.gmra.mxu1 %vm200_vm3, %v1352_v63  ;;  %1736 = vmatpush.bf16.msrb.mxu2 %v5911_v2 }
0x101a   :  { %1903 = vmatpush.bf16.msrb.mxu1 %v5848_v32  ;;  %1890 = vmatpush.bf16.msrb.mxu0 %v5837_v28 }
0x101d   :  { %1737 = vmatpush.bf16.msrb.mxu2 %v5917_v3 }
0x101e   :  { %1891 = vmatpush.bf16.msrb.mxu0 %v5857_v34  ;;  %1904 = vmatpush.bf16.msrb.mxu1 %v5861_v35 }
0x1095   :  { %v1345_v0 = vpop.f32.mrf.mxu0 }
0x1096   :  { %v1409_v1 = vrot.slane %v1345_v0, 5  ;;  %v1410_v4 = vrot.slane %v1345_v0, 6  ;;  %v1365_v5 = vpop.f32.mrf.mxu1 }
0x1098   :  { %v1413_v7 = vadd.f32 %v1409_v1, %v5810_v50  ;;  %v1414_v8 = vadd.f32 %v1410_v4, %v5813_v54 }
0x109a   :  { %5194 = vtanh.f32 %v1413_v7  ;;  %v4420_v23 = vmul.f32 -1.442695, %v1413_v7  ;;  %v4421_v6 = vmul.f32 -1.442695, %v1414_v8 }
0x109b   :  { %5196 = vtanh.f32 %v1414_v8  ;;  %v1332_v9 = vpop.f32.mrf.mxu2 }
0x109c   :  { %v1369_v10 = vadd.f32 %v1365_v5, %v1332_v9 }
0x109d   :  { %v1347_v11 = vpop.f32.mrf.mxu0 }
0x109e   :  { %v1370_v12 = vadd.f32 %v5887_v60, %v1369_v10  ;;  %v1367_v13 = vpop.f32.mrf.mxu1 }
0x10a0   :  { %v5195_v14 = vpop.eup %5194  ;;  %5198 = vtanh.f32 %v1370_v12  ;;  %v4419_v19 = vmul.f32 -1.442695, %v1370_v12 }
0x10a1   :  { %v5197_v15 = vpop.eup %5196  ;;  %1465 = vrot.lane.b32.xlu0 %v5195_v14, %s5491_s4 }
0x10a2   :  { %1467 = vrot.lane.b32.xlu1 %v5197_v15, %s5491_s4  ;;  %5200 = vpow2.f32 %v4419_v19  ;;  %v1457_v15 = vrot.slane %v5947_v30, 7 }
0x10a3   :  { %v1334_v16 = vpop.f32.mrf.mxu2 }
0x10a4   :  { %v1458_v16 = vrot.slane %v5952_v36, 7 }
0x10a6   :  { %v5199_v18 = vpop.eup %5198 }
0x10a7   :  { %1393 = vrot.lane.b32.xlu2 %v5199_v18, %s5491_s4 }
0x10a8   :  { %v5201_v20 = vpop.eup %5200 }
0x10a9   :  { %v1374_v22 = vadd.f32 1.0, %v5201_v20 }
0x10ab   :  { %5202 = vrcp.f32 %v1374_v22  ;;  %v1386_v48 = vand.u32 2147483648, %v1374_v22  ;;  %vm1380_vm2 = vweird.f32 %v1374_v22  ;;  %v1384_v37 = vand.u32 2147483647, %v1374_v22 }
0x10ac   :  { %5204 = vpow2.f32 %v4420_v23 }
0x10ad   :  { %5206 = vpow2.f32 %v4421_v6  ;;  %v1387_v41 = vor.u32 1.1754944e-38, %v1386_v48  ;;  %vm1385_vm6 = vcmp.eq.f32.partialorder %v1384_v37, 8.507059e+37 }
0x10b1   :  { %v5203_v24 = vpop.eup %5202 }
0x10b2   :  { %v1376_v25 = vmul.f32 %v5203_v24, %v1374_v22  ;;  %v5205_v17 = vpop.eup %5204  ;;  %vm1381_vm0 = vweird.f32 %v5203_v24 }
0x10b3   :  { %v5207_v26 = vpop.eup %5206  ;;  %v1421_v29 = vadd.f32 1.0, %v5205_v17  ;;  %vm1382_vm4 = vmor %vm1380_vm2, %vm1381_vm0 }
0x10b4   :  { %v1377_v27 = vsub.f32 1.0, %v1376_v25  ;;  %v1422_v31 = vadd.f32 1.0, %v5207_v26 }
0x10b5   :  { %5208 = vrcp.f32 %v1421_v29  ;;  %v1434_v55 = vand.u32 2147483648, %v1421_v29  ;;  %vm1428_vm9 = vweird.f32 %v1421_v29  ;;  %v1432_v58 = vand.u32 2147483647, %v1421_v29 }
0x10b6   :  { %v1378_v21 = vmul.f32 %v5203_v24, %v1377_v27  ;;  %5210 = vrcp.f32 %v1422_v31  ;;  %v1449_v57 = vand.u32 2147483648, %v1422_v31  ;;  %vm1443_vm10 = vweird.f32 %v1422_v31 }
0x10b7   :  { %v1447_v59 = vand.u32 2147483647, %v1422_v31  ;;  %v1435_v0 = vor.u32 1.1754944e-38, %v1434_v55  ;;  %vm1433_vm13 = vcmp.eq.f32.partialorder %v1432_v58, 8.507059e+37 }
0x10b8   :  { %v1379_v33 = vadd.f32 %v5203_v24, %v1378_v21  ;;  %v1450_v1 = vor.u32 1.1754944e-38, %v1449_v57 }
0x10b9   :  { %vm1448_vm14 = vcmp.eq.f32.partialorder %v1447_v59, 8.507059e+37 }
0x10ba   :  { %v1383_v39 = vsel %vm1382_vm4, %v5203_v24, %v1379_v33 }
0x10bb   :  { %v5209_v38 = vpop.eup %5208  ;;  %v1388_v42 = vsel %vm1385_vm6, %v1387_v41, %v1383_v39 }
0x10bc   :  { %v5211_v61 = vpop.eup %5210  ;;  %v1424_v56 = vmul.f32 %v5209_v38, %v1421_v29  ;;  %vm1429_vm7 = vweird.f32 %v5209_v38  ;;  %v1391_v11 = vmul.f32 %v1388_v42, %v5955_v40 }
0x10bd   :  { %v1439_v43 = vmul.f32 %v5211_v61, %v1422_v31  ;;  %vm1444_vm8 = vweird.f32 %v5211_v61  ;;  %vm1430_vm11 = vmor %vm1428_vm9, %vm1429_vm7 }
0x10be   :  { %v1425_v45 = vsub.f32 1.0, %v1424_v56  ;;  %vm1445_vm12 = vmor %vm1443_vm10, %vm1444_vm8 }
0x10bf   :  { %v1440_v46 = vsub.f32 1.0, %v1439_v43 }
0x10c0   :  { %v1426_v47 = vmul.f32 %v5209_v38, %v1425_v45 }
0x10c1   :  { %v1441_v49 = vmul.f32 %v5211_v61, %v1440_v46 }
0x10c2   :  { %v1427_v51 = vadd.f32 %v5209_v38, %v1426_v47 }
0x10c3   :  { %v1442_v53 = vadd.f32 %v5211_v61, %v1441_v49 }
0x10c4   :  { %v1431_v62 = vsel %vm1430_vm11, %v5209_v38, %v1427_v51 }
0x10c5   :  { %v1446_v63 = vsel %vm1445_vm12, %v5211_v61, %v1442_v53  ;;  %v1436_v5 = vsel %vm1433_vm13, %v1435_v0, %v1431_v62 }
0x10c6   :  { %v1451_v8 = vsel %vm1448_vm14, %v1450_v1, %v1446_v63  ;;  %v1461_v18 = vmul.f32 %v1457_v15, %v1436_v5 }
0x10c7   :  { %v1462_v19 = vmul.f32 %v1458_v16, %v1451_v8 }
0x1101   :  { %v1394_v52 = vpop.permute.xlu2 %1393 }
0x1102   :  { %v1396_v44 = vmul.f32 %v1394_v52, %v1388_v42 }
0x1104   :  { %1398 = vrot.lane.b32.xlu2 %v1396_v44, %s5497_s11 }
0x1113   :  { %v1466_v4 = vpop.permute.xlu0 %1465 }
0x1114   :  { %v1468_v7 = vpop.permute.xlu1 %1467  ;;  %v1471_v9 = vmul.f32 %v1466_v4, %v1436_v5 }
0x1115   :  { %v1472_v10 = vmul.f32 %v1468_v7, %v1451_v8 }
0x1116   :  { %1475 = vrot.lane.b32.xlu0 %v1471_v9, %s5497_s11 }
0x1117   :  { %1477 = vrot.lane.b32.xlu1 %v1472_v10, %s5497_s11 }
0x115e   :  { %v1399_v12 = vpop.permute.xlu2 %1398 }
0x115f   :  { %v5982_v13 = vadd.f32 %v1399_v12, %v1391_v11 }
0x1161   :  { %5212 = vtanh.f32 %v5982_v13 }
0x1167   :  { %v5213_v14 = vpop.eup %5212 }
0x1168   :  { %1404 = vrot.lane.b32.xlu2 %v5213_v14, %s5491_s4 }
0x1188   :  { %v1476_v20 = vpop.permute.xlu0 %1475 }
0x1189   :  { %v1478_v22 = vpop.permute.xlu1 %1477  ;;  %v5988_v23 = vadd.f32 %v1476_v20, %v1461_v18 }
0x118a   :  { %v5990_v6 = vadd.f32 %v1478_v22, %v1462_v19 }
0x118b   :  { %5214 = vtanh.f32 %v5988_v23 }
0x118c   :  { %5216 = vtanh.f32 %v5990_v6 }
0x1191   :  { %v5215_v40 = vpop.eup %5214 }
0x1192   :  { %v5217_v24 = vpop.eup %5216  ;;  %1487 = vrot.lane.b32.xlu0 %v5215_v40, %s5491_s4 }
0x1193   :  { %1489 = vrot.lane.b32.xlu1 %v5217_v24, %s5491_s4 }
0x11c2   :  { %v1405_v30 = vpop.permute.xlu2 %1404 }
0x11c3   :  { %v1407_v36 = vmul.f32 %v1405_v30, %v1388_v42 }
0x11c5   :  { %v1536_v25 = vpack.c.bf16 %v1407_v36, %v1407_v36 }
0x11c7   :  { %1538 = vrot.lane.b32.xlu1 %v1536_v25, %s5497_s11 }
0x1204   :  { %v1488_v17 = vpop.permute.xlu0 %1487 }
0x1205   :  { %v1490_v26 = vpop.permute.xlu1 %1489  ;;  %v1493_v27 = vmul.f32 %v1488_v17, %v1436_v5 }
0x1206   :  { %v1494_v29 = vmul.f32 %v1490_v26, %v1451_v8 }
0x1207   :  { %v1495_v31 = vpack.c.bf16 %v1493_v27, %v1493_v27 }
0x1208   :  { %v1496_v21 = vpack.c.bf16 %v1494_v29, %v1494_v29 }
0x1209   :  { %v1499_v33 = vunpack.c.l.b16 %v1495_v31 }
0x120a   :  { %v1500_v48 = vunpack.c.l.b16 %v1496_v21 }
0x120b   :  { %v1501_v37 = vrot.slane %v1499_v33, 3 }
0x120c   :  { %v1502_v38 = vrot.slane %v1500_v48, 2 }
0x120e   :  { %v1503_v61 = vsel %vm922_vm15, %v1502_v38, %v1501_v37 }
0x120f   :  { %v1504_v39 = vpack.c.b16 %v1503_v61, %v1503_v61 }
0x1211   :  { %1505 = vrot.lane.b32.xlu0 %v1504_v39, %s5497_s11 }
0x1239   :  { %v1539_v41 = vpop.permute.xlu1 %1538 }
0x123a   :  { %4424 = vmatmul.msk.bf16.vlgmr.msra.gmra.mxu0 %vm200_vm3, %v1539_v41 }
0x123b   :  { %2090 = vmatpush.bf16.msra.mxu0 %v5848_v32 }
0x123f   :  { %2091 = vmatpush.bf16.msra.mxu0 %v5861_v35 }
0x1283   :  { %v1506_v56 = vpop.permute.xlu0 %1505 }
0x1284   :  { %4422 = vmatmul.msk.bf16.vlgmr.msra.gmra.mxu3 %vm200_vm3, %v1506_v56  ;;  %4423 = vmatmul.msk.bf16.vlgmr.msra.gmra.mxu2 %vm200_vm3, %v1506_v56 }
0x1285   :  { %1923 = vmatpush.bf16.msra.mxu3 %v5911_v2  ;;  %2077 = vmatpush.bf16.msra.mxu2 %v5837_v28 }
0x1289   :  { %1924 = vmatpush.bf16.msra.mxu3 %v5917_v3  ;;  %2078 = vmatpush.bf16.msra.mxu2 %v5857_v34 }
0x12b7   :  { %v1552_v52 = vpop.f32.mrf.mxu0 }
0x12bf   :  { %v1554_v42 = vpop.f32.mrf.mxu0 }
0x1307   :  { %v1519_v43 = vpop.f32.mrf.mxu3  ;;  %v1532_v44 = vpop.f32.mrf.mxu2 }
0x1308   :  { %v1556_v32 = vadd.f32 %v1552_v52, %v1519_v43  ;;  %v1596_v45 = vrot.slane %v1532_v44, 4  ;;  %v1597_v35 = vrot.slane %v1532_v44, 5 }
0x130a   :  { %v1557_v46 = vadd.f32 %v5887_v60, %v1556_v32  ;;  %v1600_v47 = vadd.f32 %v1596_v45, %v5810_v50  ;;  %v1601_v49 = vadd.f32 %v1597_v35, %v5813_v54  ;;  %v1644_v45 = vrot.slane %v5988_v23, 7 }
0x130c   :  { %5218 = vtanh.f32 %v1557_v46  ;;  %v4426_v59 = vmul.f32 -1.442695, %v1600_v47  ;;  %v4425_v0 = vmul.f32 -1.442695, %v1557_v46  ;;  %v4427_v4 = vmul.f32 -1.442695, %v1601_v49 }
0x130d   :  { %5220 = vtanh.f32 %v1600_v47 }
0x130e   :  { %5222 = vtanh.f32 %v1601_v49 }
0x130f   :  { %v1521_v51 = vpop.f32.mrf.mxu3  ;;  %v1534_v53 = vpop.f32.mrf.mxu2  ;;  %5224 = vpow2.f32 %v4426_v59 }
0x1312   :  { %v5219_v55 = vpop.eup %5218 }
0x1313   :  { %v5221_v57 = vpop.eup %5220  ;;  %1580 = vrot.lane.b32.xlu1 %v5219_v55, %s5491_s4 }
0x1314   :  { %1652 = vrot.lane.b32.xlu2 %v5221_v57, %s5491_s4  ;;  %v5223_v58 = vpop.eup %5222  ;;  %v1645_v57 = vrot.slane %v5990_v6, 7 }
0x1315   :  { %1654 = vrot.lane.b32.xlu0 %v5223_v58, %s5491_s4  ;;  %v5225_v60 = vpop.eup %5224 }
0x1316   :  { %v1608_v62 = vadd.f32 1.0, %v5225_v60 }
0x1318   :  { %5226 = vrcp.f32 %v1608_v62  ;;  %v1621_v12 = vand.u32 2147483648, %v1608_v62  ;;  %vm1615_vm2 = vweird.f32 %v1608_v62  ;;  %v1619_v14 = vand.u32 2147483647, %v1608_v62 }
0x1319   :  { %5228 = vpow2.f32 %v4425_v0 }
0x131a   :  { %5230 = vpow2.f32 %v4427_v4  ;;  %v1622_v18 = vor.u32 1.1754944e-38, %v1621_v12  ;;  %vm1620_vm6 = vcmp.eq.f32.partialorder %v1619_v14, 8.507059e+37 }
0x131e   :  { %v5227_v63 = vpop.eup %5226 }
0x131f   :  { %v1611_v1 = vmul.f32 %v5227_v63, %v1608_v62  ;;  %v5229_v7 = vpop.eup %5228  ;;  %vm1616_vm0 = vweird.f32 %v5227_v63 }
0x1320   :  { %v1561_v9 = vadd.f32 1.0, %v5229_v7  ;;  %v5231_v10 = vpop.eup %5230  ;;  %vm1617_vm4 = vmor %vm1615_vm2, %vm1616_vm0 }
0x1321   :  { %v1612_v5 = vsub.f32 1.0, %v1611_v1  ;;  %v1609_v15 = vadd.f32 1.0, %v5231_v10 }
0x1322   :  { %5232 = vrcp.f32 %v1561_v9  ;;  %v1573_v31 = vand.u32 2147483648, %v1561_v9  ;;  %vm1567_vm8 = vweird.f32 %v1561_v9  ;;  %v1571_v21 = vand.u32 2147483647, %v1561_v9 }
0x1323   :  { %v1613_v8 = vmul.f32 %v5227_v63, %v1612_v5  ;;  %5234 = vrcp.f32 %v1609_v15  ;;  %v1636_v38 = vand.u32 2147483648, %v1609_v15  ;;  %vm1630_vm12 = vweird.f32 %v1609_v15 }
0x1324   :  { %v1574_v37 = vor.u32 1.1754944e-38, %v1573_v31  ;;  %vm1572_vm11 = vcmp.eq.f32.partialorder %v1571_v21, 8.507059e+37  ;;  %v1634_v61 = vand.u32 2147483647, %v1609_v15 }
0x1325   :  { %v1614_v11 = vadd.f32 %v5227_v63, %v1613_v8  ;;  %v1637_v42 = vor.u32 1.1754944e-38, %v1636_v38 }
0x1326   :  { %vm1635_vm14 = vcmp.eq.f32.partialorder %v1634_v61, 8.507059e+37 }
0x1327   :  { %v1618_v16 = vsel %vm1617_vm4, %v5227_v63, %v1614_v11 }
0x1328   :  { %v1623_v19 = vsel %vm1620_vm6, %v1622_v18, %v1618_v16  ;;  %v5233_v22 = vpop.eup %5232 }
0x1329   :  { %v1563_v24 = vmul.f32 %v5233_v22, %v1561_v9  ;;  %v5235_v30 = vpop.eup %5234  ;;  %vm1568_vm7 = vweird.f32 %v5233_v22  ;;  %v1648_v35 = vmul.f32 %v1644_v45, %v1623_v19 }
0x132a   :  { %v1626_v25 = vmul.f32 %v5235_v30, %v1609_v15  ;;  %vm1569_vm9 = vmor %vm1567_vm8, %vm1568_vm7  ;;  %vm1631_vm10 = vweird.f32 %v5235_v30 }
0x132b   :  { %v1564_v36 = vsub.f32 1.0, %v1563_v24  ;;  %vm1632_vm13 = vmor %vm1630_vm12, %vm1631_vm10 }
0x132c   :  { %v1627_v26 = vsub.f32 1.0, %v1626_v25 }
0x132d   :  { %v1565_v17 = vmul.f32 %v5233_v22, %v1564_v36 }
0x132e   :  { %v1628_v29 = vmul.f32 %v5235_v30, %v1627_v26 }
0x132f   :  { %v1566_v27 = vadd.f32 %v5233_v22, %v1565_v17 }
0x1330   :  { %v1629_v48 = vadd.f32 %v5235_v30, %v1628_v29 }
0x1331   :  { %v1570_v33 = vsel %vm1569_vm9, %v5233_v22, %v1566_v27 }
0x1332   :  { %v1575_v41 = vsel %vm1572_vm11, %v1574_v37, %v1570_v33  ;;  %v1633_v52 = vsel %vm1632_vm13, %v5235_v30, %v1629_v48 }
0x1333   :  { %v1638_v44 = vsel %vm1635_vm14, %v1637_v42, %v1633_v52  ;;  %v1578_v51 = vmul.f32 %v1575_v41, %v5982_v13 }
0x1334   :  { %v1649_v58 = vmul.f32 %v1645_v57, %v1638_v44 }
0x136e   :  { %v1653_v20 = vpop.permute.xlu2 %1652 }
0x136f   :  { %v1658_v40 = vmul.f32 %v1653_v20, %v1623_v19 }
0x1371   :  { %1662 = vrot.lane.b32.xlu2 %v1658_v40, %s5497_s11 }
0x1385   :  { %v1581_v39 = vpop.permute.xlu1 %1580 }
0x1386   :  { %v1583_v56 = vmul.f32 %v1581_v39, %v1575_v41 }
0x1387   :  { %v1655_v43 = vpop.permute.xlu0 %1654 }
0x1388   :  { %1585 = vrot.lane.b32.xlu1 %v1583_v56, %s5497_s11  ;;  %v1659_v32 = vmul.f32 %v1655_v43, %v1638_v44 }
0x138a   :  { %1664 = vrot.lane.b32.xlu0 %v1659_v32, %s5497_s11 }
0x13cb   :  { %v1663_v46 = vpop.permute.xlu2 %1662 }
0x13cc   :  { %v6018_v47 = vadd.f32 %v1663_v46, %v1648_v35 }
0x13ce   :  { %5236 = vtanh.f32 %v6018_v47 }
0x13d4   :  { %v5237_v49 = vpop.eup %5236 }
0x13d5   :  { %1674 = vrot.lane.b32.xlu2 %v5237_v49, %s5491_s4 }
0x13fa   :  { %v1586_v53 = vpop.permute.xlu1 %1585 }
0x13fb   :  { %v6023_v55 = vadd.f32 %v1586_v53, %v1578_v51 }
0x13fc   :  { %v1665_v23 = vpop.permute.xlu0 %1664 }
0x13fd   :  { %5238 = vtanh.f32 %v6023_v55  ;;  %v6027_v59 = vadd.f32 %v1665_v23, %v1649_v58 }
0x13ff   :  { %5240 = vtanh.f32 %v6027_v59 }
0x1403   :  { %v5239_v60 = vpop.eup %5238 }
0x1404   :  { %1591 = vrot.lane.b32.xlu1 %v5239_v60, %s5491_s4 }
0x1405   :  { %v5241_v62 = vpop.eup %5240 }
0x1406   :  { %1676 = vrot.lane.b32.xlu0 %v5241_v62, %s5491_s4 }
0x142f   :  { %v1675_v13 = vpop.permute.xlu2 %1674 }
0x1430   :  { %v1680_v63 = vmul.f32 %v1675_v13, %v1623_v19 }
0x1432   :  { %v1682_v6 = vpack.c.bf16 %v1680_v63, %v1680_v63 }
0x1434   :  { %v1686_v8 = vunpack.c.l.b16 %v1682_v6 }
0x1436   :  { %v1688_v11 = vrot.slane %v1686_v8, 4 }
0x1476   :  { %v1592_v0 = vpop.permute.xlu1 %1591 }
0x1477   :  { %v1594_v1 = vmul.f32 %v1592_v0, %v1575_v41 }
0x1478   :  { %v1677_v5 = vpop.permute.xlu0 %1676 }
0x1479   :  { %v1723_v4 = vpack.c.bf16 %v1594_v1, %v1594_v1  ;;  %v1681_v7 = vmul.f32 %v1677_v5, %v1638_v44 }
0x147b   :  { %1725 = vrot.lane.b32.xlu0 %v1723_v4, %s5497_s11  ;;  %v1683_v9 = vpack.c.bf16 %v1681_v7, %v1681_v7 }
0x147d   :  { %v1687_v10 = vunpack.c.l.b16 %v1683_v9 }
0x147f   :  { %v1689_v12 = vrot.slane %v1687_v10, 3 }
0x1481   :  { %v1690_v14 = vsel %vm922_vm15, %v1689_v12, %v1688_v11 }
0x1482   :  { %v1691_v15 = vpack.c.b16 %v1690_v14, %v1690_v14 }
0x1484   :  { %1692 = vrot.lane.b32.xlu2 %v1691_v15, %s5497_s11 }
0x14de   :  { %v1693_v16 = vpop.permute.xlu2 %1692 }
0x14df   :  { %4428 = vmatmul.msk.bf16.vlgmr.msra.gmra.mxu1 %vm200_vm3, %v1693_v16  ;;  %4429 = vmatmul.msk.bf16.vlgmr.msrb.gmra.mxu3 %vm200_vm3, %v1693_v16 }
0x14e0   :  { %2110 = vmatpush.bf16.msra.mxu1 %v5911_v2  ;;  %2264 = vmatpush.bf16.msrb.mxu3 %v5837_v28 }
0x14e4   :  { %2111 = vmatpush.bf16.msra.mxu1 %v5917_v3  ;;  %2265 = vmatpush.bf16.msrb.mxu3 %v5857_v34 }
0x14ed   :  { %v1726_v18 = vpop.permute.xlu0 %1725 }
0x14ee   :  { %4430 = vmatmul.msk.bf16.vlgmr.msrb.gmra.mxu2 %vm200_vm3, %v1726_v18 }
0x14ef   :  { %2284 = vmatpush.bf16.msrb.mxu2 %v5911_v2 }
0x14f3   :  { %2285 = vmatpush.bf16.msrb.mxu2 %v5917_v3  ;;  %v6051_v3 = vld [vmem:[%s6505_s13] ss:$0 sm:$0xff] }
0x155c   :  { %v1706_v19 = vpop.f32.mrf.mxu1 }
0x1562   :  { %v1719_v20 = vpop.f32.mrf.mxu3 }
0x1563   :  { %v1783_v22 = vrot.slane %v1719_v20, 3  ;;  %v1784_v40 = vrot.slane %v1719_v20, 4 }
0x1564   :  { %v1708_v24 = vpop.f32.mrf.mxu1 }
0x1565   :  { %v1787_v30 = vadd.f32 %v1783_v22, %v5810_v50  ;;  %v1788_v28 = vadd.f32 %v1784_v40, %v5813_v54  ;;  %v1832_v22 = vrot.slane %v6027_v59, 7 }
0x1567   :  { %5242 = vtanh.f32 %v1787_v30  ;;  %v4433_v31 = vmul.f32 -1.442695, %v1788_v28  ;;  %v4432_v48 = vmul.f32 -1.442695, %v1787_v30 }
0x1568   :  { %5244 = vtanh.f32 %v1788_v28 }
0x156a   :  { %v1721_v36 = vpop.f32.mrf.mxu3 }
0x156b   :  { %v1831_v36 = vrot.slane %v6018_v47, 7 }
0x156d   :  { %v5243_v34 = vpop.eup %5242 }
0x156e   :  { %v5245_v25 = vpop.eup %5244  ;;  %1839 = vrot.lane.b32.xlu1 %v5243_v34, %s5491_s4 }
0x156f   :  { %1841 = vrot.lane.b32.xlu2 %v5245_v25, %s5491_s4 }
0x1571   :  { %v1739_v17 = vpop.f32.mrf.mxu2 }
0x1572   :  { %v1743_v2 = vadd.f32 %v1739_v17, %v1706_v19 }
0x1574   :  { %v1744_v26 = vadd.f32 %v6051_v3, %v1743_v2 }
0x1576   :  { %5246 = vtanh.f32 %v1744_v26  ;;  %v4431_v52 = vmul.f32 -1.442695, %v1744_v26 }
0x1577   :  { %5248 = vpow2.f32 %v4433_v31 }
0x1579   :  { %v1741_v27 = vpop.f32.mrf.mxu2 }
0x157c   :  { %v5247_v29 = vpop.eup %5246 }
0x157d   :  { %1767 = vrot.lane.b32.xlu0 %v5247_v29, %s5491_s4  ;;  %v5249_v21 = vpop.eup %5248 }
0x157e   :  { %v1796_v33 = vadd.f32 1.0, %v5249_v21 }
0x1580   :  { %5250 = vrcp.f32 %v1796_v33  ;;  %v1823_v43 = vand.u32 2147483648, %v1796_v33  ;;  %vm1817_vm2 = vweird.f32 %v1796_v33  ;;  %v1821_v44 = vand.u32 2147483647, %v1796_v33 }
0x1581   :  { %5252 = vpow2.f32 %v4432_v48 }
0x1582   :  { %v1824_v45 = vor.u32 1.1754944e-38, %v1823_v43  ;;  %vm1822_vm6 = vcmp.eq.f32.partialorder %v1821_v44, 8.507059e+37 }
0x1586   :  { %v5251_v37 = vpop.eup %5250 }
0x1587   :  { %v1813_v38 = vmul.f32 %v5251_v37, %v1796_v33  ;;  %v5253_v39 = vpop.eup %5252  ;;  %vm1818_vm0 = vweird.f32 %v5251_v37 }
0x1588   :  { %v1795_v56 = vadd.f32 1.0, %v5253_v39  ;;  %vm1819_vm4 = vmor %vm1817_vm2, %vm1818_vm0 }
0x1589   :  { %v1814_v61 = vsub.f32 1.0, %v1813_v38 }
0x158a   :  { %5254 = vrcp.f32 %v1795_v56  ;;  %v1808_v63 = vand.u32 2147483648, %v1795_v56  ;;  %vm1802_vm8 = vweird.f32 %v1795_v56  ;;  %v1806_v1 = vand.u32 2147483647, %v1795_v56 }
0x158b   :  { %v1815_v41 = vmul.f32 %v5251_v37, %v1814_v61  ;;  %5256 = vpow2.f32 %v4431_v52 }
0x158c   :  { %v1809_v6 = vor.u32 1.1754944e-38, %v1808_v63  ;;  %vm1807_vm10 = vcmp.eq.f32.partialorder %v1806_v1, 8.507059e+37 }
0x158d   :  { %v1816_v42 = vadd.f32 %v5251_v37, %v1815_v41 }
0x158f   :  { %v1820_v32 = vsel %vm1819_vm4, %v5251_v37, %v1816_v42 }
0x1590   :  { %v5255_v35 = vpop.eup %5254  ;;  %v1825_v49 = vsel %vm1822_vm6, %v1824_v45, %v1820_v32 }
0x1591   :  { %v5257_v51 = vpop.eup %5256  ;;  %v1798_v58 = vmul.f32 %v5255_v35, %v1795_v56  ;;  %vm1803_vm7 = vweird.f32 %v5255_v35  ;;  %v1836_v40 = vmul.f32 %v1832_v22, %v1825_v49 }
0x1592   :  { %v1748_v57 = vadd.f32 1.0, %v5257_v51  ;;  %vm1804_vm9 = vmor %vm1802_vm8, %vm1803_vm7 }
0x1593   :  { %v1799_v23 = vsub.f32 1.0, %v1798_v58 }
0x1594   :  { %5258 = vrcp.f32 %v1748_v57  ;;  %v1760_v12 = vand.u32 2147483648, %v1748_v57  ;;  %vm1754_vm12 = vweird.f32 %v1748_v57  ;;  %v1758_v14 = vand.u32 2147483647, %v1748_v57 }
0x1595   :  { %v1800_v60 = vmul.f32 %v5255_v35, %v1799_v23 }
0x1596   :  { %v1761_v16 = vor.u32 1.1754944e-38, %v1760_v12  ;;  %vm1759_vm14 = vcmp.eq.f32.partialorder %v1758_v14, 8.507059e+37 }
0x1597   :  { %v1801_v13 = vadd.f32 %v5255_v35, %v1800_v60 }
0x1599   :  { %v1805_v4 = vsel %vm1804_vm9, %v5255_v35, %v1801_v13 }
0x159a   :  { %v5259_v62 = vpop.eup %5258  ;;  %v1810_v8 = vsel %vm1807_vm10, %v1809_v6, %v1805_v4 }
0x159b   :  { %v1750_v0 = vmul.f32 %v5259_v62, %v1748_v57  ;;  %vm1755_vm11 = vweird.f32 %v5259_v62  ;;  %v1835_v34 = vmul.f32 %v1831_v36, %v1810_v8 }
0x159c   :  { %vm1756_vm13 = vmor %vm1754_vm12, %vm1755_vm11 }
0x159d   :  { %v1751_v5 = vsub.f32 1.0, %v1750_v0 }
0x159f   :  { %v1752_v10 = vmul.f32 %v5259_v62, %v1751_v5 }
0x15a1   :  { %v1753_v11 = vadd.f32 %v5259_v62, %v1752_v10 }
0x15a3   :  { %v1757_v15 = vsel %vm1756_vm13, %v5259_v62, %v1753_v11 }
0x15a4   :  { %v1762_v19 = vsel %vm1759_vm14, %v1761_v16, %v1757_v15 }
0x15a5   :  { %v1765_v59 = vmul.f32 %v1762_v19, %v6023_v55 }
0x15c9   :  { %v1842_v46 = vpop.permute.xlu2 %1841 }
0x15ca   :  { %v1846_v53 = vmul.f32 %v1842_v46, %v1825_v49 }
0x15cc   :  { %1851 = vrot.lane.b32.xlu2 %v1846_v53, %s5497_s11 }
0x15e0   :  { %v1840_v7 = vpop.permute.xlu1 %1839 }
0x15e1   :  { %v1845_v9 = vmul.f32 %v1840_v7, %v1810_v8 }
0x15e3   :  { %1849 = vrot.lane.b32.xlu1 %v1845_v9, %s5497_s11 }
0x15ef   :  { %v1768_v18 = vpop.permute.xlu0 %1767 }
0x15f0   :  { %v1770_v20 = vmul.f32 %v1768_v18, %v1762_v19 }
0x15f2   :  { %1772 = vrot.lane.b32.xlu0 %v1770_v20, %s5497_s11 }
0x1626   :  { %v1852_v24 = vpop.permute.xlu2 %1851 }
0x1627   :  { %v6059_v30 = vadd.f32 %v1852_v24, %v1836_v40 }
0x1629   :  { %5260 = vtanh.f32 %v6059_v30 }
0x162f   :  { %v5261_v28 = vpop.eup %5260 }
0x1630   :  { %1863 = vrot.lane.b32.xlu2 %v5261_v28, %s5491_s4 }
0x1655   :  { %v1850_v25 = vpop.permute.xlu1 %1849 }
0x1656   :  { %v6064_v17 = vadd.f32 %v1850_v25, %v1835_v34 }
0x1658   :  { %5262 = vtanh.f32 %v6064_v17 }
0x165e   :  { %v5263_v2 = vpop.eup %5262 }
0x165f   :  { %1861 = vrot.lane.b32.xlu1 %v5263_v2, %s5491_s4 }
0x1664   :  { %v1773_v26 = vpop.permute.xlu0 %1772 }
0x1665   :  { %v6069_v27 = vadd.f32 %v1773_v26, %v1765_v59 }
0x1667   :  { %5264 = vtanh.f32 %v6069_v27 }
0x166d   :  { %v5265_v29 = vpop.eup %5264 }
0x166e   :  { %1778 = vrot.lane.b32.xlu0 %v5265_v29, %s5491_s4 }
0x168a   :  { %v1864_v47 = vpop.permute.xlu2 %1863 }
0x168b   :  { %v1868_v31 = vmul.f32 %v1864_v47, %v1825_v49 }
0x168d   :  { %v1870_v21 = vpack.c.bf16 %v1868_v31, %v1868_v31 }
0x168f   :  { %v1874_v37 = vunpack.c.l.b16 %v1870_v21 }
0x1691   :  { %v1876_v39 = vrot.slane %v1874_v37, 4 }
0x16d1   :  { %v1862_v33 = vpop.permute.xlu1 %1861 }
0x16d2   :  { %v1867_v48 = vmul.f32 %v1862_v33, %v1810_v8 }
0x16d4   :  { %v1869_v38 = vpack.c.bf16 %v1867_v48, %v1867_v48 }
0x16d6   :  { %v1873_v61 = vunpack.c.l.b16 %v1869_v38 }
0x16d8   :  { %v1875_v41 = vrot.slane %v1873_v61, 5 }
0x16da   :  { %v1877_v55 = vsel %vm922_vm15, %v1876_v39, %v1875_v41 }
0x16db   :  { %v1878_v56 = vpack.c.b16 %v1877_v55, %v1877_v55 }
0x16dd   :  { %1879 = vrot.lane.b32.xlu1 %v1878_v56, %s5497_s11 }
0x16e0   :  { %v1779_v52 = vpop.permute.xlu0 %1778 }
0x16e1   :  { %v1781_v42 = vmul.f32 %v1779_v52, %v1762_v19 }
0x16e3   :  { %v1910_v43 = vpack.c.bf16 %v1781_v42, %v1781_v42 }
0x16e5   :  { %1912 = vrot.lane.b32.xlu2 %v1910_v43, %s5497_s11 }
0x173f   :  { %v1913_v44 = vpop.permute.xlu2 %1912 }
0x1740   :  { %4436 = vmatmul.msk.bf16.vlgmr.msra.gmra.mxu3 %vm200_vm3, %v1913_v44 }
0x174f   :  { %v1880_v32 = vpop.permute.xlu1 %1879 }
0x1750   :  { %4434 = vmatmul.msk.bf16.vlgmr.msrb.gmra.mxu0 %vm200_vm3, %v1880_v32  ;;  %4435 = vmatmul.msk.bf16.vlgmr.msrb.gmra.mxu1 %vm200_vm3, %v1880_v32 }
0x17c3   :  { %v1926_v45 = vpop.f32.mrf.mxu3 }
0x17cb   :  { %v1928_v35 = vpop.f32.mrf.mxu3 }
0x17cd   :  { %v1893_v46 = vpop.f32.mrf.mxu0  ;;  %v1906_v49 = vpop.f32.mrf.mxu1 }
0x17ce   :  { %v1930_v51 = vadd.f32 %v1926_v45, %v1893_v46  ;;  %v1970_v53 = vrot.slane %v1906_v49, 2  ;;  %v1971_v57 = vrot.slane %v1906_v49, 3 }
0x17d0   :  { %v1931_v58 = vadd.f32 %v6051_v3, %v1930_v51  ;;  %v1974_v23 = vadd.f32 %v1970_v53, %v5810_v50  ;;  %v1975_v60 = vadd.f32 %v1971_v57, %v5813_v54  ;;  %v2018_v57 = vrot.slane %v6064_v17, 7 }
0x17d2   :  { %5266 = vtanh.f32 %v1931_v58  ;;  %v4437_v4 = vmul.f32 -1.442695, %v1931_v58  ;;  %v4438_v8 = vmul.f32 -1.442695, %v1974_v23  ;;  %v4439_v10 = vmul.f32 -1.442695, %v1975_v60 }
0x17d3   :  { %5268 = vtanh.f32 %v1974_v23 }
0x17d4   :  { %5270 = vtanh.f32 %v1975_v60  ;;  %v2019_v60 = vrot.slane %v6059_v30, 7 }
0x17d5   :  { %v1895_v62 = vpop.f32.mrf.mxu0  ;;  %v1908_v13 = vpop.f32.mrf.mxu1  ;;  %5272 = vpow2.f32 %v4437_v4 }
0x17d8   :  { %v5267_v63 = vpop.eup %5266 }
0x17d9   :  { %v5269_v0 = vpop.eup %5268  ;;  %1954 = vrot.lane.b32.xlu2 %v5267_v63, %s5491_s4 }
0x17da   :  { %2026 = vrot.lane.b32.xlu0 %v5269_v0, %s5491_s4  ;;  %v5271_v1 = vpop.eup %5270 }
0x17db   :  { %2028 = vrot.lane.b32.xlu1 %v5271_v1, %s5491_s4  ;;  %v5273_v6 = vpop.eup %5272 }
0x17dc   :  { %v1935_v5 = vadd.f32 1.0, %v5273_v6 }
0x17de   :  { %5274 = vrcp.f32 %v1935_v5  ;;  %v1947_v19 = vand.u32 2147483648, %v1935_v5  ;;  %vm1941_vm2 = vweird.f32 %v1935_v5  ;;  %v1945_v20 = vand.u32 2147483647, %v1935_v5 }
0x17df   :  { %5276 = vpow2.f32 %v4438_v8 }
0x17e0   :  { %5278 = vpow2.f32 %v4439_v10  ;;  %v1948_v24 = vor.u32 1.1754944e-38, %v1947_v19  ;;  %vm1946_vm6 = vcmp.eq.f32.partialorder %v1945_v20, 8.507059e+37 }
0x17e4   :  { %v5275_v7 = vpop.eup %5274 }
0x17e5   :  { %v1937_v9 = vmul.f32 %v5275_v7, %v1935_v5  ;;  %v5277_v14 = vpop.eup %5276  ;;  %vm1942_vm0 = vweird.f32 %v5275_v7 }
0x17e6   :  { %v1982_v15 = vadd.f32 1.0, %v5277_v14  ;;  %v5279_v18 = vpop.eup %5278  ;;  %vm1943_vm4 = vmor %vm1941_vm2, %vm1942_vm0 }
0x17e7   :  { %v1938_v11 = vsub.f32 1.0, %v1937_v9  ;;  %v1983_v22 = vadd.f32 1.0, %v5279_v18 }
0x17e8   :  { %5280 = vrcp.f32 %v1982_v15  ;;  %v1995_v48 = vand.u32 2147483648, %v1982_v15  ;;  %vm1989_vm8 = vweird.f32 %v1982_v15  ;;  %v1993_v37 = vand.u32 2147483647, %v1982_v15 }
0x17e9   :  { %v1939_v12 = vmul.f32 %v5275_v7, %v1938_v11  ;;  %5282 = vrcp.f32 %v1983_v22  ;;  %v2010_v39 = vand.u32 2147483648, %v1983_v22  ;;  %vm2004_vm11 = vweird.f32 %v1983_v22 }
0x17ea   :  { %v1996_v41 = vor.u32 1.1754944e-38, %v1995_v48  ;;  %v2008_v55 = vand.u32 2147483647, %v1983_v22  ;;  %vm1994_vm12 = vcmp.eq.f32.partialorder %v1993_v37, 8.507059e+37 }
0x17eb   :  { %v1940_v16 = vadd.f32 %v5275_v7, %v1939_v12  ;;  %v2011_v44 = vor.u32 1.1754944e-38, %v2010_v39 }
0x17ec   :  { %vm2009_vm14 = vcmp.eq.f32.partialorder %v2008_v55, 8.507059e+37 }
0x17ed   :  { %v1944_v40 = vsel %vm1943_vm4, %v5275_v7, %v1940_v16 }
0x17ee   :  { %v1949_v36 = vsel %vm1946_vm6, %v1948_v24, %v1944_v40  ;;  %v5281_v25 = vpop.eup %5280 }
0x17ef   :  { %v1985_v2 = vmul.f32 %v5281_v25, %v1982_v15  ;;  %v5283_v59 = vpop.eup %5282  ;;  %vm1990_vm7 = vweird.f32 %v5281_v25  ;;  %v1952_v46 = vmul.f32 %v1949_v36, %v6069_v27 }
0x17f0   :  { %v2000_v26 = vmul.f32 %v5283_v59, %v1983_v22  ;;  %vm1991_vm9 = vmor %vm1989_vm8, %vm1990_vm7  ;;  %vm2005_vm10 = vweird.f32 %v5283_v59 }
0x17f1   :  { %v1986_v29 = vsub.f32 1.0, %v1985_v2  ;;  %vm2006_vm13 = vmor %vm2004_vm11, %vm2005_vm10 }
0x17f2   :  { %v2001_v47 = vsub.f32 1.0, %v2000_v26 }
0x17f3   :  { %v1987_v31 = vmul.f32 %v5281_v25, %v1986_v29 }
0x17f4   :  { %v2002_v21 = vmul.f32 %v5283_v59, %v2001_v47 }
0x17f5   :  { %v1988_v33 = vadd.f32 %v5281_v25, %v1987_v31 }
0x17f6   :  { %v2003_v38 = vadd.f32 %v5283_v59, %v2002_v21 }
0x17f7   :  { %v1992_v61 = vsel %vm1991_vm9, %v5281_v25, %v1988_v33 }
0x17f8   :  { %v1997_v52 = vsel %vm1994_vm12, %v1996_v41, %v1992_v61  ;;  %v2007_v42 = vsel %vm2006_vm13, %v5283_v59, %v2003_v38 }
0x17f9   :  { %v2012_v45 = vsel %vm2009_vm14, %v2011_v44, %v2007_v42  ;;  %v2022_v58 = vmul.f32 %v2018_v57, %v1997_v52 }
0x17fa   :  { %v2023_v13 = vmul.f32 %v2019_v60, %v2012_v45 }
0x1833   :  { %v1955_v28 = vpop.permute.xlu2 %1954 }
0x1834   :  { %v1957_v34 = vmul.f32 %v1955_v28, %v1949_v36 }
0x1836   :  { %1959 = vrot.lane.b32.xlu2 %v1957_v34, %s5497_s11 }
0x184c   :  { %v2027_v56 = vpop.permute.xlu0 %2026 }
0x184d   :  { %v2032_v43 = vmul.f32 %v2027_v56, %v1997_v52  ;;  %v2029_v32 = vpop.permute.xlu1 %2028 }
0x184e   :  { %v2033_v35 = vmul.f32 %v2029_v32, %v2012_v45 }
0x184f   :  { %2036 = vrot.lane.b32.xlu0 %v2032_v43, %s5497_s11 }
0x1850   :  { %2038 = vrot.lane.b32.xlu1 %v2033_v35, %s5497_s11 }
0x1890   :  { %v1960_v49 = vpop.permute.xlu2 %1959 }
0x1891   :  { %v6089_v51 = vadd.f32 %v1960_v49, %v1952_v46 }
0x1893   :  { %5284 = vtanh.f32 %v6089_v51 }
0x1899   :  { %v5285_v53 = vpop.eup %5284 }
0x189a   :  { %1965 = vrot.lane.b32.xlu2 %v5285_v53, %s5491_s4 }
0x18c1   :  { %v2037_v23 = vpop.permute.xlu0 %2036 }
0x18c2   :  { %v6095_v62 = vadd.f32 %v2037_v23, %v2022_v58  ;;  %v2039_v27 = vpop.permute.xlu1 %2038 }
0x18c3   :  { %v6098_v63 = vadd.f32 %v2039_v27, %v2023_v13 }
0x18c4   :  { %5286 = vtanh.f32 %v6095_v62 }
0x18c5   :  { %5288 = vtanh.f32 %v6098_v63 }
0x18ca   :  { %v5287_v0 = vpop.eup %5286 }
0x18cb   :  { %2048 = vrot.lane.b32.xlu0 %v5287_v0, %s5491_s4  ;;  %v5289_v1 = vpop.eup %5288 }
0x18cc   :  { %2050 = vrot.lane.b32.xlu1 %v5289_v1, %s5491_s4 }
0x18f4   :  { %v1966_v17 = vpop.permute.xlu2 %1965 }
0x18f5   :  { %v1968_v4 = vmul.f32 %v1966_v17, %v1949_v36 }
0x18f7   :  { %v2097_v6 = vpack.c.bf16 %v1968_v4, %v1968_v4 }
0x18f9   :  { %2099 = vrot.lane.b32.xlu1 %v2097_v6, %s5497_s11 }
0x193d   :  { %v2049_v30 = vpop.permute.xlu0 %2048 }
0x193e   :  { %v2054_v5 = vmul.f32 %v2049_v30, %v1997_v52  ;;  %v2051_v8 = vpop.permute.xlu1 %2050 }
0x193f   :  { %v2055_v9 = vmul.f32 %v2051_v8, %v2012_v45 }
0x1940   :  { %v2056_v7 = vpack.c.bf16 %v2054_v5, %v2054_v5 }
0x1941   :  { %v2057_v11 = vpack.c.bf16 %v2055_v9, %v2055_v9 }
0x1942   :  { %v2060_v10 = vunpack.c.l.b16 %v2056_v7 }
0x1943   :  { %v2061_v12 = vunpack.c.l.b16 %v2057_v11 }
0x1944   :  { %v2062_v14 = vrot.slane %v2060_v10, 6 }
0x1945   :  { %v2063_v15 = vrot.slane %v2061_v12, 5 }
0x1947   :  { %v2064_v16 = vsel %vm922_vm15, %v2063_v15, %v2062_v14 }
0x1948   :  { %v2065_v18 = vpack.c.b16 %v2064_v16, %v2064_v16 }
0x194a   :  { %2066 = vrot.lane.b32.xlu0 %v2065_v18, %s5497_s11 }
0x196b   :  { %v2100_v19 = vpop.permute.xlu1 %2099 }
0x196c   :  { %4442 = vmatmul.msk.bf16.vlgmr.msra.gmra.mxu1 %vm200_vm3, %v2100_v19 }
0x19bc   :  { %v2067_v20 = vpop.permute.xlu0 %2066 }
0x19bd   :  { %4440 = vmatmul.msk.bf16.vlgmr.msra.gmra.mxu2 %vm200_vm3, %v2067_v20  ;;  %4441 = vmatmul.msk.bf16.vlgmr.msra.gmra.mxu0 %vm200_vm3, %v2067_v20 }
0x19e9   :  { %v2113_v22 = vpop.f32.mrf.mxu1 }
0x19f1   :  { %v2115_v40 = vpop.f32.mrf.mxu1 }
0x1a3a   :  { %v2093_v24 = vpop.f32.mrf.mxu0 }
0x1a3b   :  { %v2157_v28 = vrot.slane %v2093_v24, 1  ;;  %v2158_v36 = vrot.slane %v2093_v24, 2 }
0x1a3d   :  { %v2161_v34 = vadd.f32 %v2157_v28, %v5810_v50  ;;  %v2162_v25 = vadd.f32 %v2158_v36, %v5813_v54 }
0x1a3f   :  { %5290 = vtanh.f32 %v2161_v34  ;;  %v4444_v50 = vmul.f32 -1.442695, %v2161_v34  ;;  %v4445_v38 = vmul.f32 -1.442695, %v2162_v25  ;;  %v2206_v34 = vrot.slane %v6098_v63, 7 }
0x1a40   :  { %5292 = vtanh.f32 %v2162_v25  ;;  %v2080_v2 = vpop.f32.mrf.mxu2 }
0x1a41   :  { %v2117_v59 = vadd.f32 %v2113_v22, %v2080_v2  ;;  %v2205_v22 = vrot.slane %v6095_v62, 7 }
0x1a42   :  { %v2095_v26 = vpop.f32.mrf.mxu0 }
0x1a43   :  { %v2118_v29 = vadd.f32 %v6051_v3, %v2117_v59 }
0x1a45   :  { %v5291_v47 = vpop.eup %5290  ;;  %5294 = vtanh.f32 %v2118_v29  ;;  %v4443_v39 = vmul.f32 -1.442695, %v2118_v29 }
0x1a46   :  { %v5293_v31 = vpop.eup %5292  ;;  %2213 = vrot.lane.b32.xlu2 %v5291_v47, %s5491_s4  ;;  %5296 = vpow2.f32 %v4444_v50 }
0x1a47   :  { %2215 = vrot.lane.b32.xlu0 %v5293_v31, %s5491_s4 }
0x1a48   :  { %v2082_v21 = vpop.f32.mrf.mxu2 }
0x1a4b   :  { %v5295_v33 = vpop.eup %5294 }
0x1a4c   :  { %2141 = vrot.lane.b32.xlu1 %v5295_v33, %s5491_s4  ;;  %v5297_v54 = vpop.eup %5296 }
0x1a4d   :  { %v2169_v48 = vadd.f32 1.0, %v5297_v54 }
0x1a4f   :  { %5298 = vrcp.f32 %v2169_v48  ;;  %v2182_v43 = vand.u32 2147483648, %v2169_v48  ;;  %vm2176_vm2 = vweird.f32 %v2169_v48  ;;  %v2180_v32 = vand.u32 2147483647, %v2169_v48 }
0x1a50   :  { %5300 = vpow2.f32 %v4445_v38 }
0x1a51   :  { %5302 = vpow2.f32 %v4443_v39  ;;  %v2183_v46 = vor.u32 1.1754944e-38, %v2182_v43  ;;  %vm2181_vm6 = vcmp.eq.f32.partialorder %v2180_v32, 8.507059e+37 }
0x1a55   :  { %v5299_v37 = vpop.eup %5298 }
0x1a56   :  { %v2172_v61 = vmul.f32 %v5299_v37, %v2169_v48  ;;  %v5301_v56 = vpop.eup %5300  ;;  %vm2177_vm0 = vweird.f32 %v5299_v37 }
0x1a57   :  { %v2170_v52 = vadd.f32 1.0, %v5301_v56  ;;  %v5303_v44 = vpop.eup %5302  ;;  %vm2178_vm4 = vmor %vm2176_vm2, %vm2177_vm0 }
0x1a58   :  { %v2173_v41 = vsub.f32 1.0, %v2172_v61  ;;  %v2122_v35 = vadd.f32 1.0, %v5303_v44 }
0x1a59   :  { %5304 = vrcp.f32 %v2170_v52  ;;  %v2197_v4 = vand.u32 2147483648, %v2170_v52  ;;  %vm2191_vm8 = vweird.f32 %v2170_v52  ;;  %v2195_v30 = vand.u32 2147483647, %v2170_v52 }
0x1a5a   :  { %v2174_v55 = vmul.f32 %v5299_v37, %v2173_v41  ;;  %5306 = vrcp.f32 %v2122_v35  ;;  %v2134_v9 = vand.u32 2147483648, %v2122_v35  ;;  %vm2128_vm12 = vweird.f32 %v2122_v35 }
0x1a5b   :  { %v2198_v7 = vor.u32 1.1754944e-38, %v2197_v4  ;;  %vm2196_vm11 = vcmp.eq.f32.partialorder %v2195_v30, 8.507059e+37  ;;  %v2132_v12 = vand.u32 2147483647, %v2122_v35 }
0x1a5c   :  { %v2175_v42 = vadd.f32 %v5299_v37, %v2174_v55  ;;  %v2135_v16 = vor.u32 1.1754944e-38, %v2134_v9 }
0x1a5d   :  { %vm2133_vm14 = vcmp.eq.f32.partialorder %v2132_v12, 8.507059e+37  ;;  %v4936_v12 = vld [vmem:[%s6506_s14 + $0x8] sm:$0xff] }
0x1a5e   :  { %v2179_v45 = vsel %vm2178_vm4, %v5299_v37, %v2175_v42  ;;  %2363 = vmatpush.bf16.msrb.mxu0 %v4936_v12 }
0x1a5f   :  { %v2184_v53 = vsel %vm2181_vm6, %v2183_v46, %v2179_v45  ;;  %v5305_v58 = vpop.eup %5304  ;;  %vm2370_vm6 = vcmask 254976  }
0x1a60   :  { %v2187_v23 = vmul.f32 %v5305_v58, %v2170_v52  ;;  %v5307_v60 = vpop.eup %5306  ;;  %vm2192_vm7 = vweird.f32 %v5305_v58  ;;  %v2209_v40 = vmul.f32 %v2205_v22, %v2184_v53  ;;  %v4937_v22 = vld [vmem:[%s6508_s16] sm:$0xff] }
0x1a61   :  { %v2124_v27 = vmul.f32 %v5307_v60, %v2122_v35  ;;  %vm2193_vm9 = vmor %vm2191_vm8, %vm2192_vm7  ;;  %vm2129_vm10 = vweird.f32 %v5307_v60  ;;  %2409 = vmatpush.bf16.msrb.mxu1 %v4937_v22 }
0x1a62   :  { %v2188_v13 = vsub.f32 1.0, %v2187_v23  ;;  %vm2130_vm13 = vmor %vm2128_vm12, %vm2129_vm10 }
0x1a63   :  { %v2125_v1 = vsub.f32 1.0, %v2124_v27 }
0x1a64   :  { %v2189_v0 = vmul.f32 %v5305_v58, %v2188_v13 }
0x1a65   :  { %v2126_v6 = vmul.f32 %v5307_v60, %v2125_v1 }
0x1a66   :  { %v2190_v17 = vadd.f32 %v5305_v58, %v2189_v0 }
0x1a67   :  { %v2127_v8 = vadd.f32 %v5307_v60, %v2126_v6 }
0x1a68   :  { %v2194_v5 = vsel %vm2193_vm9, %v5305_v58, %v2190_v17 }
0x1a69   :  { %v2199_v11 = vsel %vm2196_vm11, %v2198_v7, %v2194_v5  ;;  %v2131_v15 = vsel %vm2130_vm13, %v5307_v60, %v2127_v8 }
0x1a6a   :  { %v2136_v19 = vsel %vm2133_vm14, %v2135_v16, %v2131_v15  ;;  %v2210_v25 = vmul.f32 %v2206_v34, %v2199_v11 }
0x1a6b   :  { %v2139_v26 = vmul.f32 %v2136_v19, %v6089_v51 }
0x1aa0   :  { %v2214_v49 = vpop.permute.xlu2 %2213 }
0x1aa1   :  { %v2219_v57 = vmul.f32 %v2214_v49, %v2184_v53 }
0x1aa3   :  { %2223 = vrot.lane.b32.xlu2 %v2219_v57, %s5497_s11 }
0x1ab9   :  { %v2216_v10 = vpop.permute.xlu0 %2215 }
0x1aba   :  { %v2220_v14 = vmul.f32 %v2216_v10, %v2199_v11 }
0x1abc   :  { %2225 = vrot.lane.b32.xlu0 %v2220_v14, %s5497_s11  ;;  %v4935_v14 = vld [vmem:[%s6506_s14] sm:$0xff] }
0x1abd   :  { %2364 = vmatpush.bf16.msrb.mxu0 %v4935_v14 }
0x1abe   :  { %v2142_v18 = vpop.permute.xlu1 %2141 }
0x1abf   :  { %v2144_v20 = vmul.f32 %v2142_v18, %v2136_v19 }
0x1ac1   :  { %2146 = vrot.lane.b32.xlu1 %v2144_v20, %s5497_s11 }
0x1afd   :  { %v2224_v24 = vpop.permute.xlu2 %2223 }
0x1afe   :  { %v2229_v28 = vadd.f32 %v2224_v24, %v2209_v40  ;;  %v5094_v40 = vld [vmem:[%s6507_s15] ss:$0 sm:$0xff] }
0x1b00   :  { %5308 = vtanh.f32 %v2229_v28 }
0x1b06   :  { %v5309_v36 = vpop.eup %5308 }
0x1b07   :  { %2235 = vrot.lane.b32.xlu2 %v5309_v36, %s5491_s4 }
0x1b2e   :  { %v2226_v2 = vpop.permute.xlu0 %2225 }
0x1b2f   :  { %v2230_v59 = vadd.f32 %v2226_v2, %v2210_v25 }
0x1b31   :  { %5310 = vtanh.f32 %v2230_v59 }
0x1b33   :  { %v2147_v29 = vpop.permute.xlu1 %2146 }
0x1b34   :  { %v2149_v47 = vadd.f32 %v2147_v29, %v2139_v26  ;;  %v4939_v29 = vld [vmem:[%s6510_s18 + $0x8] sm:$0xff] }
0x1b35   :  { %2446 = vmatpush.bf16.msra.mxu3 %v4939_v29 }
0x1b36   :  { %5312 = vtanh.f32 %v2149_v47 }
0x1b37   :  { %v5311_v31 = vpop.eup %5310 }
0x1b38   :  { %2237 = vrot.lane.b32.xlu0 %v5311_v31, %s5491_s4 }
0x1b3c   :  { %v5313_v62 = vpop.eup %5312 }
0x1b3d   :  { %2152 = vrot.lane.b32.xlu1 %v5313_v62, %s5491_s4 }
0x1b61   :  { %v2236_v21 = vpop.permute.xlu2 %2235 }
0x1b62   :  { %v2241_v33 = vmul.f32 %v2236_v21, %v2184_v53  ;;  %v4938_v21 = vld [vmem:[%s6510_s18] sm:$0xff] }
0x1b63   :  { %2447 = vmatpush.bf16.msra.mxu3 %v4938_v21 }
0x1b64   :  { %v2243_v50 = vpack.c.bf16 %v2241_v33, %v2241_v33  ;;  %v5095_v33 = vld [vmem:[%s6509_s17] ss:$0 sm:$0xff] }
0x1b66   :  { %v2247_v48 = vunpack.c.l.b16 %v2243_v50 }
0x1b68   :  { %v2249_v51 = vrot.slane %v2247_v48, 7 }
0x1baa   :  { %v2238_v54 = vpop.permute.xlu0 %2237 }
0x1bab   :  { %v2242_v63 = vmul.f32 %v2238_v54, %v2199_v11 }
0x1bad   :  { %v2244_v37 = vpack.c.bf16 %v2242_v63, %v2242_v63 }
0x1baf   :  { %v2248_v38 = vunpack.c.l.b16 %v2244_v37  ;;  %v2153_v61 = vpop.permute.xlu1 %2152 }
0x1bb0   :  { %v2155_v39 = vmul.f32 %v2153_v61, %v2136_v19  ;;  %v2375_v19 = vld [vmem:[%s6547_s0] sm:$0x3] }
0x1bb1   :  { %v2250_v41 = vrot.slane %v2248_v38, 6  ;;  %v5096_v38 = vld [vmem:[%s6511_s19] ss:$0 sm:$0xff] }
0x1bb2   :  { %v2271_v55 = vpack.c.bf16 %v2155_v39, %v2155_v39 }
0x1bb3   :  { %v2251_v56 = vsel %vm922_vm15, %v2250_v41, %v2249_v51 }
0x1bb4   :  { %2273 = vrot.lane.b32.xlu0 %v2271_v55, %s5497_s11  ;;  %v2252_v52 = vpack.c.b16 %v2251_v56, %v2251_v56 }
0x1bb6   :  { %2253 = vrot.lane.b32.xlu2 %v2252_v52, %s5497_s11 }
0x1c10   :  { %v2254_v42 = vpop.permute.xlu2 %2253 }
0x1c11   :  { %4446 = vmatmul.msk.bf16.vlgmr.msrb.gmra.mxu3 %vm200_vm3, %v2254_v42 }
0x1c26   :  { %v2274_v43 = vpop.permute.xlu0 %2273 }
0x1c27   :  { %4447 = vmatmul.msk.bf16.vlgmr.msrb.gmra.mxu2 %vm200_vm3, %v2274_v43 }
0x1c94   :  { %v2267_v44 = vpop.f32.mrf.mxu3 }
0x1c9c   :  { %v2269_v32 = vpop.f32.mrf.mxu3 }
0x1caa   :  { %v2287_v45 = vpop.f32.mrf.mxu2 }
0x1cab   :  { %v2291_v35 = vadd.f32 %v2287_v45, %v2267_v44 }
0x1cad   :  { %v2292_v46 = vadd.f32 %v6051_v3, %v2291_v35 }
0x1caf   :  { %5314 = vtanh.f32 %v2292_v46  ;;  %v4448_v57 = vmul.f32 -1.442695, %v2292_v46 }
0x1cb1   :  { %5316 = vpow2.f32 %v4448_v57 }
0x1cb2   :  { %v2289_v49 = vpop.f32.mrf.mxu2 }
0x1cb5   :  { %v5315_v53 = vpop.eup %5314 }
0x1cb6   :  { %2315 = vrot.lane.b32.xlu1 %v5315_v53, %s5491_s4 }
0x1cb7   :  { %v5317_v58 = vpop.eup %5316 }
0x1cb8   :  { %v2296_v23 = vadd.f32 1.0, %v5317_v58 }
0x1cba   :  { %5318 = vrcp.f32 %v2296_v23  ;;  %v2308_v17 = vand.u32 2147483648, %v2296_v23  ;;  %vm2302_vm0 = vweird.f32 %v2296_v23  ;;  %v2306_v4 = vand.u32 2147483647, %v2296_v23 }
0x1cbc   :  { %v2309_v6 = vor.u32 1.1754944e-38, %v2308_v17  ;;  %vm2307_vm4 = vcmp.eq.f32.partialorder %v2306_v4, 8.507059e+37  ;;  %v4943_v17 = vld [vmem:[%s6512_s20 + $0x14] sm:$0xf0]  ;;  %v4475_v4 = vld [vmem:[%s6512_s20] sm:$0xf] }
0x1cc0   :  { %v5319_v60 = vpop.eup %5318 }
0x1cc1   :  { %v2298_v13 = vmul.f32 %v5319_v60, %v2296_v23  ;;  %vm2303_vm15 = vweird.f32 %v5319_v60 }
0x1cc2   :  { %vm2304_vm2 = vmor %vm2302_vm0, %vm2303_vm15 }
0x1cc3   :  { %v2299_v27 = vsub.f32 1.0, %v2298_v13  ;;  %v4942_v13 = vld [vmem:[%s6512_s20 + $0x14] sm:$0xf] }
0x1cc5   :  { %v2300_v0 = vmul.f32 %v5319_v60, %v2299_v27  ;;  %v4485_v27 = vld [vmem:[%s6512_s20 + $0x18] sm:$0xf0] }
0x1cc7   :  { %v2301_v1 = vadd.f32 %v5319_v60, %v2300_v0  ;;  %v4483_v0 = vld [vmem:[%s6512_s20 + $0x10] sm:$0xf] }
0x1cc9   :  { %v2305_v3 = vsel %vm2304_vm2, %v5319_v60, %v2301_v1  ;;  %v6184_v1 = vor.u32 %v4942_v13, %v4485_v27 }
0x1cca   :  { %v2310_v5 = vsel %vm2307_vm4, %v2309_v6, %v2305_v3  ;;  %v4941_v3 = vld [vmem:[%s6512_s20 + $0x4] sm:$0xf0]  ;;  %v6195_v6 = vor.u32 %v4943_v17, %v4483_v0 }
0x1ccb   :  { %v2313_v8 = vmul.f32 %v2310_v5, %v2149_v47  ;;  %2534 = vmatpush.bf16.msra.mxu0 %v6184_v1  ;;  %2645 = vmatpush.bf16.msrb.mxu3 %v6184_v1 }
0x1ccc   :  { %2521 = vmatpush.bf16.msra.mxu2 %v6195_v6  ;;  %2632 = vmatpush.bf16.msra.mxu1 %v6195_v6 }
0x1d28   :  { %v2316_v30 = vpop.permute.xlu1 %2315 }
0x1d29   :  { %v2318_v7 = vmul.f32 %v2316_v30, %v2310_v5  ;;  %v4940_v30 = vld [vmem:[%s6512_s20 + $0x4] sm:$0xf] }
0x1d2b   :  { %2320 = vrot.lane.b32.xlu2 %v2318_v7, %s5497_s11 }
0x1d33   :  { %2377 = vrot.lane.b32.xlu2 %v2375_v19, %s5496_s6 }
0x1d85   :  { %v2321_v9 = vpop.permute.xlu2 %2320 }
0x1d86   :  { %v2323_v10 = vadd.f32 %v2321_v9, %v2313_v8  ;;  %v6208_v8 = vor.u32 %v4941_v3, %v4475_v4 }
0x1d88   :  { %5320 = vtanh.f32 %v2323_v10  ;;  %2522 = vmatpush.bf16.msra.mxu2 %v6208_v8  ;;  %2633 = vmatpush.bf16.msra.mxu1 %v6208_v8 }
0x1d8d   :  { %v2378_v2 = vpop.permute.xlu2 %2377 }
0x1d8e   :  { %v5321_v11 = vpop.eup %5320 }
0x1d8f   :  { %2326 = vrot.lane.b32.xlu0 %v5321_v11, %s5491_s4 }
0x1e01   :  { %v2327_v15 = vpop.permute.xlu0 %2326 }
0x1e02   :  { %v2329_v16 = vmul.f32 %v2327_v15, %v2310_v5  ;;  %v4477_v5 = vld [vmem:[%s6512_s20 + $0x8] sm:$0xf0] }
0x1e03   :  { %v6204_v7 = vor.u32 %v4940_v30, %v4477_v5 }
0x1e04   :  { %v2334_v18 = vpack.c.bf16 %v2329_v16, %v2329_v16  ;;  %v6229_v16 = vld [vmem:[%s6514_s22] ss:$0 sm:$0xff] }
0x1e05   :  { %2535 = vmatpush.bf16.msra.mxu0 %v6204_v7  ;;  %2646 = vmatpush.bf16.msrb.mxu3 %v6204_v7 }
0x1e06   :  { %2340 = vrot.lane.b32.xlu1 %v2334_v18, %s5497_s11 }
0x1e78   :  { %v2341_v20 = vpop.permute.xlu1 %2340 }
0x1e79   :  { %4457 = vmatmul.msk.bf16.vlgmr.msrb.gmra.mxu0 %vm200_vm3, %v2341_v20 }
0x1e7a   :  { %2782 = vmatpush.bf16.msrb.mxu0 %v6195_v6 }
0x1e7e   :  { %2783 = vmatpush.bf16.msrb.mxu0 %v6208_v8 }
0x1ef6   :  { %v2366_v24 = vpop.f32.mrf.mxu0 }
0x1ef7   :  { %v2367_v28 = vadd.f32 %v5094_v40, %v2366_v24 }
0x1ef9   :  { %2371 = vst.msk [vmem:[%s6518_s26] sm:$0x3] %vm2370_vm6, %v2367_v28  ;;  %v2372_v36 = vmul.f32 0.5, %v2367_v28 }
0x1efb   :  { %v2373_v34 = vmul.f32 1.442695, %v2372_v36 }
0x1efd   :  { %5322 = vpow2.f32 %v2373_v34 }
0x1efe   :  { %v2368_v25 = vpop.f32.mrf.mxu0 }
0x1f03   :  { %v5323_v59 = vpop.eup %5322 }
0x1f04   :  { %v2380_v26 = vmul.f32 %v5323_v59, %v2378_v2 }
0x1f06   :  { %2382 = vrot.lane.b32.xlu0 %v2380_v26, %s5488_s7 }
0x1f78   :  { %v2383_v47 = vpop.permute.xlu0 %2382 }
0x1f79   :  { %v2385_v31 = vadd.f32 %v2383_v47, %v2367_v28 }
0x1f7b   :  { %v2388_v62 = vpack.c.bf16 %v2385_v31, %v2385_v31 }
0x1f7d   :  { %4462 = vmatmul.msk.bf16.vlgmr.msrb.gmra.mxu1 %vm493_vm5, %v2388_v62 }
0x1f7e   :  { %2795 = vmatpush.bf16.msrb.mxu1 %v6184_v1 }
0x1f82   :  { %2796 = vmatpush.bf16.msrb.mxu1 %v6204_v7 }
0x1ffa   :  { %v2411_v50 = vpop.f32.mrf.mxu1 }
0x1ffb   :  { %v2412_v54 = vadd.f32 %v5095_v33, %v2411_v50 }
0x1ffd   :  { %v2415_v63 = vmax.f32 %v2412_v54, 0.0 }
0x1fff   :  { %v2420_v48 = vpack.c.bf16 %v2415_v63, %v2415_v63 }
0x2001   :  { %4471 = vmatmul.msk.bf16.vlgmr.msra.gmra.mxu3 %vm200_vm3, %v2420_v48 }
0x2002   :  { %v2413_v37 = vpop.f32.mrf.mxu1 }
0x2084   :  { %v2449_v61 = vpop.f32.mrf.mxu3 }
0x2085   :  { %v6169_v39 = vadd.f32 %v5096_v38, %v2449_v61 }
0x2087   :  { %5324 = vtanh.f32 %v6169_v39  ;;  %v4472_v55 = vmul.f32 -1.442695, %v6169_v39 }
0x2089   :  { %5326 = vpow2.f32 %v4472_v55 }
0x208c   :  { %v2451_v51 = vpop.f32.mrf.mxu3 }
0x208d   :  { %v5325_v41 = vpop.eup %5324 }
0x208e   :  { %2474 = vrot.lane.b32.xlu1 %v5325_v41, %s5491_s4 }
0x208f   :  { %v5327_v56 = vpop.eup %5326 }
0x2090   :  { %v2456_v52 = vadd.f32 1.0, %v5327_v56 }
0x2092   :  { %5328 = vrcp.f32 %v2456_v52  ;;  %v2468_v35 = vand.u32 2147483648, %v2456_v52  ;;  %vm2462_vm7 = vweird.f32 %v2456_v52  ;;  %v2466_v46 = vand.u32 2147483647, %v2456_v52 }
0x2094   :  { %v2469_v53 = vor.u32 1.1754944e-38, %v2468_v35  ;;  %vm2467_vm9 = vcmp.eq.f32.partialorder %v2466_v46, 8.507059e+37 }
0x2098   :  { %v5329_v42 = vpop.eup %5328 }
0x2099   :  { %v2458_v43 = vmul.f32 %v5329_v42, %v2456_v52  ;;  %vm2463_vm5 = vweird.f32 %v5329_v42 }
0x209a   :  { %vm2464_vm8 = vmor %vm2462_vm7, %vm2463_vm5 }
0x209b   :  { %v2459_v44 = vsub.f32 1.0, %v2458_v43 }
0x209d   :  { %v2460_v32 = vmul.f32 %v5329_v42, %v2459_v44 }
0x209f   :  { %v2461_v45 = vadd.f32 %v5329_v42, %v2460_v32 }
0x20a1   :  { %v2465_v49 = vsel %vm2464_vm8, %v5329_v42, %v2461_v45 }
0x20a2   :  { %v2470_v58 = vsel %vm2467_vm9, %v2469_v53, %v2465_v49 }
0x2100   :  { %v2475_v57 = vpop.permute.xlu1 %2474 }
0x2101   :  { %v2477_v23 = vmul.f32 %v2475_v57, %v2470_v58  ;;  %v6244_v57 = vld [vmem:[%s6513_s21 + $0x8] sm:$0xff] }
0x2102   :  { %2681 = vmatpush.bf16.msrb.mxu2 %v6244_v57  ;;  %2815 = vmatpush.bf16.msra.mxu3 %v6244_v57 }
0x2103   :  { %5330 = vtanh.f32 %v2477_v23 }
0x2109   :  { %v5331_v60 = vpop.eup %5330 }
0x210a   :  { %2480 = vrot.lane.b32.xlu2 %v5331_v60, %s5485_s1 }
0x2164   :  { %v2481_v9 = vpop.permute.xlu2 %2480 }
0x2165   :  { %v2483_v10 = vmul.f32 %v2481_v9, %v2470_v58  ;;  %v6250_v58 = vld [vmem:[%s6513_s21] sm:$0xff] }
0x2166   :  { %2682 = vmatpush.bf16.msrb.mxu2 %v6250_v58  ;;  %2816 = vmatpush.bf16.msra.mxu3 %v6250_v58 }
0x2167   :  { %v2488_v11 = vpack.c.bf16 %v2483_v10, %v2483_v10 }
0x2169   :  { %2490 = vrot.lane.b32.xlu0 %v2488_v11, %s5497_s11 }
0x2171   :  { %2599 = vrot.lane.b32.xlu0 %v2477_v23, %s5497_s11 }
0x21db   :  { %v2491_v12 = vpop.permute.xlu0 %2490 }
0x21dc   :  { %4489 = vmatmul.msk.bf16.vlgmr.msra.gmra.mxu2 %vm200_vm3, %v2491_v12  ;;  %4490 = vmatmul.msk.bf16.vlgmr.msra.gmra.mxu0 %vm200_vm3, %v2491_v12 }
0x21dd   :  { %2925 = vmatpush.bf16.msra.mxu0 %v6184_v1  ;;  %2912 = vmatpush.bf16.msra.mxu2 %v6195_v6 }
0x21e1   :  { %2926 = vmatpush.bf16.msra.mxu0 %v6204_v7  ;;  %2913 = vmatpush.bf16.msra.mxu2 %v6208_v8 }
0x21e3   :  { %v2600_v23 = vpop.permute.xlu0 %2599 }
0x2259   :  { %v2537_v14 = vpop.f32.mrf.mxu0 }
0x225a   :  { %v2577_v15 = vadd.f32 %v2537_v14, %v6169_v39 }
0x225c   :  { %5332 = vtanh.f32 %v2577_v15  ;;  %v4492_v25 = vmul.f32 -1.442695, %v2577_v15 }
0x225f   :  { %v2524_v18 = vpop.f32.mrf.mxu2 }
0x2260   :  { %v2545_v19 = vadd.f32 %v6229_v16, %v2524_v18 }
0x2261   :  { %v2539_v20 = vpop.f32.mrf.mxu0 }
0x2262   :  { %v5333_v22 = vpop.eup %5332  ;;  %5334 = vtanh.f32 %v2545_v19  ;;  %v4491_v28 = vmul.f32 -1.442695, %v2545_v19 }
0x2263   :  { %2604 = vrot.lane.b32.xlu1 %v5333_v22, %s5491_s4 }
0x2264   :  { %5336 = vpow2.f32 %v4491_v28 }
0x2267   :  { %v2526_v40 = vpop.f32.mrf.mxu2 }
0x2268   :  { %v5335_v24 = vpop.eup %5334 }
0x2269   :  { %2567 = vrot.lane.b32.xlu2 %v5335_v24, %s5491_s4 }
0x226a   :  { %v5337_v36 = vpop.eup %5336 }
0x226b   :  { %v2549_v34 = vadd.f32 1.0, %v5337_v36 }
0x226d   :  { %5338 = vrcp.f32 %v2549_v34  ;;  %v2561_v21 = vand.u32 2147483648, %v2549_v34  ;;  %vm2555_vm11 = vweird.f32 %v2549_v34  ;;  %v2559_v33 = vand.u32 2147483647, %v2549_v34 }
0x226e   :  { %5340 = vpow2.f32 %v4492_v25 }
0x226f   :  { %v2562_v63 = vor.u32 1.1754944e-38, %v2561_v21  ;;  %vm2560_vm13 = vcmp.eq.f32.partialorder %v2559_v33, 8.507059e+37 }
0x2273   :  { %v5339_v2 = vpop.eup %5338 }
0x2274   :  { %v2551_v59 = vmul.f32 %v5339_v2, %v2549_v34  ;;  %v5341_v26 = vpop.eup %5340  ;;  %vm2556_vm10 = vweird.f32 %v5339_v2 }
0x2275   :  { %v2581_v47 = vadd.f32 1.0, %v5341_v26  ;;  %vm2557_vm12 = vmor %vm2555_vm11, %vm2556_vm10 }
0x2276   :  { %v2552_v29 = vsub.f32 1.0, %v2551_v59 }
0x2277   :  { %5342 = vrcp.f32 %v2581_v47  ;;  %v2593_v52 = vand.u32 2147483648, %v2581_v47  ;;  %vm2587_vm15 = vweird.f32 %v2581_v47  ;;  %v2591_v42 = vand.u32 2147483647, %v2581_v47 }
0x2278   :  { %v2553_v31 = vmul.f32 %v5339_v2, %v2552_v29 }
0x2279   :  { %v2594_v44 = vor.u32 1.1754944e-38, %v2593_v52  ;;  %vm2592_vm2 = vcmp.eq.f32.partialorder %v2591_v42, 8.507059e+37 }
0x227a   :  { %v2554_v62 = vadd.f32 %v5339_v2, %v2553_v31 }
0x227c   :  { %v2558_v54 = vsel %vm2557_vm12, %v5339_v2, %v2554_v62 }
0x227d   :  { %v5343_v50 = vpop.eup %5342  ;;  %v2563_v38 = vsel %vm2560_vm13, %v2562_v63, %v2558_v54 }
0x227e   :  { %v2583_v48 = vmul.f32 %v5343_v50, %v2581_v47  ;;  %vm2588_vm14 = vweird.f32 %v5343_v50 }
0x227f   :  { %vm2589_vm0 = vmor %vm2587_vm15, %vm2588_vm14 }
0x2280   :  { %v2584_v51 = vsub.f32 1.0, %v2583_v48 }
0x2282   :  { %v2585_v41 = vmul.f32 %v5343_v50, %v2584_v51 }
0x2284   :  { %v2586_v56 = vadd.f32 %v5343_v50, %v2585_v41 }
0x2286   :  { %v2590_v43 = vsel %vm2589_vm0, %v5343_v50, %v2586_v56 }
0x2287   :  { %v2595_v45 = vsel %vm2592_vm2, %v2594_v44, %v2590_v43 }
0x2288   :  { %v2602_v60 = vmul.f32 %v2600_v23, %v2595_v45 }
0x22c3   :  { %v2568_v37 = vpop.permute.xlu2 %2567 }
0x22c4   :  { %v2570_v61 = vmul.f32 %v2568_v37, %v2563_v38 }
0x22c6   :  { %5344 = vtanh.f32 %v2570_v61 }
0x22cc   :  { %v5345_v55 = vpop.eup %5344 }
0x22cd   :  { %2573 = vrot.lane.b32.xlu2 %v5345_v55, %s5485_s1 }
0x22d5   :  { %v2605_v32 = vpop.permute.xlu1 %2604 }
0x22d6   :  { %v2607_v35 = vmul.f32 %v2605_v32, %v2595_v45 }
0x22d8   :  { %2609 = vrot.lane.b32.xlu1 %v2607_v35, %s5497_s11 }
0x2327   :  { %v2574_v46 = vpop.permute.xlu2 %2573 }
0x2328   :  { %v6236_v49 = vmul.f32 %v2574_v46, %v2563_v38 }
0x232a   :  { %v2656_v53 = vpack.c.bf16 %v6236_v49, %v6236_v49 }
0x232c   :  { %2658 = vrot.lane.b32.xlu1 %v2656_v53, %s5497_s11 }
0x234a   :  { %v2610_v13 = vpop.permute.xlu1 %2609 }
0x234b   :  { %v6257_v27 = vadd.f32 %v2610_v13, %v2602_v60 }
0x234d   :  { %5346 = vtanh.f32 %v6257_v27 }
0x2353   :  { %v5347_v0 = vpop.eup %5346 }
0x2354   :  { %2615 = vrot.lane.b32.xlu0 %v5347_v0, %s5491_s4 }
0x239e   :  { %v2659_v17 = vpop.permute.xlu1 %2658 }
0x239f   :  { %4503 = vmatmul.msk.bf16.vlgmr.msrb.gmra.mxu2 %vm200_vm3, %v2659_v17 }
0x23a0   :  { %3055 = vmatpush.bf16.msrb.mxu2 %v6184_v1 }
0x23a4   :  { %3056 = vmatpush.bf16.msrb.mxu2 %v6204_v7 }
0x23c6   :  { %v2616_v4 = vpop.permute.xlu0 %2615 }
0x23c7   :  { %v2618_v3 = vmul.f32 %v2616_v4, %v2595_v45 }
0x23c9   :  { %v2619_v30 = vpack.c.bf16 %v2618_v3, %v2618_v3 }
0x23cb   :  { %2621 = vrot.lane.b32.xlu2 %v2619_v30, %s5497_s11 }
0x23d3   :  { %2711 = vrot.lane.b32.xlu2 %v2570_v61, %s5497_s11 }
0x2422   :  { %v2684_v5 = vpop.f32.mrf.mxu2 }
0x2425   :  { %v2622_v9 = vpop.permute.xlu2 %2621 }
0x2426   :  { %4493 = vmatmul.msk.bf16.vlgmr.msra.gmra.mxu1 %vm200_vm3, %v2622_v9  ;;  %4494 = vmatmul.msk.bf16.vlgmr.msrb.gmra.mxu3 %vm200_vm3, %v2622_v9 }
0x2427   :  { %2945 = vmatpush.bf16.msra.mxu1 %v6244_v57  ;;  %3042 = vmatpush.bf16.msrb.mxu3 %v6195_v6 }
0x242a   :  { %v2686_v10 = vpop.f32.mrf.mxu2 }
0x242b   :  { %2946 = vmatpush.bf16.msra.mxu1 %v6250_v58  ;;  %3043 = vmatpush.bf16.msrb.mxu3 %v6208_v8 }
0x242d   :  { %v2712_v45 = vpop.permute.xlu2 %2711 }
0x24a3   :  { %v2635_v11 = vpop.f32.mrf.mxu1 }
0x24a4   :  { %v2688_v12 = vadd.f32 %v2684_v5, %v2635_v11 }
0x24a6   :  { %v2689_v14 = vadd.f32 %v6229_v16, %v2688_v12 }
0x24a8   :  { %5348 = vtanh.f32 %v2689_v14  ;;  %v4504_v24 = vmul.f32 -1.442695, %v2689_v14 }
0x24a9   :  { %v2648_v15 = vpop.f32.mrf.mxu3 }
0x24aa   :  { %v2731_v18 = vadd.f32 %v2648_v15, %v6169_v39 }
0x24ab   :  { %v2637_v19 = vpop.f32.mrf.mxu1 }
0x24ac   :  { %5350 = vtanh.f32 %v2731_v18  ;;  %v4505_v28 = vmul.f32 -1.442695, %v2731_v18 }
0x24ad   :  { %5352 = vpow2.f32 %v4504_v24 }
0x24ae   :  { %v5349_v20 = vpop.eup %5348  ;;  %5354 = vpow2.f32 %v4505_v28 }
0x24af   :  { %2716 = vrot.lane.b32.xlu0 %v5349_v20, %s5491_s4 }
0x24b1   :  { %v2650_v22 = vpop.f32.mrf.mxu3 }
0x24b2   :  { %v5351_v40 = vpop.eup %5350 }
0x24b3   :  { %2754 = vrot.lane.b32.xlu1 %v5351_v40, %s5491_s4  ;;  %v5353_v36 = vpop.eup %5352 }
0x24b4   :  { %v2693_v34 = vadd.f32 1.0, %v5353_v36  ;;  %v5355_v25 = vpop.eup %5354 }
0x24b5   :  { %v2735_v2 = vadd.f32 1.0, %v5355_v25 }
0x24b6   :  { %5356 = vrcp.f32 %v2693_v34  ;;  %v2705_v54 = vand.u32 2147483648, %v2693_v34  ;;  %vm2699_vm6 = vweird.f32 %v2693_v34  ;;  %v2703_v63 = vand.u32 2147483647, %v2693_v34 }
0x24b7   :  { %5358 = vrcp.f32 %v2735_v2  ;;  %v2747_v61 = vand.u32 2147483648, %v2735_v2  ;;  %vm2741_vm9 = vweird.f32 %v2735_v2  ;;  %v2745_v51 = vand.u32 2147483647, %v2735_v2 }
0x24b8   :  { %v2706_v38 = vor.u32 1.1754944e-38, %v2705_v54  ;;  %vm2704_vm8 = vcmp.eq.f32.partialorder %v2703_v63, 8.507059e+37 }
0x24b9   :  { %v2748_v42 = vor.u32 1.1754944e-38, %v2747_v61  ;;  %vm2746_vm11 = vcmp.eq.f32.partialorder %v2745_v51, 8.507059e+37 }
0x24bc   :  { %v5357_v59 = vpop.eup %5356 }
0x24bd   :  { %v2695_v26 = vmul.f32 %v5357_v59, %v2693_v34  ;;  %v5359_v29 = vpop.eup %5358  ;;  %vm2700_vm4 = vweird.f32 %v5357_v59 }
0x24be   :  { %v2737_v31 = vmul.f32 %v5359_v29, %v2735_v2  ;;  %vm2701_vm5 = vmor %vm2699_vm6, %vm2700_vm4  ;;  %vm2742_vm7 = vweird.f32 %v5359_v29 }
0x24bf   :  { %v2696_v47 = vsub.f32 1.0, %v2695_v26  ;;  %vm2743_vm10 = vmor %vm2741_vm9, %vm2742_vm7 }
0x24c0   :  { %v2738_v21 = vsub.f32 1.0, %v2737_v31 }
0x24c1   :  { %v2697_v62 = vmul.f32 %v5357_v59, %v2696_v47 }
0x24c2   :  { %v2739_v50 = vmul.f32 %v5359_v29, %v2738_v21 }
0x24c3   :  { %v2698_v33 = vadd.f32 %v5357_v59, %v2697_v62 }
0x24c4   :  { %v2740_v37 = vadd.f32 %v5359_v29, %v2739_v50 }
0x24c5   :  { %v2702_v48 = vsel %vm2701_vm5, %v5357_v59, %v2698_v33 }
0x24c6   :  { %v2707_v55 = vsel %vm2704_vm8, %v2706_v38, %v2702_v48  ;;  %v2744_v52 = vsel %vm2743_vm10, %v5359_v29, %v2740_v37 }
0x24c7   :  { %v2749_v44 = vsel %vm2746_vm11, %v2748_v42, %v2744_v52  ;;  %v2714_v35 = vmul.f32 %v2712_v45, %v2707_v55 }
0x24c8   :  { %v2752_v23 = vmul.f32 %v2749_v44, %v6257_v27 }
0x2521   :  { %v2717_v41 = vpop.permute.xlu0 %2716 }
0x2522   :  { %v2719_v56 = vmul.f32 %v2717_v41, %v2707_v55 }
0x2524   :  { %2721 = vrot.lane.b32.xlu0 %v2719_v56, %s5497_s11 }
0x2525   :  { %v2755_v43 = vpop.permute.xlu1 %2754 }
0x2526   :  { %v2757_v32 = vmul.f32 %v2755_v43, %v2749_v44 }
0x2528   :  { %2759 = vrot.lane.b32.xlu1 %v2757_v32, %s5497_s11 }
0x2596   :  { %v2722_v46 = vpop.permute.xlu0 %2721 }
0x2597   :  { %v6278_v53 = vadd.f32 %v2722_v46, %v2714_v35 }
0x2599   :  { %5360 = vtanh.f32 %v6278_v53 }
0x259a   :  { %v2760_v60 = vpop.permute.xlu1 %2759 }
0x259b   :  { %v6282_v13 = vadd.f32 %v2760_v60, %v2752_v23 }
0x259d   :  { %5362 = vtanh.f32 %v6282_v13 }
0x259f   :  { %v5361_v0 = vpop.eup %5360 }
0x25a0   :  { %2727 = vrot.lane.b32.xlu2 %v5361_v0, %s5491_s4 }
0x25a3   :  { %v5363_v17 = vpop.eup %5362 }
0x25a4   :  { %2765 = vrot.lane.b32.xlu0 %v5363_v17, %s5491_s4 }
0x25fa   :  { %v2728_v4 = vpop.permute.xlu2 %2727 }
0x25fb   :  { %v6287_v3 = vmul.f32 %v2728_v4, %v2707_v55 }
0x25fd   :  { %v2802_v30 = vpack.c.bf16 %v6287_v3, %v6287_v3 }
0x25ff   :  { %2804 = vrot.lane.b32.xlu1 %v2802_v30, %s5497_s11 }
0x2616   :  { %v2766_v27 = vpop.permute.xlu0 %2765 }
0x2617   :  { %v2768_v5 = vmul.f32 %v2766_v27, %v2749_v44 }
0x2619   :  { %v2769_v9 = vpack.c.bf16 %v2768_v5, %v2768_v5 }
0x261b   :  { %2771 = vrot.lane.b32.xlu2 %v2769_v9, %s5497_s11 }
0x2671   :  { %v2805_v10 = vpop.permute.xlu1 %2804 }
0x2672   :  { %4508 = vmatmul.msk.bf16.vlgmr.msra.gmra.mxu3 %vm200_vm3, %v2805_v10 }
0x2673   :  { %3185 = vmatpush.bf16.msra.mxu3 %v6184_v1 }
0x2675   :  { %v2772_v11 = vpop.permute.xlu2 %2771 }
0x2676   :  { %4506 = vmatmul.msk.bf16.vlgmr.msrb.gmra.mxu0 %vm200_vm3, %v2772_v11  ;;  %4507 = vmatmul.msk.bf16.vlgmr.msrb.gmra.mxu1 %vm200_vm3, %v2772_v11 }
0x2677   :  { %3075 = vmatpush.bf16.msrb.mxu0 %v6244_v57  ;;  %3172 = vmatpush.bf16.msrb.mxu1 %v6195_v6 }
0x2678   :  { %3186 = vmatpush.bf16.msra.mxu3 %v6204_v7 }
0x267b   :  { %3076 = vmatpush.bf16.msrb.mxu0 %v6250_v58  ;;  %3173 = vmatpush.bf16.msrb.mxu1 %v6208_v8 }
0x26f3   :  { %v2785_v12 = vpop.f32.mrf.mxu0  ;;  %v2798_v14 = vpop.f32.mrf.mxu1 }
0x26f4   :  { %v2861_v15 = vadd.f32 %v2798_v14, %v6169_v39 }
0x26f5   :  { %v2818_v18 = vpop.f32.mrf.mxu3 }
0x26f6   :  { %5364 = vtanh.f32 %v2861_v15  ;;  %v2822_v19 = vadd.f32 %v2818_v18, %v2785_v12  ;;  %v4510_v34 = vmul.f32 -1.442695, %v2861_v15 }
0x26f8   :  { %v2823_v20 = vadd.f32 %v6229_v16, %v2822_v19 }
0x26fa   :  { %5366 = vtanh.f32 %v2823_v20  ;;  %v4509_v25 = vmul.f32 -1.442695, %v2823_v20 }
0x26fb   :  { %v2787_v22 = vpop.f32.mrf.mxu0  ;;  %v2800_v40 = vpop.f32.mrf.mxu1  ;;  %5368 = vpow2.f32 %v4510_v34 }
0x26fc   :  { %v5365_v24 = vpop.eup %5364  ;;  %5370 = vpow2.f32 %v4509_v25 }
0x26fd   :  { %v2820_v28 = vpop.f32.mrf.mxu3  ;;  %2884 = vrot.lane.b32.xlu0 %v5365_v24, %s5491_s4 }
0x2700   :  { %v5367_v36 = vpop.eup %5366 }
0x2701   :  { %2846 = vrot.lane.b32.xlu1 %v5367_v36, %s5491_s4  ;;  %v5369_v2 = vpop.eup %5368 }
0x2702   :  { %v2865_v59 = vadd.f32 1.0, %v5369_v2  ;;  %v5371_v26 = vpop.eup %5370 }
0x2703   :  { %v2827_v29 = vadd.f32 1.0, %v5371_v26 }
0x2704   :  { %5372 = vrcp.f32 %v2865_v59  ;;  %v2877_v37 = vand.u32 2147483648, %v2865_v59  ;;  %vm2871_vm13 = vweird.f32 %v2865_v59  ;;  %v2875_v38 = vand.u32 2147483647, %v2865_v59 }
0x2705   :  { %5374 = vrcp.f32 %v2827_v29  ;;  %v2839_v55 = vand.u32 2147483648, %v2827_v29  ;;  %vm2833_vm2 = vweird.f32 %v2827_v29  ;;  %v2837_v56 = vand.u32 2147483647, %v2827_v29 }
0x2706   :  { %v2878_v41 = vor.u32 1.1754944e-38, %v2877_v37  ;;  %vm2876_vm0 = vcmp.eq.f32.partialorder %v2875_v38, 8.507059e+37 }
0x2707   :  { %v2840_v32 = vor.u32 1.1754944e-38, %v2839_v55  ;;  %vm2838_vm6 = vcmp.eq.f32.partialorder %v2837_v56, 8.507059e+37 }
0x270a   :  { %v5373_v47 = vpop.eup %5372 }
0x270b   :  { %v2867_v31 = vmul.f32 %v5373_v47, %v2865_v59  ;;  %v5375_v62 = vpop.eup %5374  ;;  %vm2872_vm12 = vweird.f32 %v5373_v47 }
0x270c   :  { %v2829_v33 = vmul.f32 %v5375_v62, %v2827_v29  ;;  %vm2873_vm14 = vmor %vm2871_vm13, %vm2872_vm12  ;;  %vm2834_vm15 = vweird.f32 %v5375_v62 }
0x270d   :  { %v2868_v21 = vsub.f32 1.0, %v2867_v31  ;;  %vm2835_vm4 = vmor %vm2833_vm2, %vm2834_vm15 }
0x270e   :  { %v2830_v54 = vsub.f32 1.0, %v2829_v33 }
0x270f   :  { %v2869_v50 = vmul.f32 %v5373_v47, %v2868_v21 }
0x2710   :  { %v2831_v48 = vmul.f32 %v5375_v62, %v2830_v54 }
0x2711   :  { %v2870_v63 = vadd.f32 %v5373_v47, %v2869_v50 }
0x2712   :  { %v2832_v51 = vadd.f32 %v5375_v62, %v2831_v48 }
0x2713   :  { %v2874_v61 = vsel %vm2873_vm14, %v5373_v47, %v2870_v63 }
0x2714   :  { %v2879_v42 = vsel %vm2876_vm0, %v2878_v41, %v2874_v61  ;;  %v2836_v44 = vsel %vm2835_vm4, %v5375_v62, %v2832_v51 }
0x2715   :  { %v2841_v35 = vsel %vm2838_vm6, %v2840_v32, %v2836_v44  ;;  %v2882_v23 = vmul.f32 %v2879_v42, %v6282_v13 }
0x2716   :  { %v2844_v4 = vmul.f32 %v2841_v35, %v6278_v53 }
0x276f   :  { %v2885_v52 = vpop.permute.xlu0 %2884 }
0x2770   :  { %v2887_v43 = vmul.f32 %v2885_v52, %v2879_v42 }
0x2772   :  { %2889 = vrot.lane.b32.xlu2 %v2887_v43, %s5497_s11 }
0x2773   :  { %v2847_v45 = vpop.permute.xlu1 %2846 }
0x2774   :  { %v2849_v46 = vmul.f32 %v2847_v45, %v2841_v35 }
0x2776   :  { %2851 = vrot.lane.b32.xlu0 %v2849_v46, %s5497_s11 }
0x27cc   :  { %v2890_v60 = vpop.permute.xlu2 %2889 }
0x27cd   :  { %v6309_v0 = vadd.f32 %v2890_v60, %v2882_v23 }
0x27cf   :  { %5376 = vtanh.f32 %v6309_v0 }
0x27d5   :  { %v5377_v17 = vpop.eup %5376 }
0x27d6   :  { %2895 = vrot.lane.b32.xlu1 %v5377_v17, %s5491_s4 }
0x27e8   :  { %v2852_v30 = vpop.permute.xlu0 %2851 }
0x27e9   :  { %v6314_v27 = vadd.f32 %v2852_v30, %v2844_v4 }
0x27eb   :  { %5378 = vtanh.f32 %v6314_v27 }
0x27f1   :  { %v5379_v5 = vpop.eup %5378 }
0x27f2   :  { %2857 = vrot.lane.b32.xlu2 %v5379_v5, %s5491_s4 }
0x2848   :  { %v2896_v9 = vpop.permute.xlu1 %2895 }
0x2849   :  { %v2898_v13 = vmul.f32 %v2896_v9, %v2879_v42 }
0x284b   :  { %v2899_v10 = vpack.c.bf16 %v2898_v13, %v2898_v13 }
0x284c   :  { %v2858_v11 = vpop.permute.xlu2 %2857 }
0x284d   :  { %v6318_v12 = vmul.f32 %v2858_v11, %v2841_v35  ;;  %2901 = vrot.lane.b32.xlu0 %v2899_v10, %s5497_s11 }
0x284f   :  { %v2932_v14 = vpack.c.bf16 %v6318_v12, %v6318_v12 }
0x2851   :  { %2934 = vrot.lane.b32.xlu1 %v2932_v14, %s5497_s11 }
0x28bf   :  { %v2902_v53 = vpop.permute.xlu0 %2901 }
0x28c0   :  { %4511 = vmatmul.msk.bf16.vlgmr.msra.gmra.mxu2 %vm200_vm3, %v2902_v53  ;;  %4512 = vmatmul.msk.bf16.vlgmr.msra.gmra.mxu0 %vm200_vm3, %v2902_v53 }
0x28c1   :  { %3205 = vmatpush.bf16.msra.mxu2 %v6244_v57  ;;  %3302 = vmatpush.bf16.msra.mxu0 %v6195_v6 }
0x28c3   :  { %v2935_v15 = vpop.permute.xlu1 %2934 }
0x28c4   :  { %4513 = vmatmul.msk.bf16.vlgmr.msra.gmra.mxu1 %vm200_vm3, %v2935_v15 }
0x28c5   :  { %3206 = vmatpush.bf16.msra.mxu2 %v6250_v58  ;;  %3315 = vmatpush.bf16.msra.mxu1 %v6184_v1 }
0x28c6   :  { %3303 = vmatpush.bf16.msra.mxu0 %v6208_v8 }
0x28c9   :  { %3316 = vmatpush.bf16.msra.mxu1 %v6204_v7 }
0x293d   :  { %v2928_v18 = vpop.f32.mrf.mxu0 }
0x293e   :  { %v2991_v19 = vadd.f32 %v2928_v18, %v6169_v39 }
0x2940   :  { %5380 = vtanh.f32 %v2991_v19  ;;  %v4515_v7 = vmul.f32 -1.442695, %v2991_v19 }
0x2941   :  { %v2948_v20 = vpop.f32.mrf.mxu1 }
0x2943   :  { %v2915_v22 = vpop.f32.mrf.mxu2 }
0x2944   :  { %v2952_v40 = vadd.f32 %v2948_v20, %v2915_v22 }
0x2945   :  { %v2930_v24 = vpop.f32.mrf.mxu0 }
0x2946   :  { %v5381_v28 = vpop.eup %5380  ;;  %v2953_v36 = vadd.f32 %v6229_v16, %v2952_v40 }
0x2947   :  { %3014 = vrot.lane.b32.xlu2 %v5381_v28, %s5491_s4 }
0x2948   :  { %5382 = vtanh.f32 %v2953_v36  ;;  %v4514_v31 = vmul.f32 -1.442695, %v2953_v36 }
0x2949   :  { %v2950_v34 = vpop.f32.mrf.mxu1  ;;  %5384 = vpow2.f32 %v4515_v7 }
0x294b   :  { %v2917_v1 = vpop.f32.mrf.mxu2 }
0x294e   :  { %v5383_v25 = vpop.eup %5382 }
0x294f   :  { %2976 = vrot.lane.b32.xlu0 %v5383_v25, %s5491_s4  ;;  %v5385_v2 = vpop.eup %5384 }
0x2950   :  { %v2995_v59 = vadd.f32 1.0, %v5385_v2 }
0x2952   :  { %5386 = vrcp.f32 %v2995_v59  ;;  %v3007_v33 = vand.u32 2147483648, %v2995_v59  ;;  %vm3001_vm7 = vweird.f32 %v2995_v59  ;;  %v3005_v50 = vand.u32 2147483647, %v2995_v59 }
0x2953   :  { %5388 = vpow2.f32 %v4514_v31 }
0x2954   :  { %v3008_v48 = vor.u32 1.1754944e-38, %v3007_v33  ;;  %vm3006_vm9 = vcmp.eq.f32.partialorder %v3005_v50, 8.507059e+37 }
0x2958   :  { %v5387_v26 = vpop.eup %5386 }
0x2959   :  { %v2997_v29 = vmul.f32 %v5387_v26, %v2995_v59  ;;  %vm3002_vm5 = vweird.f32 %v5387_v26  ;;  %v5389_v54 = vpop.eup %5388 }
0x295a   :  { %vm3003_vm8 = vmor %vm3001_vm7, %vm3002_vm5  ;;  %v2957_v37 = vadd.f32 1.0, %v5389_v54 }
0x295b   :  { %v2998_v47 = vsub.f32 1.0, %v2997_v29 }
0x295c   :  { %5390 = vrcp.f32 %v2957_v37  ;;  %v2969_v43 = vand.u32 2147483648, %v2957_v37  ;;  %vm2963_vm11 = vweird.f32 %v2957_v37  ;;  %v2967_v44 = vand.u32 2147483647, %v2957_v37 }
0x295d   :  { %v2999_v62 = vmul.f32 %v5387_v26, %v2998_v47 }
0x295e   :  { %v2970_v45 = vor.u32 1.1754944e-38, %v2969_v43  ;;  %vm2968_vm13 = vcmp.eq.f32.partialorder %v2967_v44, 8.507059e+37 }
0x295f   :  { %v3000_v21 = vadd.f32 %v5387_v26, %v2999_v62 }
0x2961   :  { %v3004_v63 = vsel %vm3003_vm8, %v5387_v26, %v3000_v21 }
0x2962   :  { %v3009_v61 = vsel %vm3006_vm9, %v3008_v48, %v3004_v63  ;;  %v5391_v41 = vpop.eup %5390 }
0x2963   :  { %v2959_v55 = vmul.f32 %v5391_v41, %v2957_v37  ;;  %vm2964_vm10 = vweird.f32 %v5391_v41  ;;  %v3012_v60 = vmul.f32 %v3009_v61, %v6309_v0 }
0x2964   :  { %vm2965_vm12 = vmor %vm2963_vm11, %vm2964_vm10 }
0x2965   :  { %v2960_v56 = vsub.f32 1.0, %v2959_v55 }
0x2967   :  { %v2961_v52 = vmul.f32 %v5391_v41, %v2960_v56 }
0x2969   :  { %v2962_v42 = vadd.f32 %v5391_v41, %v2961_v52 }
0x296b   :  { %v2966_v32 = vsel %vm2965_vm12, %v5391_v41, %v2962_v42 }
0x296c   :  { %v2971_v46 = vsel %vm2968_vm13, %v2970_v45, %v2966_v32 }
0x296d   :  { %v2974_v30 = vmul.f32 %v2971_v46, %v6314_v27 }
0x29a1   :  { %v3015_v38 = vpop.permute.xlu2 %3014 }
0x29a2   :  { %v3017_v51 = vmul.f32 %v3015_v38, %v3009_v61 }
0x29a4   :  { %3019 = vrot.lane.b32.xlu1 %v3017_v51, %s5497_s11 }
0x29c1   :  { %v2977_v35 = vpop.permute.xlu0 %2976 }
0x29c2   :  { %v2979_v23 = vmul.f32 %v2977_v35, %v2971_v46 }
0x29c4   :  { %2981 = vrot.lane.b32.xlu2 %v2979_v23, %s5497_s11 }
0x2a16   :  { %v3020_v17 = vpop.permute.xlu1 %3019 }
0x2a17   :  { %v6340_v4 = vadd.f32 %v3020_v17, %v3012_v60 }
0x2a19   :  { %5392 = vtanh.f32 %v6340_v4 }
0x2a1e   :  { %v2982_v5 = vpop.permute.xlu2 %2981 }
0x2a1f   :  { %v5393_v9 = vpop.eup %5392  ;;  %v6344_v13 = vadd.f32 %v2982_v5, %v2974_v30 }
0x2a20   :  { %3025 = vrot.lane.b32.xlu0 %v5393_v9, %s5491_s4 }
0x2a21   :  { %5394 = vtanh.f32 %v6344_v13 }
0x2a27   :  { %v5395_v10 = vpop.eup %5394 }
0x2a28   :  { %2987 = vrot.lane.b32.xlu1 %v5395_v10, %s5491_s4 }
0x2a92   :  { %v3026_v11 = vpop.permute.xlu0 %3025 }
0x2a93   :  { %v3028_v0 = vmul.f32 %v3026_v11, %v3009_v61 }
0x2a95   :  { %v3029_v14 = vpack.c.bf16 %v3028_v0, %v3028_v0 }
0x2a97   :  { %3031 = vrot.lane.b32.xlu2 %v3029_v14, %s5497_s11 }
0x2a9a   :  { %v2988_v53 = vpop.permute.xlu1 %2987 }
0x2a9b   :  { %v6350_v15 = vmul.f32 %v2988_v53, %v2971_v46 }
0x2a9d   :  { %v3062_v27 = vpack.c.bf16 %v6350_v15, %v6350_v15 }
0x2a9f   :  { %3064 = vrot.lane.b32.xlu0 %v3062_v27, %s5497_s11 }
0x2af1   :  { %v3032_v18 = vpop.permute.xlu2 %3031 }
0x2af2   :  { %4516 = vmatmul.msk.bf16.vlgmr.msrb.gmra.mxu3 %vm200_vm3, %v3032_v18  ;;  %4517 = vmatmul.msk.bf16.vlgmr.msrb.gmra.mxu2 %vm200_vm3, %v3032_v18 }
0x2af3   :  { %3335 = vmatpush.bf16.msrb.mxu3 %v6244_v57  ;;  %3432 = vmatpush.bf16.msrb.mxu2 %v6195_v6 }
0x2af7   :  { %3336 = vmatpush.bf16.msrb.mxu3 %v6250_v58  ;;  %3433 = vmatpush.bf16.msrb.mxu2 %v6208_v8 }
0x2b11   :  { %v3065_v19 = vpop.permute.xlu0 %3064 }
0x2b12   :  { %4518 = vmatmul.msk.bf16.vlgmr.msrb.gmra.mxu0 %vm200_vm3, %v3065_v19 }
0x2b13   :  { %3452 = vmatpush.bf16.msrb.mxu0 %v6244_v57 }
0x2b17   :  { %3453 = vmatpush.bf16.msrb.mxu0 %v6250_v58 }
0x2b75   :  { %v3045_v20 = vpop.f32.mrf.mxu3  ;;  %v3058_v22 = vpop.f32.mrf.mxu2 }
0x2b76   :  { %v3121_v40 = vadd.f32 %v3058_v22, %v6169_v39 }
0x2b78   :  { %5396 = vtanh.f32 %v3121_v40  ;;  %v4520_v57 = vmul.f32 -1.442695, %v3121_v40 }
0x2b7d   :  { %v3047_v24 = vpop.f32.mrf.mxu3  ;;  %v3060_v28 = vpop.f32.mrf.mxu2 }
0x2b7e   :  { %v5397_v36 = vpop.eup %5396 }
0x2b7f   :  { %3144 = vrot.lane.b32.xlu2 %v5397_v36, %s5491_s4 }
0x2b8f   :  { %v3078_v6 = vpop.f32.mrf.mxu0 }
0x2b90   :  { %v3082_v34 = vadd.f32 %v3078_v6, %v3045_v20 }
0x2b92   :  { %v3083_v8 = vadd.f32 %v6229_v16, %v3082_v34 }
0x2b94   :  { %5398 = vtanh.f32 %v3083_v8  ;;  %v4519_v48 = vmul.f32 -1.442695, %v3083_v8 }
0x2b95   :  { %5400 = vpow2.f32 %v4520_v57 }
0x2b97   :  { %v3080_v1 = vpop.f32.mrf.mxu0 }
0x2b9a   :  { %v5399_v25 = vpop.eup %5398 }
0x2b9b   :  { %3106 = vrot.lane.b32.xlu1 %v5399_v25, %s5491_s4  ;;  %v5401_v58 = vpop.eup %5400 }
0x2b9c   :  { %v3125_v7 = vadd.f32 1.0, %v5401_v58 }
0x2b9e   :  { %5402 = vrcp.f32 %v3125_v7  ;;  %v3137_v31 = vand.u32 2147483648, %v3125_v7  ;;  %vm3131_vm15 = vweird.f32 %v3125_v7  ;;  %v3135_v62 = vand.u32 2147483647, %v3125_v7 }
0x2b9f   :  { %5404 = vpow2.f32 %v4519_v48 }
0x2ba0   :  { %v3138_v33 = vor.u32 1.1754944e-38, %v3137_v31  ;;  %vm3136_vm2 = vcmp.eq.f32.partialorder %v3135_v62, 8.507059e+37 }
0x2ba4   :  { %v5403_v2 = vpop.eup %5402 }
0x2ba5   :  { %v3127_v59 = vmul.f32 %v5403_v2, %v3125_v7  ;;  %vm3132_vm14 = vweird.f32 %v5403_v2  ;;  %v5405_v37 = vpop.eup %5404 }
0x2ba6   :  { %vm3133_vm0 = vmor %vm3131_vm15, %vm3132_vm14  ;;  %v3087_v38 = vadd.f32 1.0, %v5405_v37 }
0x2ba7   :  { %v3128_v26 = vsub.f32 1.0, %v3127_v59 }
0x2ba8   :  { %5406 = vrcp.f32 %v3087_v38  ;;  %v3099_v52 = vand.u32 2147483648, %v3087_v38  ;;  %vm3093_vm6 = vweird.f32 %v3087_v38  ;;  %v3097_v42 = vand.u32 2147483647, %v3087_v38 }
0x2ba9   :  { %v3129_v29 = vmul.f32 %v5403_v2, %v3128_v26 }
0x2baa   :  { %v3100_v44 = vor.u32 1.1754944e-38, %v3099_v52  ;;  %vm3098_vm7 = vcmp.eq.f32.partialorder %v3097_v42, 8.507059e+37 }
0x2bab   :  { %v3130_v47 = vadd.f32 %v5403_v2, %v3129_v29 }
0x2bad   :  { %v3134_v21 = vsel %vm3133_vm0, %v5403_v2, %v3130_v47 }
0x2bae   :  { %v3139_v54 = vsel %vm3136_vm2, %v3138_v33, %v3134_v21  ;;  %v5407_v61 = vpop.eup %5406 }
0x2baf   :  { %v3089_v51 = vmul.f32 %v5407_v61, %v3087_v38  ;;  %vm3094_vm4 = vweird.f32 %v5407_v61  ;;  %v3142_v46 = vmul.f32 %v3139_v54, %v6340_v4 }
0x2bb0   :  { %vm3095_vm5 = vmor %vm3093_vm6, %vm3094_vm4 }
0x2bb1   :  { %v3090_v41 = vsub.f32 1.0, %v3089_v51 }
0x2bb3   :  { %v3091_v55 = vmul.f32 %v5407_v61, %v3090_v41 }
0x2bb5   :  { %v3092_v56 = vadd.f32 %v5407_v61, %v3091_v55 }
0x2bb7   :  { %v3096_v43 = vsel %vm3095_vm5, %v5407_v61, %v3092_v56 }
0x2bb8   :  { %v3101_v45 = vsel %vm3098_vm7, %v3100_v44, %v3096_v43 }
0x2bb9   :  { %v3104_v30 = vmul.f32 %v3101_v45, %v6344_v13 }
0x2bd9   :  { %v3145_v50 = vpop.permute.xlu2 %3144 }
0x2bda   :  { %v3147_v63 = vmul.f32 %v3145_v50, %v3139_v54 }
0x2bdc   :  { %3149 = vrot.lane.b32.xlu1 %v3147_v63, %s5497_s11 }
0x2c0d   :  { %v3107_v32 = vpop.permute.xlu1 %3106 }
0x2c0e   :  { %v3109_v35 = vmul.f32 %v3107_v32, %v3101_v45 }
0x2c10   :  { %3111 = vrot.lane.b32.xlu0 %v3109_v35, %s5497_s11 }
0x2c4e   :  { %v3150_v23 = vpop.permute.xlu1 %3149 }
0x2c4f   :  { %v6371_v60 = vadd.f32 %v3150_v23, %v3142_v46 }
0x2c51   :  { %5408 = vtanh.f32 %v6371_v60 }
0x2c57   :  { %v5409_v17 = vpop.eup %5408 }
0x2c58   :  { %3155 = vrot.lane.b32.xlu0 %v5409_v17, %s5491_s4 }
0x2c82   :  { %v3112_v5 = vpop.permute.xlu0 %3111 }
0x2c83   :  { %v6376_v9 = vadd.f32 %v3112_v5, %v3104_v30 }
0x2c85   :  { %5410 = vtanh.f32 %v6376_v9 }
0x2c8b   :  { %v5411_v10 = vpop.eup %5410 }
0x2c8c   :  { %3117 = vrot.lane.b32.xlu2 %v5411_v10, %s5491_s4 }
0x2cca   :  { %v3156_v11 = vpop.permute.xlu0 %3155 }
0x2ccb   :  { %v3158_v4 = vmul.f32 %v3156_v11, %v3139_v54 }
0x2ccd   :  { %v3159_v0 = vpack.c.bf16 %v3158_v4, %v3158_v4 }
0x2ccf   :  { %3161 = vrot.lane.b32.xlu2 %v3159_v0, %s5497_s11 }
0x2ce6   :  { %v3118_v14 = vpop.permute.xlu2 %3117 }
0x2ce7   :  { %v6381_v53 = vmul.f32 %v3118_v14, %v3101_v45 }
0x2ce9   :  { %v3192_v27 = vpack.c.bf16 %v6381_v53, %v6381_v53 }
0x2ceb   :  { %3194 = vrot.lane.b32.xlu1 %v3192_v27, %s5497_s11 }
0x2d29   :  { %v3162_v13 = vpop.permute.xlu2 %3161 }
0x2d2a   :  { %4521 = vmatmul.msk.bf16.vlgmr.msrb.gmra.mxu1 %vm200_vm3, %v3162_v13  ;;  %4522 = vmatmul.msk.bf16.vlgmr.msra.gmra.mxu3 %vm200_vm3, %v3162_v13 }
0x2d5d   :  { %v3195_v18 = vpop.permute.xlu1 %3194 }
0x2d5e   :  { %4523 = vmatmul.msk.bf16.vlgmr.msra.gmra.mxu2 %vm200_vm3, %v3195_v18 }
0x2da7   :  { %v3175_v19 = vpop.f32.mrf.mxu1 }
0x2dad   :  { %v3188_v20 = vpop.f32.mrf.mxu3 }
0x2dae   :  { %v3251_v22 = vadd.f32 %v3188_v20, %v6169_v39 }
0x2daf   :  { %v3177_v40 = vpop.f32.mrf.mxu1 }
0x2db0   :  { %5412 = vtanh.f32 %v3251_v22  ;;  %v4525_v25 = vmul.f32 -1.442695, %v3251_v22 }
0x2db5   :  { %v3190_v24 = vpop.f32.mrf.mxu3 }
0x2db6   :  { %v5413_v28 = vpop.eup %5412 }
0x2db7   :  { %3274 = vrot.lane.b32.xlu1 %v5413_v28, %s5491_s4 }
0x2de1   :  { %v3208_v36 = vpop.f32.mrf.mxu2 }
0x2de2   :  { %v3212_v6 = vadd.f32 %v3208_v36, %v3175_v19 }
0x2de4   :  { %v3213_v34 = vadd.f32 %v6229_v16, %v3212_v6 }
0x2de6   :  { %5414 = vtanh.f32 %v3213_v34  ;;  %v4524_v54 = vmul.f32 -1.442695, %v3213_v34  ;;  %v6419_v34 = vld [vmem:[%s6514_s22] ss:$0 sm:$0xff] }
0x2de7   :  { %5416 = vpow2.f32 %v4525_v25 }
0x2de9   :  { %v3210_v8 = vpop.f32.mrf.mxu2 }
0x2dec   :  { %v5415_v1 = vpop.eup %5414 }
0x2ded   :  { %3236 = vrot.lane.b32.xlu0 %v5415_v1, %s5491_s4  ;;  %v5417_v57 = vpop.eup %5416 }
0x2dee   :  { %v3255_v58 = vadd.f32 1.0, %v5417_v57 }
0x2df0   :  { %5418 = vrcp.f32 %v3255_v58  ;;  %v3267_v47 = vand.u32 2147483648, %v3255_v58  ;;  %vm3261_vm9 = vweird.f32 %v3255_v58  ;;  %v3265_v31 = vand.u32 2147483647, %v3255_v58 }
0x2df1   :  { %5420 = vpow2.f32 %v4524_v54 }
0x2df2   :  { %v3268_v62 = vor.u32 1.1754944e-38, %v3267_v47  ;;  %vm3266_vm11 = vcmp.eq.f32.partialorder %v3265_v31, 8.507059e+37 }
0x2df6   :  { %v5419_v7 = vpop.eup %5418 }
0x2df7   :  { %v3257_v2 = vmul.f32 %v5419_v7, %v3255_v58  ;;  %vm3262_vm8 = vweird.f32 %v5419_v7  ;;  %v5421_v63 = vpop.eup %5420 }
0x2df8   :  { %vm3263_vm10 = vmor %vm3261_vm9, %vm3262_vm8  ;;  %v3217_v48 = vadd.f32 1.0, %v5421_v63 }
0x2df9   :  { %v3258_v59 = vsub.f32 1.0, %v3257_v2 }
0x2dfa   :  { %5422 = vrcp.f32 %v3217_v48  ;;  %v3229_v55 = vand.u32 2147483648, %v3217_v48  ;;  %vm3223_vm13 = vweird.f32 %v3217_v48  ;;  %v3227_v56 = vand.u32 2147483647, %v3217_v48 }
0x2dfb   :  { %v3259_v26 = vmul.f32 %v5419_v7, %v3258_v59 }
0x2dfc   :  { %v3230_v42 = vor.u32 1.1754944e-38, %v3229_v55  ;;  %vm3228_vm15 = vcmp.eq.f32.partialorder %v3227_v56, 8.507059e+37 }
0x2dfd   :  { %v3260_v29 = vadd.f32 %v5419_v7, %v3259_v26 }
0x2dff   :  { %v3264_v16 = vsel %vm3263_vm10, %v5419_v7, %v3260_v29 }
0x2e00   :  { %v3269_v33 = vsel %vm3266_vm11, %v3268_v62, %v3264_v16  ;;  %v5423_v37 = vpop.eup %5422 }
0x2e01   :  { %v3219_v38 = vmul.f32 %v5423_v37, %v3217_v48  ;;  %vm3224_vm12 = vweird.f32 %v5423_v37  ;;  %v3272_v45 = vmul.f32 %v3269_v33, %v6371_v60 }
0x2e02   :  { %vm3225_vm14 = vmor %vm3223_vm13, %vm3224_vm12 }
0x2e03   :  { %v3220_v61 = vsub.f32 1.0, %v3219_v38 }
0x2e05   :  { %v3221_v51 = vmul.f32 %v5423_v37, %v3220_v61 }
0x2e07   :  { %v3222_v41 = vadd.f32 %v5423_v37, %v3221_v51 }
0x2e09   :  { %v3226_v52 = vsel %vm3225_vm14, %v5423_v37, %v3222_v41  ;;  %vm3523_vm14 = vcmask 523264  }
0x2e0a   :  { %v3231_v44 = vsel %vm3228_vm15, %v3230_v42, %v3226_v52  ;;  %vm3525_vm15 = vcmask 785408  }
0x2e0b   :  { %v3234_v17 = vmul.f32 %v3231_v44, %v6376_v9 }
0x2e29   :  { %v3275_v21 = vpop.permute.xlu1 %3274 }
0x2e2a   :  { %v3277_v50 = vmul.f32 %v3275_v21, %v3269_v33 }
0x2e2c   :  { %3279 = vrot.lane.b32.xlu0 %v3277_v50, %s5497_s11 }
0x2e5f   :  { %v3237_v43 = vpop.permute.xlu0 %3236 }
0x2e60   :  { %v3239_v32 = vmul.f32 %v3237_v43, %v3231_v44 }
0x2e62   :  { %3241 = vrot.lane.b32.xlu2 %v3239_v32, %s5497_s11 }
0x2e9e   :  { %v3280_v35 = vpop.permute.xlu0 %3279 }
0x2e9f   :  { %v6396_v46 = vadd.f32 %v3280_v35, %v3272_v45 }
0x2ea1   :  { %5424 = vtanh.f32 %v6396_v46 }
0x2ea7   :  { %v5425_v23 = vpop.eup %5424 }
0x2ea8   :  { %3285 = vrot.lane.b32.xlu2 %v5425_v23, %s5491_s4 }
0x2ebc   :  { %v3242_v30 = vpop.permute.xlu2 %3241 }
0x2ebd   :  { %v6401_v5 = vadd.f32 %v3242_v30, %v3234_v17 }
0x2ebf   :  { %5426 = vtanh.f32 %v6401_v5 }
0x2ec5   :  { %v5427_v10 = vpop.eup %5426 }
0x2ec6   :  { %3247 = vrot.lane.b32.xlu1 %v5427_v10, %s5491_s4 }
0x2f02   :  { %v3286_v11 = vpop.permute.xlu2 %3285 }
0x2f03   :  { %v3288_v60 = vmul.f32 %v3286_v11, %v3269_v33 }
0x2f05   :  { %v3289_v4 = vpack.c.bf16 %v3288_v60, %v3288_v60 }
0x2f07   :  { %3291 = vrot.lane.b32.xlu1 %v3289_v4, %s5497_s11 }
0x2f38   :  { %v3248_v0 = vpop.permute.xlu1 %3247 }
0x2f39   :  { %v6406_v14 = vmul.f32 %v3248_v0, %v3231_v44 }
0x2f3b   :  { %v3322_v27 = vpack.c.bf16 %v6406_v14, %v6406_v14 }
0x2f3d   :  { %3324 = vrot.lane.b32.xlu0 %v3322_v27, %s5497_s11 }
0x2f79   :  { %v3292_v9 = vpop.permute.xlu1 %3291 }
0x2f7a   :  { %4526 = vmatmul.msk.bf16.vlgmr.msra.gmra.mxu0 %vm200_vm3, %v3292_v9  ;;  %4527 = vmatmul.msk.bf16.vlgmr.msra.gmra.mxu1 %vm200_vm3, %v3292_v9 }
0x2faf   :  { %v3325_v13 = vpop.permute.xlu0 %3324 }
0x2fb0   :  { %4528 = vmatmul.msk.bf16.vlgmr.msrb.gmra.mxu3 %vm200_vm3, %v3325_v13 }
0x2ff7   :  { %v3305_v18 = vpop.f32.mrf.mxu0  ;;  %v3318_v19 = vpop.f32.mrf.mxu1 }
0x2ff8   :  { %v3381_v20 = vadd.f32 %v3318_v19, %v6169_v39 }
0x2ffa   :  { %5428 = vtanh.f32 %v3381_v20  ;;  %v4530_v28 = vmul.f32 -1.442695, %v3381_v20 }
0x2ffc   :  { %5430 = vpow2.f32 %v4530_v28 }
0x2fff   :  { %v3307_v22 = vpop.f32.mrf.mxu0  ;;  %v3320_v40 = vpop.f32.mrf.mxu1 }
0x3000   :  { %v5429_v24 = vpop.eup %5428 }
0x3001   :  { %3404 = vrot.lane.b32.xlu2 %v5429_v24, %s5491_s4 }
0x3002   :  { %v5431_v1 = vpop.eup %5430 }
0x3003   :  { %v3385_v39 = vadd.f32 1.0, %v5431_v1 }
0x3005   :  { %v3397_v29 = vand.u32 2147483648, %v3385_v39  ;;  %vm3391_vm2 = vweird.f32 %v3385_v39  ;;  %v3395_v47 = vand.u32 2147483647, %v3385_v39 }
0x3007   :  { %v3398_v16 = vor.u32 1.1754944e-38, %v3397_v29  ;;  %vm3396_vm6 = vcmp.eq.f32.partialorder %v3395_v47, 8.507059e+37  ;;  %v5080_v47 = vpack.i.bf16 %v6406_v14, %v6287_v3 }
0x3033   :  { %v3338_v36 = vpop.f32.mrf.mxu3 }
0x3034   :  { %v3342_v6 = vadd.f32 %v3338_v36, %v3305_v18  ;;  %v5075_v36 = vpack.i.bf16 %v6381_v53, %v6236_v49 }
0x3036   :  { %v3343_v8 = vadd.f32 %v6419_v34, %v3342_v6 }
0x3038   :  { %5432 = vtanh.f32 %v3343_v8  ;;  %v4529_v50 = vmul.f32 -1.442695, %v3343_v8 }
0x3039   :  { %5434 = vrcp.f32 %v3385_v39 }
0x303a   :  { %5436 = vpow2.f32 %v4529_v50  ;;  %v4988_v50 = vld [vmem:[#allocation2 + $0x154] sm:$0xf] }
0x303b   :  { %v3340_v25 = vpop.f32.mrf.mxu3 }
0x303e   :  { %v5433_v57 = vpop.eup %5432 }
0x303f   :  { %3366 = vrot.lane.b32.xlu0 %v5433_v57, %s5491_s4  ;;  %v5435_v58 = vpop.eup %5434 }
0x3040   :  { %v3387_v7 = vmul.f32 %v5435_v58, %v3385_v39  ;;  %vm3392_vm0 = vweird.f32 %v5435_v58  ;;  %v5437_v54 = vpop.eup %5436 }
0x3041   :  { %vm3393_vm4 = vmor %vm3391_vm2, %vm3392_vm0  ;;  %v3347_v63 = vadd.f32 1.0, %v5437_v54  ;;  %v4706_v54 = vld [vmem:[#allocation2 + $0x168] sm:$0xf0]  ;;  %vm4290_vm0 = vcmask 1045508  }
0x3042   :  { %v3388_v2 = vsub.f32 1.0, %v3387_v7 }
0x3043   :  { %5438 = vrcp.f32 %v3347_v63  ;;  %v3359_v41 = vand.u32 2147483648, %v3347_v63  ;;  %vm3353_vm7 = vweird.f32 %v3347_v63  ;;  %v3357_v55 = vand.u32 2147483647, %v3347_v63 }
0x3044   :  { %v3389_v59 = vmul.f32 %v5435_v58, %v3388_v2 }
0x3045   :  { %v3360_v52 = vor.u32 1.1754944e-38, %v3359_v41  ;;  %vm3358_vm9 = vcmp.eq.f32.partialorder %v3357_v55, 8.507059e+37  ;;  %v4985_v41 = vld [vmem:[#allocation2 + $0x134] sm:$0xf0]  ;;  %v4872_v55 = vld [vmem:[#allocation2 + $0x2a0] sm:$0xf] }
0x3046   :  { %v3390_v26 = vadd.f32 %v5435_v58, %v3389_v59 }
0x3048   :  { %v3394_v31 = vsel %vm3393_vm4, %v5435_v58, %v3390_v26 }
0x3049   :  { %v3399_v21 = vsel %vm3396_vm6, %v3398_v16, %v3394_v31  ;;  %v5439_v48 = vpop.eup %5438  ;;  %v4704_v31 = vld [vmem:[#allocation2 + $0x150] sm:$0xf]  ;;  %v4991_v16 = vld [vmem:[#allocation2 + $0x164] sm:$0xf0] }
0x304a   :  { %v3349_v37 = vmul.f32 %v5439_v48, %v3347_v63  ;;  %vm3354_vm5 = vweird.f32 %v5439_v48  ;;  %v3402_v32 = vmul.f32 %v3399_v21, %v6396_v46 }
0x304b   :  { %vm3355_vm8 = vmor %vm3353_vm7, %vm3354_vm5 }
0x304c   :  { %v3350_v38 = vsub.f32 1.0, %v3349_v37  ;;  %v5036_v37 = vld [vmem:[#allocation2 + $0x2d4] sm:$0xf] }
0x304e   :  { %v3351_v61 = vmul.f32 %v5439_v48, %v3350_v38  ;;  %v4898_v38 = vld [vmem:[#allocation2 + $0x2e8] sm:$0xf0] }
0x3050   :  { %v3352_v51 = vadd.f32 %v5439_v48, %v3351_v61  ;;  %v4680_v61 = vld [vmem:[#allocation2 + $0x120] sm:$0xf] }
0x3051   :  { %v4681_v3 = vor.u32 %v4985_v41, %v4680_v61  ;;  %v4560_v41 = vld [vmem:[#allocation2 + $0x30] sm:$0xf] }
0x3052   :  { %v3356_v56 = vsel %vm3355_vm8, %v5439_v48, %v3352_v51  ;;  %v4709_v48 = vor.u32 %v4988_v50, %v4706_v54  ;;  %v4901_v51 = vor.u32 %v5036_v37, %v4898_v38  ;;  %v4776_v50 = vld [vmem:[#allocation2 + $0x1e0] sm:$0xf]  ;;  %v5009_v54 = vld [vmem:[#allocation2 + $0x1f4] sm:$0xf0]  ;;  %v5006_v37 = vld [vmem:[#allocation2 + $0x1e4] sm:$0xf] }
0x3053   :  { %v3361_v43 = vsel %vm3358_vm9, %v3360_v52, %v3356_v56  ;;  %v5033_v56 = vld [vmem:[#allocation2 + $0x2b4] sm:$0xf0]  ;;  %v4982_v52 = vld [vmem:[#allocation2 + $0x124] sm:$0xf]  ;;  %v4778_v38 = vld [vmem:[#allocation2 + $0x1f8] sm:$0xf0] }
0x3054   :  { %v3364_v17 = vmul.f32 %v3361_v43, %v6401_v5  ;;  %4148 = vmatpush.bf16.msra.mxu2 %v4709_v48  ;;  %v4873_v14 = vor.u32 %v5033_v56, %v4872_v55  ;;  %4161 = vmatpush.bf16.msra.mxu0 %v4901_v51  ;;  %v4586_v48 = vld [vmem:[#allocation2 + $0x78] sm:$0xf0]  ;;  %v4777_v51 = vor.u32 %v5009_v54, %v4776_v50  ;;  %v4955_v55 = vld [vmem:[#allocation2 + $0x44] sm:$0xf0]  ;;  %v4856_v50 = vld [vmem:[#allocation2 + $0x278] sm:$0xf] }
0x3055   :  { %v5028_v54 = vld [vmem:[#allocation2 + $0x28c] sm:$0xf0] }
0x305b   :  { %v3405_v62 = vpop.permute.xlu2 %3404 }
0x305c   :  { %v3407_v33 = vmul.f32 %v3405_v62, %v3399_v21  ;;  %v4896_v62 = vld [vmem:[#allocation2 + $0x2d0] sm:$0xf] }
0x305e   :  { %3409 = vrot.lane.b32.xlu1 %v3407_v33, %s5497_s11  ;;  %v5039_v33 = vld [vmem:[#allocation2 + $0x2e4] sm:$0xf0] }
0x305f   :  { %v4897_v63 = vor.u32 %v5039_v33, %v4896_v62  ;;  %v4961_v33 = vld [vmem:[#allocation2 + $0x74] sm:$0xf0] }
0x3061   :  { %4135 = vmatpush.bf16.msra.mxu3 %v4897_v63  ;;  %v4958_v63 = vld [vmem:[#allocation2 + $0x64] sm:$0xf] }
0x3062   :  { %v4589_v56 = vor.u32 %v4958_v63, %v4586_v48  ;;  %v4977_v63 = vld [vmem:[#allocation2 + $0xfc] sm:$0xf]  ;;  %v4666_v48 = vld [vmem:[#allocation2 + $0x110] sm:$0xf0] }
0x3065   :  { %4136 = vmatpush.bf16.msra.mxu3 %v4873_v14  ;;  %v4752_v14 = vld [vmem:[#allocation2 + $0x1b0] sm:$0xf] }
0x30b1   :  { %v3367_v42 = vpop.permute.xlu0 %3366 }
0x30b2   :  { %v3369_v44 = vmul.f32 %v3367_v42, %v3361_v43  ;;  %v4682_v42 = vld [vmem:[#allocation2 + $0x138] sm:$0xf0] }
0x30b4   :  { %3371 = vrot.lane.b32.xlu2 %v3369_v44, %s5497_s11  ;;  %v4685_v44 = vor.u32 %v4982_v52, %v4682_v42  ;;  %v5003_v52 = vld [vmem:[#allocation2 + $0x1c4] sm:$0xf0]  ;;  %v4952_v42 = vld [vmem:[#allocation2 + $0x34] sm:$0xf] }
0x30b6   :  { %4149 = vmatpush.bf16.msra.mxu2 %v4685_v44  ;;  %v5000_v44 = vld [vmem:[#allocation2 + $0x1b4] sm:$0xf] }
0x30d0   :  { %v3410_v45 = vpop.permute.xlu1 %3409 }
0x30d1   :  { %v3412_v35 = vadd.f32 %v3410_v45, %v3402_v32  ;;  %v4874_v32 = vld [vmem:[#allocation2 + $0x2b8] sm:$0xf0]  ;;  %v4656_v45 = vld [vmem:[#allocation2 + $0xf0] sm:$0xf] }
0x30d3   :  { %5440 = vtanh.f32 %v3412_v35  ;;  %v4979_v35 = vld [vmem:[#allocation2 + $0x104] sm:$0xf0] }
0x30d9   :  { %v5441_v23 = vpop.eup %5440 }
0x30da   :  { %3415 = vrot.lane.b32.xlu0 %v5441_v23, %s5491_s4 }
0x310e   :  { %v3372_v30 = vpop.permute.xlu2 %3371 }
0x310f   :  { %v6428_v10 = vadd.f32 %v3372_v30, %v3364_v17  ;;  %v4848_v17 = vld [vmem:[#allocation2 + $0x270] sm:$0xf]  ;;  %v5027_v30 = vld [vmem:[#allocation2 + $0x284] sm:$0xf0] }
0x3111   :  { %5442 = vtanh.f32 %v6428_v10 }
0x3117   :  { %v5443_v11 = vpop.eup %5442 }
0x3118   :  { %3377 = vrot.lane.b32.xlu1 %v5443_v11, %s5491_s4  ;;  %v4976_v11 = vld [vmem:[#allocation2 + $0xf4] sm:$0xf] }
0x314c   :  { %v3416_v60 = vpop.permute.xlu0 %3415 }
0x314d   :  { %v3418_v4 = vmul.f32 %v3416_v60, %v3399_v21  ;;  %v4705_v21 = vor.u32 %v4991_v16, %v4704_v31  ;;  %v4657_v60 = vor.u32 %v4979_v35, %v4656_v45  ;;  %v4561_v35 = vor.u32 %v4955_v55, %v4560_v41  ;;  %v4640_v41 = vld [vmem:[#allocation2 + $0xc8] sm:$0xf]  ;;  %v4974_v55 = vld [vmem:[#allocation2 + $0xdc] sm:$0xf0] }
0x314f   :  { %v3419_v0 = vpack.c.bf16 %v3418_v4, %v3418_v4  ;;  %4122 = vmatpush.bf16.msrb.mxu1 %v4705_v21  ;;  %v4658_v4 = vld [vmem:[#allocation2 + $0x108] sm:$0xf0]  ;;  %v4584_v21 = vld [vmem:[#allocation2 + $0x60] sm:$0xf] }
0x3150   :  { %v4585_v61 = vor.u32 %v4961_v33, %v4584_v21  ;;  %v4980_v21 = vld [vmem:[#allocation2 + $0x10c] sm:$0xf0] }
0x3151   :  { %3421 = vrot.lane.b32.xlu2 %v3419_v0, %s5497_s11  ;;  %v5024_v0 = vld [vmem:[#allocation2 + $0x274] sm:$0xf] }
0x3153   :  { %4123 = vmatpush.bf16.msrb.mxu1 %v4681_v3  ;;  %v4781_v3 = vor.u32 %v5006_v37, %v4778_v38  ;;  %v5025_v37 = vld [vmem:[#allocation2 + $0x27c] sm:$0xf]  ;;  %v4858_v38 = vld [vmem:[#allocation2 + $0x290] sm:$0xf0] }
0x3157   :  { %4124 = vmatpush.bf16.msrb.mxu1 %v4657_v60  ;;  %v4997_v60 = vld [vmem:[#allocation2 + $0x194] sm:$0xf0] }
0x318a   :  { %v3378_v46 = vpop.permute.xlu1 %3377 }
0x318b   :  { %v6433_v27 = vmul.f32 %v3378_v46, %v3361_v43  ;;  %v5030_v43 = vld [vmem:[#allocation2 + $0x2a4] sm:$0xf]  ;;  %v4850_v46 = vld [vmem:[#allocation2 + $0x288] sm:$0xf0] }
0x318c   :  { %v4877_v23 = vor.u32 %v5030_v43, %v4874_v32  ;;  %v4562_v43 = vld [vmem:[#allocation2 + $0x48] sm:$0xf0] }
0x318d   :  { %v3439_v9 = vpack.c.bf16 %v6433_v27, %v6433_v27  ;;  %v4754_v32 = vld [vmem:[#allocation2 + $0x1c8] sm:$0xf0] }
0x318e   :  { %4162 = vmatpush.bf16.msra.mxu0 %v4877_v23  ;;  %v4536_v23 = vld [vmem:[#allocation2] sm:$0xf] }
0x318f   :  { %3441 = vrot.lane.b32.xlu0 %v3439_v9, %s5497_s11  ;;  %v4849_v9 = vor.u32 %v5027_v30, %v4848_v17  ;;  %v4753_v17 = vor.u32 %v5003_v52, %v4752_v14  ;;  %v4949_v30 = vld [vmem:[#allocation2 + $0x14] sm:$0xf0]  ;;  %v4832_v14 = vld [vmem:[#allocation2 + $0x248] sm:$0xf]  ;;  %v5022_v52 = vld [vmem:[#allocation2 + $0x25c] sm:$0xf0] }
0x3191   :  { %4137 = vmatpush.bf16.msra.mxu3 %v4849_v9  ;;  %v4538_v9 = vld [vmem:[#allocation2 + $0x18] sm:$0xf0] }
0x31ab   :  { %v3422_v5 = vpop.permute.xlu2 %3421 }
0x31ac   :  { %4531 = vmatmul.msk.bf16.vlgmr.msrb.gmra.mxu2 %vm200_vm3, %v3422_v5  ;;  %v4661_v5 = vor.u32 %v4976_v11, %v4658_v4  ;;  %v4728_v11 = vld [vmem:[#allocation2 + $0x180] sm:$0xf]  ;;  %v4565_v4 = vor.u32 %v4952_v42, %v4562_v43  ;;  %v4971_v42 = vld [vmem:[#allocation2 + $0xcc] sm:$0xf]  ;;  %v4642_v43 = vld [vmem:[#allocation2 + $0xe0] sm:$0xf0] }
0x31ae   :  { %4150 = vmatpush.bf16.msra.mxu2 %v4661_v5  ;;  %v4994_v5 = vld [vmem:[#allocation2 + $0x184] sm:$0xf] }
0x3201   :  { %v3442_v13 = vpop.permute.xlu0 %3441 }
0x3202   :  { %4532 = vmatmul.msk.bf16.vlgmr.msrb.gmra.mxu0 %vm200_vm3, %v3442_v13  ;;  %v4632_v13 = vld [vmem:[#allocation2 + $0xc0] sm:$0xf] }
0x322f   :  { %v3435_v18 = vpop.f32.mrf.mxu2 }
0x3237   :  { %v3437_v19 = vpop.f32.mrf.mxu2 }
0x3238   :  { %v4824_v19 = vld [vmem:[#allocation2 + $0x240] sm:$0xf] }
0x327f   :  { %v3455_v20 = vpop.f32.mrf.mxu0 }
0x3280   :  { %v3459_v22 = vadd.f32 %v3455_v20, %v3435_v18  ;;  %v4973_v18 = vld [vmem:[#allocation2 + $0xd4] sm:$0xf0]  ;;  %v4853_v20 = vor.u32 %v5024_v0, %v4850_v46  ;;  %v4757_v0 = vor.u32 %v5000_v44, %v4754_v32  ;;  %v4946_v46 = vld [vmem:[#allocation2 + $0x4] sm:$0xf]  ;;  %v5019_v44 = vld [vmem:[#allocation2 + $0x24c] sm:$0xf] }
0x3281   :  { %v4834_v32 = vld [vmem:[#allocation2 + $0x260] sm:$0xf0] }
0x3282   :  { %v3460_v40 = vadd.f32 %v6419_v34, %v3459_v22  ;;  %v5021_v22 = vld [vmem:[#allocation2 + $0x254] sm:$0xf0]  ;;  %4163 = vmatpush.bf16.msra.mxu0 %v4853_v20  ;;  %v4537_v20 = vor.u32 %v4949_v30, %v4536_v23  ;;  %v4645_v23 = vor.u32 %v4971_v42, %v4642_v43 }
0x3283   :  { %v4616_v30 = vld [vmem:[#allocation2 + $0x98] sm:$0xf] }
0x3284   :  { %5444 = vtanh.f32 %v3460_v40  ;;  %v4533_v6 = vmul.f32 -1.442695, %v3460_v40  ;;  %v4970_v40 = vld [vmem:[#allocation2 + $0xc4] sm:$0xf] }
0x3286   :  { %5446 = vpow2.f32 %v4533_v6  ;;  %v4633_v6 = vor.u32 %v4973_v18, %v4632_v13  ;;  %v4730_v13 = vld [vmem:[#allocation2 + $0x198] sm:$0xf0]  ;;  %v4712_v18 = vld [vmem:[#allocation2 + $0x158] sm:$0xf] }
0x3287   :  { %v3457_v24 = vpop.f32.mrf.mxu0 }
0x3288   :  { %v4634_v24 = vld [vmem:[#allocation2 + $0xd8] sm:$0xf0]  ;;  %4125 = vmatpush.bf16.msrb.mxu1 %v4633_v6 }
0x3289   :  { %v5037_v6 = vld [vmem:[#allocation2 + $0x2dc] sm:$0xf] }
0x328a   :  { %v5445_v28 = vpop.eup %5444 }
0x328b   :  { %3483 = vrot.lane.b32.xlu1 %v5445_v28, %s5491_s4  ;;  %v5018_v28 = vld [vmem:[#allocation2 + $0x244] sm:$0xf] }
0x328c   :  { %v5447_v8 = vpop.eup %5446 }
0x328d   :  { %v3464_v1 = vadd.f32 1.0, %v5447_v8  ;;  %v4825_v8 = vor.u32 %v5021_v22, %v4824_v19  ;;  %v4992_v19 = vld [vmem:[#allocation2 + $0x16c] sm:$0xf0]  ;;  %v4904_v22 = vld [vmem:[#allocation2 + $0x2d8] sm:$0xf] }
0x328f   :  { %5448 = vrcp.f32 %v3464_v1  ;;  %v3476_v7 = vand.u32 2147483648, %v3464_v1  ;;  %vm3470_vm11 = vweird.f32 %v3464_v1  ;;  %v3474_v2 = vand.u32 2147483647, %v3464_v1  ;;  %4138 = vmatpush.bf16.msra.mxu3 %v4825_v8  ;;  %v4906_v8 = vld [vmem:[#allocation2 + $0x2f0] sm:$0xf0] }
0x3291   :  { %v3477_v26 = vor.u32 1.1754944e-38, %v3476_v7  ;;  %vm3475_vm13 = vcmp.eq.f32.partialorder %v3474_v2, 8.507059e+37  ;;  %v5015_v7 = vld [vmem:[#allocation2 + $0x224] sm:$0xf0]  ;;  %v4964_v2 = vld [vmem:[#allocation2 + $0x94] sm:$0xf] }
0x3293   :  { %5076 = vrot.lane.b32.xlu1 %v5075_v36, %s5497_s11  ;;  %v4826_v36 = vld [vmem:[#allocation2 + $0x258] sm:$0xf0] }
0x3295   :  { %v5449_v39 = vpop.eup %5448 }
0x3296   :  { %v3466_v25 = vmul.f32 %v5449_v39, %v3464_v1  ;;  %vm3471_vm10 = vweird.f32 %v5449_v39  ;;  %v4637_v1 = vor.u32 %v4970_v40, %v4634_v24  ;;  %v5040_v40 = vld [vmem:[#allocation2 + $0x2ec] sm:$0xf0]  ;;  %v4989_v24 = vld [vmem:[#allocation2 + $0x15c] sm:$0xf] }
0x3297   :  { %vm3472_vm12 = vmor %vm3470_vm11, %vm3471_vm10 }
0x3298   :  { %v3467_v57 = vsub.f32 1.0, %v3466_v25  ;;  %v4967_v25 = vld [vmem:[#allocation2 + $0xa4] sm:$0xf0]  ;;  %4151 = vmatpush.bf16.msra.mxu2 %v4637_v1  ;;  %v4541_v1 = vor.u32 %v4946_v46, %v4538_v9  ;;  %v4965_v46 = vld [vmem:[#allocation2 + $0x9c] sm:$0xf] }
0x3299   :  { %v4618_v9 = vld [vmem:[#allocation2 + $0xb0] sm:$0xf0] }
0x329a   :  { %v3468_v58 = vmul.f32 %v5449_v39, %v3467_v57  ;;  %v4800_v57 = vld [vmem:[#allocation2 + $0x210] sm:$0xf] }
0x329b   :  { %v4801_v16 = vor.u32 %v5015_v7, %v4800_v57  ;;  %v4713_v57 = vor.u32 %v4992_v19, %v4712_v18  ;;  %v4986_v7 = vld [vmem:[#allocation2 + $0x13c] sm:$0xf0]  ;;  %v5013_v18 = vld [vmem:[#allocation2 + $0x21c] sm:$0xf]  ;;  %v4810_v19 = vld [vmem:[#allocation2 + $0x230] sm:$0xf0] }
0x329c   :  { %v3469_v34 = vadd.f32 %v5449_v39, %v3468_v58 }
0x329d   :  { %4139 = vmatpush.bf16.msra.mxu3 %v4801_v16  ;;  %v4882_v16 = vld [vmem:[#allocation2 + $0x2c0] sm:$0xf0] }
0x329e   :  { %v3473_v59 = vsel %vm3472_vm12, %v5449_v39, %v3469_v34  ;;  %v4608_v39 = vld [vmem:[#allocation2 + $0x90] sm:$0xf]  ;;  %v4829_v34 = vor.u32 %v5018_v28, %v4826_v36  ;;  %v4729_v28 = vor.u32 %v4997_v60, %v4728_v11  ;;  %v4714_v36 = vld [vmem:[#allocation2 + $0x170] sm:$0xf0]  ;;  %v4808_v60 = vld [vmem:[#allocation2 + $0x218] sm:$0xf] }
0x329f   :  { %v6445_v53 = vsel %vm3475_vm13, %v3477_v26, %v3473_v59  ;;  %v4610_v59 = vld [vmem:[#allocation2 + $0xa8] sm:$0xf0]  ;;  %v4609_v31 = vor.u32 %v4967_v25, %v4608_v39  ;;  %v4733_v39 = vor.u32 %v4994_v5, %v4730_v13  ;;  %v5085_v25 = vpack.i.bf16 %v6433_v27, %v6318_v12  ;;  %v4968_v11 = vld [vmem:[#allocation2 + $0xac] sm:$0xf0] }
0x32a0   :  { %v3481_v58 = vmul.f32 %v6445_v53, %v6428_v10  ;;  %v4613_v62 = vor.u32 %v4964_v2, %v4610_v59  ;;  %4164 = vmatpush.bf16.msra.mxu0 %v4829_v34  ;;  %v4688_v34 = vld [vmem:[#allocation2 + $0x128] sm:$0xf]  ;;  %v4717_v2 = vor.u32 %v4989_v24, %v4714_v36  ;;  %v4909_v59 = vor.u32 %v5037_v6, %v4906_v8  ;;  %v4959_v8 = vld [vmem:[#allocation2 + $0x6c] sm:$0xf] }
0x32a1   :  { %4126 = vmatpush.bf16.msrb.mxu1 %v4609_v31  ;;  %4140 = vmatpush.bf16.msra.mxu3 %v4777_v51  ;;  %v5031_v31 = vld [vmem:[#allocation2 + $0x2ac] sm:$0xf]  ;;  %v4689_v12 = vor.u32 %v4986_v7, %v4688_v34  ;;  %v4857_v51 = vor.u32 %v5028_v54, %v4856_v50  ;;  %v4621_v13 = vor.u32 %v4965_v46, %v4618_v9  ;;  %v4784_v24 = vld [vmem:[#allocation2 + $0x1e8] sm:$0xf]  ;;  %v4568_v34 = vld [vmem:[#allocation2 + $0x38] sm:$0xf] }
0x32a2   :  { %4152 = vmatpush.bf16.msra.mxu2 %v4613_v62  ;;  %v4664_v62 = vld [vmem:[#allocation2 + $0xf8] sm:$0xf]  ;;  %v4956_v7 = vld [vmem:[#allocation2 + $0x4c] sm:$0xf0]  ;;  %v4998_v50 = vld [vmem:[#allocation2 + $0x19c] sm:$0xf0] }
0x32a3   :  { %v4947_v54 = vld [vmem:[#allocation2 + $0xc] sm:$0xf]  ;;  %v4722_v9 = vld [vmem:[#allocation2 + $0x178] sm:$0xf0] }
0x32a5   :  { %4127 = vmatpush.bf16.msrb.mxu1 %v4585_v61  ;;  %4141 = vmatpush.bf16.msra.mxu3 %v4753_v17  ;;  %v4665_v61 = vor.u32 %v4980_v21, %v4664_v62  ;;  %v4837_v17 = vor.u32 %v5019_v44, %v4834_v32  ;;  %v4544_v62 = vld [vmem:[#allocation2 + $0x8] sm:$0xf]  ;;  %v4950_v21 = vld [vmem:[#allocation2 + $0x1c] sm:$0xf0] }
0x32a6   :  { %4153 = vmatpush.bf16.msra.mxu2 %v4589_v56  ;;  %v4669_v56 = vor.u32 %v4977_v63, %v4666_v48  ;;  %v4546_v63 = vld [vmem:[#allocation2 + $0x20] sm:$0xf0] }
0x32a9   :  { %4128 = vmatpush.bf16.msrb.mxu1 %v4561_v35  ;;  %4142 = vmatpush.bf16.msra.mxu3 %v4729_v28  ;;  %v4833_v35 = vor.u32 %v5022_v52, %v4832_v14  ;;  %v5010_v28 = vld [vmem:[#allocation2 + $0x1fc] sm:$0xf0] }
0x32aa   :  { %4154 = vmatpush.bf16.msra.mxu2 %v4565_v4  ;;  %v4617_v4 = vor.u32 %v4968_v11, %v4616_v30  ;;  %v4785_v6 = vor.u32 %v5010_v28, %v4784_v24  ;;  %v4912_v11 = vld [vmem:[#allocation2 + $0x2e0] sm:$0xf]  ;;  %v4987_v28 = vld [vmem:[#allocation2 + $0x144] sm:$0xf0] }
0x32ad   :  { %4129 = vmatpush.bf16.msrb.mxu1 %v4537_v20  ;;  %v4592_v20 = vld [vmem:[#allocation2 + $0x68] sm:$0xf] }
0x32ae   :  { %4155 = vmatpush.bf16.msra.mxu2 %v4541_v1  ;;  %v4594_v1 = vld [vmem:[#allocation2 + $0x80] sm:$0xf0] }
0x32b1   :  { %4174 = vmatpush.bf16.msra.mxu1 %v4713_v57  ;;  %v4786_v57 = vld [vmem:[#allocation2 + $0x200] sm:$0xf0] }
0x32b2   :  { %4200 = vmatpush.bf16.msrb.mxu2 %v4717_v2  ;;  %v4760_v2 = vld [vmem:[#allocation2 + $0x1b8] sm:$0xf] }
0x32b5   :  { %4175 = vmatpush.bf16.msra.mxu1 %v4689_v12  ;;  %v4762_v12 = vld [vmem:[#allocation2 + $0x1d0] sm:$0xf0] }
0x32b9   :  { %4176 = vmatpush.bf16.msra.mxu1 %v4665_v61  ;;  %v4738_v61 = vld [vmem:[#allocation2 + $0x1a0] sm:$0xf0] }
0x32fd   :  { %v3484_v49 = vpop.permute.xlu1 %3483 }
0x32fe   :  { %v3486_v29 = vmul.f32 %v3484_v49, %v6445_v53  ;;  %v5012_v49 = vld [vmem:[#allocation2 + $0x214] sm:$0xf] }
0x3300   :  { %3488 = vrot.lane.b32.xlu2 %v3486_v29, %s5497_s11  ;;  %v4802_v29 = vld [vmem:[#allocation2 + $0x228] sm:$0xf0] }
0x3301   :  { %v4805_v10 = vor.u32 %v5012_v49, %v4802_v29  ;;  %v5034_v49 = vld [vmem:[#allocation2 + $0x2bc] sm:$0xf0]  ;;  %v4983_v29 = vld [vmem:[#allocation2 + $0x12c] sm:$0xf] }
0x3303   :  { %4165 = vmatpush.bf16.msra.mxu0 %v4805_v10  ;;  %v4885_v10 = vor.u32 %v5031_v31, %v4882_v16  ;;  %v5001_v16 = vld [vmem:[#allocation2 + $0x1bc] sm:$0xf] }
0x3307   :  { %4166 = vmatpush.bf16.msra.mxu0 %v4781_v3  ;;  %v4861_v3 = vor.u32 %v5025_v37, %v4858_v38  ;;  %v4549_v37 = vor.u32 %v4947_v54, %v4546_v63  ;;  %v4995_v38 = vld [vmem:[#allocation2 + $0x18c] sm:$0xf]  ;;  %v4840_v54 = vld [vmem:[#allocation2 + $0x250] sm:$0xf]  ;;  %v5023_v63 = vld [vmem:[#allocation2 + $0x264] sm:$0xf0] }
0x3308   :  { %5081 = vrot.lane.b32.xlu2 %v5080_v47, %s5491_s4 }
0x330b   :  { %4167 = vmatpush.bf16.msra.mxu0 %v4757_v0  ;;  %v5016_v0 = vld [vmem:[#allocation2 + $0x22c] sm:$0xf0] }
0x330c   :  { %v4809_v5 = vor.u32 %v5016_v0, %v4808_v60  ;;  %v5041_v60 = vld [vmem:[#allocation2 + $0x2f4] sm:$0xf0] }
0x330d   :  { %v4913_v24 = vor.u32 %v5041_v60, %v4912_v11 }
0x330f   :  { %4168 = vmatpush.bf16.msra.mxu0 %v4733_v39  ;;  %v5007_v39 = vld [vmem:[#allocation2 + $0x1ec] sm:$0xf] }
0x3313   :  { %4213 = vmatpush.bf16.msrb.mxu0 %v4909_v59  ;;  %v4569_v59 = vor.u32 %v4956_v7, %v4568_v34  ;;  %v4672_v7 = vld [vmem:[#allocation2 + $0x100] sm:$0xf] }
0x3317   :  { %4214 = vmatpush.bf16.msrb.mxu0 %v4885_v10  ;;  %v4545_v10 = vor.u32 %v4950_v21, %v4544_v62  ;;  %v4648_v21 = vld [vmem:[#allocation2 + $0xd0] sm:$0xf] }
0x331b   :  { %4215 = vmatpush.bf16.msrb.mxu0 %v4861_v3 }
0x331f   :  { %4216 = vmatpush.bf16.msrb.mxu0 %v4837_v17 }
0x335a   :  { %v3489_v26 = vpop.permute.xlu2 %3488 }
0x335b   :  { %v3491_v47 = vadd.f32 %v3489_v26, %v3481_v58  ;;  %v4905_v58 = vor.u32 %v5040_v40, %v4904_v22  ;;  %v4880_v26 = vld [vmem:[#allocation2 + $0x2a8] sm:$0xf]  ;;  %v4813_v22 = vor.u32 %v5013_v18, %v4810_v19  ;;  %v4962_v40 = vld [vmem:[#allocation2 + $0x7c] sm:$0xf0] }
0x335c   :  { %v4881_v27 = vor.u32 %v5034_v49, %v4880_v26  ;;  %v4593_v36 = vor.u32 %v4962_v40, %v4592_v20  ;;  %v5004_v26 = vld [vmem:[#allocation2 + $0x1cc] sm:$0xf0]  ;;  %v4953_v49 = vld [vmem:[#allocation2 + $0x3c] sm:$0xf] }
0x335d   :  { %5450 = vtanh.f32 %v3491_v47  ;;  %v4690_v47 = vld [vmem:[#allocation2 + $0x140] sm:$0xf0]  ;;  %4187 = vmatpush.bf16.msrb.mxu3 %v4905_v58  ;;  %4217 = vmatpush.bf16.msrb.mxu0 %v4813_v22  ;;  %v4789_v58 = vor.u32 %v5007_v39, %v4786_v57  ;;  %v4984_v39 = vld [vmem:[#allocation2 + $0x134] sm:$0xf] }
0x335e   :  { %v4693_v33 = vor.u32 %v4983_v29, %v4690_v47  ;;  %v4570_v29 = vld [vmem:[#allocation2 + $0x50] sm:$0xf0]  ;;  %v4761_v47 = vor.u32 %v5004_v26, %v4760_v2  ;;  %v4981_v2 = vld [vmem:[#allocation2 + $0x114] sm:$0xf0] }
0x335f   :  { %v4573_v31 = vor.u32 %v4953_v49, %v4570_v29  ;;  %v5032_v57 = vld [vmem:[#allocation2 + $0x2b4] sm:$0xf]  ;;  %v4864_v49 = vld [vmem:[#allocation2 + $0x280] sm:$0xf]  ;;  %v5029_v29 = vld [vmem:[#allocation2 + $0x294] sm:$0xf0] }
0x3360   :  { %4201 = vmatpush.bf16.msrb.mxu2 %v4693_v33  ;;  %v4736_v33 = vld [vmem:[#allocation2 + $0x188] sm:$0xf]  ;;  %v4865_v62 = vor.u32 %v5029_v29, %v4864_v49  ;;  %v4948_v49 = vld [vmem:[#allocation2 + $0x14] sm:$0xf]  ;;  %v4554_v29 = vld [vmem:[#allocation2 + $0x28] sm:$0xf0] }
0x3361   :  { %4188 = vmatpush.bf16.msrb.mxu3 %v4881_v27  ;;  %4218 = vmatpush.bf16.msrb.mxu0 %v4789_v58  ;;  %v4765_v27 = vor.u32 %v5001_v16, %v4762_v12  ;;  %v4737_v48 = vor.u32 %v4998_v50, %v4736_v33  ;;  %v5026_v16 = vld [vmem:[#allocation2 + $0x284] sm:$0xf]  ;;  %v4866_v12 = vld [vmem:[#allocation2 + $0x298] sm:$0xf0]  ;;  %v4975_v33 = vld [vmem:[#allocation2 + $0xe4] sm:$0xf0] }
0x3362   :  { %v4869_v50 = vor.u32 %v5026_v16, %v4866_v12 }
0x3363   :  { %v5451_v45 = vpop.eup %5450 }
0x3364   :  { %3494 = vrot.lane.b32.xlu0 %v5451_v45, %s5491_s4  ;;  %v4641_v45 = vor.u32 %v4974_v55, %v4640_v41  ;;  %4202 = vmatpush.bf16.msrb.mxu2 %v4669_v56  ;;  %v5082_v55 = vpop.permute.xlu2 %5081  ;;  %v5077_v56 = vpop.permute.xlu1 %5076 }
0x3365   :  { %4189 = vmatpush.bf16.msrb.mxu3 %v4857_v51  ;;  %4219 = vmatpush.bf16.msrb.mxu0 %v4765_v27  ;;  %v4741_v51 = vor.u32 %v4995_v38, %v4738_v61  ;;  %v5084_v3 = vunpack.i.h.bf16 %v5082_v55  ;;  %v5083_v14 = vunpack.i.l.bf16 %v5082_v55  ;;  %v5079_v52 = vunpack.i.h.bf16 %v5077_v56  ;;  %v5020_v38 = vld [vmem:[#allocation2 + $0x254] sm:$0xf]  ;;  %v4842_v61 = vld [vmem:[#allocation2 + $0x268] sm:$0xf0]  ;;  %v4624_v55 = vld [vmem:[#allocation2 + $0xa0] sm:$0xf] }
0x3366   :  { %4177 = vmatpush.bf16.msra.mxu1 %v4641_v45  ;;  %v5078_v42 = vunpack.i.l.bf16 %v5077_v56  ;;  %v4720_v45 = vld [vmem:[#allocation2 + $0x160] sm:$0xf]  ;;  %v4673_v27 = vor.u32 %v4981_v2, %v4672_v7  ;;  %v4969_v56 = vld [vmem:[#allocation2 + $0xb4] sm:$0xf0] }
0x3368   :  { %4203 = vmatpush.bf16.msrb.mxu2 %v4645_v23  ;;  %v3527_v23 = vsel %vm200_vm3, %v5079_v52, %v5084_v3  ;;  %v3522_v17 = vsel %vm200_vm3, %v5078_v42, %v5083_v14  ;;  %v4845_v14 = vor.u32 %v5020_v38, %v4842_v61  ;;  %v4816_v52 = vld [vmem:[#allocation2 + $0x220] sm:$0xf]  ;;  %v5017_v42 = vld [vmem:[#allocation2 + $0x234] sm:$0xf0]  ;;  %vm4288_vm3 = vcmask 1041408  }
0x3369   :  { %4190 = vmatpush.bf16.msrb.mxu3 %v4833_v35  ;;  %4220 = vmatpush.bf16.msrb.mxu0 %v4741_v51  ;;  %v4993_v35 = vld [vmem:[#allocation2 + $0x174] sm:$0xf0]  ;;  %v4649_v51 = vor.u32 %v4975_v33, %v4648_v21 }
0x336a   :  { %4178 = vmatpush.bf16.msra.mxu1 %v4617_v4  ;;  %v4990_v4 = vld [vmem:[#allocation2 + $0x164] sm:$0xf]  ;;  %v4721_v40 = vor.u32 %v4993_v35, %v4720_v45  ;;  %v4818_v45 = vld [vmem:[#allocation2 + $0x238] sm:$0xf0]  ;;  %v4625_v35 = vor.u32 %v4969_v56, %v4624_v55 }
0x336c   :  { %5086 = vrot.lane.b32.xlu0 %v5085_v25, %s5485_s1  ;;  %4204 = vmatpush.bf16.msrb.mxu2 %v4621_v13  ;;  %v4597_v25 = vor.u32 %v4959_v8, %v4594_v1  ;;  %v4914_v13 = vld [vmem:[#allocation2 + $0x2f8] sm:$0xf0]  ;;  %v4888_v8 = vld [vmem:[#allocation2 + $0x2b0] sm:$0xf]  ;;  %v5035_v1 = vld [vmem:[#allocation2 + $0x2c4] sm:$0xf0] }
0x336d   :  { %4191 = vmatpush.bf16.msrb.mxu3 %v4809_v5  ;;  %v5038_v5 = vld [vmem:[#allocation2 + $0x2e4] sm:$0xf]  ;;  %v4889_v34 = vor.u32 %v5035_v1, %v4888_v8  ;;  %v4578_v1 = vld [vmem:[#allocation2 + $0x58] sm:$0xf0] }
0x336e   :  { %4179 = vmatpush.bf16.msra.mxu1 %v4593_v36  ;;  %v4725_v36 = vor.u32 %v4990_v4, %v4722_v9  ;;  %v4792_v4 = vld [vmem:[#allocation2 + $0x1f0] sm:$0xf]  ;;  %v4602_v9 = vld [vmem:[#allocation2 + $0x88] sm:$0xf0]  ;;  %v4954_v8 = vld [vmem:[#allocation2 + $0x44] sm:$0xf] }
0x336f   :  { %v4581_v7 = vor.u32 %v4954_v8, %v4578_v1 }
0x3370   :  { %4205 = vmatpush.bf16.msrb.mxu2 %v4597_v25  ;;  %v4698_v25 = vld [vmem:[#allocation2 + $0x148] sm:$0xf0] }
0x3371   :  { %4192 = vmatpush.bf16.msrb.mxu3 %v4785_v6  ;;  %v4917_v6 = vor.u32 %v5038_v5, %v4914_v13  ;;  %v5008_v5 = vld [vmem:[#allocation2 + $0x1f4] sm:$0xf]  ;;  %v4794_v13 = vld [vmem:[#allocation2 + $0x208] sm:$0xf0] }
0x3372   :  { %4180 = vmatpush.bf16.msra.mxu1 %v4569_v59  ;;  %v4701_v59 = vor.u32 %v4984_v39, %v4698_v25  ;;  %v5002_v39 = vld [vmem:[#allocation2 + $0x1c4] sm:$0xf]  ;;  %v4770_v25 = vld [vmem:[#allocation2 + $0x1d8] sm:$0xf0] }
0x3373   :  { %v4773_v2 = vor.u32 %v5002_v39, %v4770_v25 }
0x3374   :  { %4206 = vmatpush.bf16.msrb.mxu2 %v4573_v31  ;;  %v4674_v31 = vld [vmem:[#allocation2 + $0x118] sm:$0xf0] }
0x3375   :  { %4193 = vmatpush.bf16.msrb.mxu3 %v4761_v47  ;;  %v4978_v47 = vld [vmem:[#allocation2 + $0x104] sm:$0xf] }
0x3376   :  { %4181 = vmatpush.bf16.msra.mxu1 %v4545_v10  ;;  %v4677_v10 = vor.u32 %v4978_v47, %v4674_v31  ;;  %v4996_v47 = vld [vmem:[#allocation2 + $0x194] sm:$0xf]  ;;  %v4746_v31 = vld [vmem:[#allocation2 + $0x1a8] sm:$0xf0] }
0x3378   :  { %4207 = vmatpush.bf16.msrb.mxu2 %v4549_v37  ;;  %v4650_v37 = vld [vmem:[#allocation2 + $0xe8] sm:$0xf0] }
0x3379   :  { %4194 = vmatpush.bf16.msrb.mxu3 %v4737_v48  ;;  %v4972_v48 = vld [vmem:[#allocation2 + $0xd4] sm:$0xf] }
0x337a   :  { %v4653_v3 = vor.u32 %v4972_v48, %v4650_v37  ;;  %v3628_v48 = vld [vmem:[%s6516_s24] sm:$0x3f] }
0x337b   :  { %v3631_v37 = vperm.slane %v3628_v48, 1  ;;  %v3632_v56 = vperm.slane %v3628_v48, 2 }
0x33d6   :  { %v3495_v41 = vpop.permute.xlu0 %3494 }
0x33d7   :  { %v3497_v30 = vmul.f32 %v3495_v41, %v6445_v53  ;;  %v4696_v53 = vld [vmem:[#allocation2 + $0x130] sm:$0xf]  ;;  %v4841_v41 = vor.u32 %v5023_v63, %v4840_v54 }
0x33d8   :  { %v4697_v58 = vor.u32 %v4987_v28, %v4696_v53  ;;  %v4797_v28 = vor.u32 %v5008_v5, %v4794_v13 }
0x33de   :  { %v5087_v43 = vpop.permute.xlu0 %5086 }
0x33df   :  { %v5089_v44 = vunpack.i.h.bf16 %v5087_v43  ;;  %v5088_v32 = vunpack.i.l.bf16 %v5087_v43  ;;  %v4966_v43 = vld [vmem:[#allocation2 + $0xa4] sm:$0xf] }
0x33e1   :  { %v3528_v0 = vsel %vm3523_vm14, %v3527_v23, %v5089_v44  ;;  %v3524_v46 = vsel %vm3523_vm14, %v3522_v17, %v5088_v32  ;;  %v4626_v44 = vld [vmem:[#allocation2 + $0xb8] sm:$0xf0]  ;;  %v5014_v32 = vld [vmem:[#allocation2 + $0x224] sm:$0xf]  ;;  %v4817_v23 = vor.u32 %v5017_v42, %v4816_v52  ;;  %v4600_v17 = vld [vmem:[#allocation2 + $0x70] sm:$0xf] }
0x33e2   :  { %v3529_v18 = vsel %vm3525_vm15, %v3528_v0, %v3497_v30  ;;  %v3526_v19 = vsel %vm3525_vm15, %v3524_v46, %v6350_v15  ;;  %v4890_v15 = vld [vmem:[#allocation2 + $0x2c8] sm:$0xf0]  ;;  %v4963_v30 = vld [vmem:[#allocation2 + $0x84] sm:$0xf0]  ;;  %v4629_v11 = vor.u32 %v4966_v43, %v4626_v44  ;;  %v4821_v60 = vor.u32 %v5014_v32, %v4818_v45  ;;  %v4960_v46 = vld [vmem:[#allocation2 + $0x74] sm:$0xf] }
0x33e3   :  { %v6464_v20 = vpack.c.bf16 %v3529_v18, %v3529_v18  ;;  %v6466_v22 = vpack.c.bf16 %v3526_v19, %v3526_v19  ;;  %v4893_v26 = vor.u32 %v5032_v57, %v4890_v15  ;;  %v5011_v0 = vld [vmem:[#allocation2 + $0x204] sm:$0xf0]  ;;  %v4601_v18 = vor.u32 %v4963_v30, %v4600_v17 }
0x33e4   :  { %v4793_v19 = vor.u32 %v5011_v0, %v4792_v4  ;;  %v4605_v53 = vor.u32 %v4960_v46, %v4602_v9 }
0x33e5   :  { %4130 = vmatmul.bf16.vlgmr.msrb.gmra.mxu1 %v6466_v22  ;;  %4143 = vmatmul.bf16.vlgmr.msra.gmra.mxu3 %v6464_v20 }
0x33e6   :  { %4156 = vmatmul.bf16.vlgmr.msra.gmra.mxu2 %v6466_v22  ;;  %4169 = vmatmul.bf16.vlgmr.msra.gmra.mxu0 %v6464_v20 }
0x33e7   :  { %4226 = vmatpush.bf16.msrb.mxu1 %v4721_v40  ;;  %4239 = vmatpush.bf16.msra.mxu3 %v4913_v24  ;;  %v4576_v40 = vld [vmem:[#allocation2 + $0x40] sm:$0xf]  ;;  %v4957_v24 = vld [vmem:[#allocation2 + $0x54] sm:$0xf0] }
0x33e8   :  { %4252 = vmatpush.bf16.msra.mxu2 %v4725_v36  ;;  %4265 = vmatpush.bf16.msra.mxu0 %v4917_v6  ;;  %v4768_v36 = vld [vmem:[#allocation2 + $0x1c0] sm:$0xf]  ;;  %v5005_v6 = vld [vmem:[#allocation2 + $0x1d4] sm:$0xf0]  ;;  %v4577_v57 = vor.u32 %v4957_v24, %v4576_v40  ;;  %v3634_v40 = vperm.slane %v3628_v48, 4 }
0x33e9   :  { %v4769_v15 = vor.u32 %v5005_v6, %v4768_v36 }
0x33eb   :  { %4227 = vmatpush.bf16.msrb.mxu1 %v4697_v58  ;;  %4240 = vmatpush.bf16.msra.mxu3 %v4889_v34  ;;  %v4552_v58 = vld [vmem:[#allocation2 + $0x10] sm:$0xf]  ;;  %v4951_v34 = vld [vmem:[#allocation2 + $0x24] sm:$0xf0] }
0x33ec   :  { %4253 = vmatpush.bf16.msra.mxu2 %v4701_v59  ;;  %4266 = vmatpush.bf16.msra.mxu0 %v4893_v26  ;;  %v4744_v59 = vld [vmem:[#allocation2 + $0x190] sm:$0xf]  ;;  %v4999_v26 = vld [vmem:[#allocation2 + $0x1a4] sm:$0xf0]  ;;  %v4553_v16 = vor.u32 %v4951_v34, %v4552_v58 }
0x33ed   :  { %v4745_v12 = vor.u32 %v4999_v26, %v4744_v59 }
0x33ef   :  { %4228 = vmatpush.bf16.msrb.mxu1 %v4673_v27  ;;  %4241 = vmatpush.bf16.msra.mxu3 %v4865_v62  ;;  %v4557_v27 = vor.u32 %v4948_v49, %v4554_v29  ;;  %v4749_v62 = vor.u32 %v4996_v47, %v4746_v31 }
0x33f0   :  { %4254 = vmatpush.bf16.msra.mxu2 %v4677_v10  ;;  %4267 = vmatpush.bf16.msra.mxu0 %v4869_v50 }
0x33f3   :  { %4229 = vmatpush.bf16.msrb.mxu1 %v4649_v51  ;;  %4242 = vmatpush.bf16.msra.mxu3 %v4841_v41 }
0x33f4   :  { %4255 = vmatpush.bf16.msra.mxu2 %v4653_v3  ;;  %4268 = vmatpush.bf16.msra.mxu0 %v4845_v14  ;;  %v3630_v3 = vperm.slane %v3628_v48, 0 }
0x33f5   :  { %4182 = vmatmul.bf16.vlgmr.msra.gmra.mxu1 %v6466_v22  ;;  %4195 = vmatmul.bf16.vlgmr.msrb.gmra.mxu3 %v6464_v20 }
0x33f6   :  { %4208 = vmatmul.bf16.vlgmr.msrb.gmra.mxu2 %v6466_v22  ;;  %4221 = vmatmul.bf16.vlgmr.msrb.gmra.mxu0 %v6464_v20 }
0x33f7   :  { %4230 = vmatpush.bf16.msrb.mxu1 %v4625_v35  ;;  %4243 = vmatpush.bf16.msra.mxu3 %v4817_v23 }
0x33f8   :  { %4256 = vmatpush.bf16.msra.mxu2 %v4629_v11  ;;  %4269 = vmatpush.bf16.msra.mxu0 %v4821_v60 }
0x33fb   :  { %4231 = vmatpush.bf16.msrb.mxu1 %v4601_v18  ;;  %4244 = vmatpush.bf16.msra.mxu3 %v4793_v19  ;;  %v3635_v19 = vperm.slane %v3628_v48, 5 }
0x33fc   :  { %4257 = vmatpush.bf16.msra.mxu2 %v4605_v53  ;;  %4270 = vmatpush.bf16.msra.mxu0 %v4797_v28 }
0x33ff   :  { %4232 = vmatpush.bf16.msrb.mxu1 %v4577_v57  ;;  %4245 = vmatpush.bf16.msra.mxu3 %v4769_v15 }
0x3400   :  { %4258 = vmatpush.bf16.msra.mxu2 %v4581_v7  ;;  %4271 = vmatpush.bf16.msra.mxu0 %v4773_v2 }
0x3403   :  { %4233 = vmatpush.bf16.msrb.mxu1 %v4553_v16  ;;  %4246 = vmatpush.bf16.msra.mxu3 %v4745_v12 }
0x3404   :  { %4259 = vmatpush.bf16.msra.mxu2 %v4557_v27  ;;  %4272 = vmatpush.bf16.msra.mxu0 %v4749_v62 }
0x3406   :  { %4234 = vmatmul.bf16.vlgmr.msrb.gmra.mxu1 %v6466_v22  ;;  %4247 = vmatmul.bf16.vlgmr.msra.gmra.mxu3 %v6464_v20 }
0x3407   :  { %4260 = vmatmul.bf16.vlgmr.msra.gmra.mxu2 %v6466_v22  ;;  %4273 = vmatmul.bf16.vlgmr.msra.gmra.mxu0 %v6464_v20  ;;  %v3633_v22 = vperm.slane %v3628_v48, 3 }
0x3462   :  { %v4131_v21 = vpop.f32.mrf.mxu1 }
0x3463   :  { %v4170_v33 = vpop.f32.mrf.mxu0  ;;  %v4132_v35 = vadd.f32 %v4131_v21, %v3630_v3 }
0x3468   :  { %v4144_v10 = vpop.f32.mrf.mxu3 }
0x3469   :  { %v4157_v50 = vpop.f32.mrf.mxu2  ;;  %v4145_v30 = vadd.f32 %v4144_v10, %v4132_v35 }
0x346a   :  { %v4133_v54 = vpop.f32.mrf.mxu1  ;;  %v4158_v55 = vadd.f32 %v4157_v50, %v3631_v37 }
0x346b   :  { %v4172_v63 = vpop.f32.mrf.mxu0 }
0x346c   :  { %v4171_v20 = vadd.f32 %v4170_v33, %v4158_v55 }
0x346e   :  { %v4284_v23 = vrot.slane %v4171_v20, 6 }
0x3470   :  { %v4146_v38 = vpop.f32.mrf.mxu3  ;;  %v4289_v4 = vsel %vm4288_vm3, %v4145_v30, %v4284_v23 }
0x3471   :  { %v4159_v61 = vpop.f32.mrf.mxu2 }
0x3472   :  { %v4183_v51 = vpop.f32.mrf.mxu1 }
0x3473   :  { %v4222_v41 = vpop.f32.mrf.mxu0  ;;  %v4184_v14 = vadd.f32 %v4183_v51, %v3632_v56 }
0x3478   :  { %v4196_v52 = vpop.f32.mrf.mxu3 }
0x3479   :  { %v4209_v42 = vpop.f32.mrf.mxu2  ;;  %v4197_v43 = vadd.f32 %v4196_v52, %v4184_v14 }
0x347a   :  { %v4210_v44 = vadd.f32 %v4209_v42, %v3633_v22  ;;  %v4185_v32 = vpop.f32.mrf.mxu1 }
0x347b   :  { %v4224_v45 = vpop.f32.mrf.mxu0  ;;  %v4285_v11 = vrot.slane %v4197_v43, 4 }
0x347c   :  { %v4223_v17 = vadd.f32 %v4222_v41, %v4210_v44 }
0x347e   :  { %v4286_v60 = vrot.slane %v4223_v17, 2 }
0x3480   :  { %v4291_v0 = vsel %vm4290_vm0, %v4285_v11, %v4286_v60  ;;  %v4198_v46 = vpop.f32.mrf.mxu3 }
0x3481   :  { %v4292_v9 = vsel %vm159_vm1, %v4289_v4, %v4291_v0  ;;  %v4211_v5 = vpop.f32.mrf.mxu2 }
0x3482   :  { %4296 = vst [vmem:[%s6517_s25] sm:$0xff] %v4292_v9 }
0x3483   :  { %v4235_v13 = vpop.f32.mrf.mxu1 }
0x3484   :  { %v4274_v18 = vpop.f32.mrf.mxu0  ;;  %v4236_v8 = vadd.f32 %v4235_v13, %v3634_v40 }
0x3489   :  { %v4248_v24 = vpop.f32.mrf.mxu3 }
0x348a   :  { %v4261_v53 = vpop.f32.mrf.mxu2  ;;  %v4249_v39 = vadd.f32 %v4248_v24, %v4236_v8 }
0x348b   :  { %v4262_v28 = vadd.f32 %v4261_v53, %v3635_v19  ;;  %v4237_v36 = vpop.f32.mrf.mxu1 }
0x348c   :  { %v4276_v6 = vpop.f32.mrf.mxu0 }
0x348d   :  { %v4275_v1 = vadd.f32 %v4274_v18, %v4262_v28 }
0x348f   :  { %v4287_v25 = vrot.slane %v4275_v1, 6 }
0x3491   :  { %v4293_v57 = vsel %vm4288_vm3, %v4249_v39, %v4287_v25  ;;  %v4250_v15 = vpop.f32.mrf.mxu3 }
0x3492   :  { %4297 = vst [vmem:[%s6517_s25 + $0x8] sm:$0xf] %v4293_v57  ;;  %v4263_v58 = vpop.f32.mrf.mxu2 }
0x3493   :  { %4306 = vsyncpa [#allocation3], 1 }

</bundles_post_ra>
